<compile_context>
chip_gen: v5e
topology: v5e:2x2
jax: 0.10.0
libtpu: 0.0.40
codegen_flags: <defaults>
</compile_context>

<pallas_src>
import functools

import jax
import jax.numpy as jnp
from jax.experimental import pallas as pl
from jax.experimental.pallas import tpu as pltpu


# -----------------------------------------------------------------------------
# Kernel 1: 3x3 "same" conv on one image, with
#   - optional fused input affine + ReLU (previous stage's folded BatchNorm),
#   - in-kernel zero halo (VMEM scratch),
#   - im2col scratch -> single wide-K MXU matmul,
#   - per-program partial batch stats (sum, sum of squares).
# -----------------------------------------------------------------------------
def _conv_kernel(*refs, fuse_input_act, compute_dtype):
    if fuse_input_act:
        (x_ref, w_ref, scale_ref, shift_ref,
         y_ref, psum_ref, pssq_ref, xpad_ref, col_ref) = refs
    else:
        (x_ref, w_ref,
         y_ref, psum_ref, pssq_ref, xpad_ref, col_ref) = refs

    _, H, W, Cout = y_ref.shape
    Cin = x_ref.shape[3]

    a = x_ref[0].astype(jnp.float32)                        # (H, W, Cin)
    if fuse_input_act:
        # Folded BN + ReLU of the previous stage, applied on the fly (f32 on VPU).
        s = scale_ref[...].reshape(1, 1, Cin)
        b = shift_ref[...].reshape(1, 1, Cin)
        a = jnp.maximum(a * s + b, 0.0)

    # Zero halo inside VMEM (replaces wrapper-side jnp.pad -> no extra HBM traffic).
    xpad_ref[...] = jnp.zeros_like(xpad_ref)
    xpad_ref[1:H + 1, 1:W + 1, :] = a

    # im2col into VMEM scratch: one (H*W, 9*Cin) @ (9*Cin, Cout) matmul instead of
    # nine K=Cin matmuls. (compute_dtype may be bf16 for v6e/v7x; f32 default keeps
    # exact PyTorch numerics. Accumulation is always f32.)
    for dy in range(3):
        for dx in range(3):
            j = dy * 3 + dx
            patch = xpad_ref[dy:dy + H, dx:dx + W, :].reshape(H * W, Cin)
            col_ref[:, j * Cin:(j + 1) * Cin] = patch.astype(col_ref.dtype)

    acc = jnp.dot(col_ref[...], w_ref[...].astype(compute_dtype),
                  preferred_element_type=jnp.float32)        # (H*W, Cout) f32

    # NOTE: at realistic DoubleConv widths (Cout >= 64/128) this store is
    # lane-dense; the tiny Cout=8 demo shape is the worst case.
    y_ref[...] = acc.reshape(1, H, W, Cout)

    # Per-program partial statistics -> no cross-step accumulation, so the batch
    # grid axis can be 'parallel' (v7x megacore). Reduced in the wrapper.
    psum_ref[...] = jnp.sum(acc, axis=0, keepdims=True).reshape(1, 1, Cout)
    pssq_ref[...] = jnp.sum(acc * acc, axis=0, keepdims=True).reshape(1, 1, Cout)


def conv3x3_bn_stats(x, w, in_scale=None, in_shift=None,
                     compute_dtype=jnp.float32):
    """x: (N,H,W,Cin) f32; w: (3,3,Cin,Cout) HWIO.
    Returns (y, partial_sum, partial_ssq) with partials of shape (N,1,Cout)."""
    N, H, W, Cin = x.shape
    Cout = w.shape[-1]
    # (dy, dx, cin) flattening order matches the im2col column order in the kernel.
    w_flat = w.reshape(9 * Cin, Cout).astype(compute_dtype)

    fuse = in_scale is not None
    kernel = functools.partial(_conv_kernel, fuse_input_act=fuse,
                               compute_dtype=compute_dtype)

    in_specs = [
        pl.BlockSpec((1, H, W, Cin), lambda n: (n, 0, 0, 0)),
        pl.BlockSpec((9 * Cin, Cout), lambda n: (0, 0)),
    ]
    args = [x, w_flat]
    if fuse:
        in_specs += [pl.BlockSpec((1, Cin), lambda n: (0, 0)),
                     pl.BlockSpec((1, Cin), lambda n: (0, 0))]
        args += [in_scale.reshape(1, Cin).astype(jnp.float32),
                 in_shift.reshape(1, Cin).astype(jnp.float32)]

    out_shape = (
        jax.ShapeDtypeStruct((N, H, W, Cout), jnp.float32),
        jax.ShapeDtypeStruct((N, 1, Cout), jnp.float32),
        jax.ShapeDtypeStruct((N, 1, Cout), jnp.float32),
    )
    out_specs = [
        pl.BlockSpec((1, H, W, Cout), lambda n: (n, 0, 0, 0)),
        pl.BlockSpec((1, 1, Cout), lambda n: (n, 0, 0)),
        pl.BlockSpec((1, 1, Cout), lambda n: (n, 0, 0)),
    ]
    return pl.pallas_call(
        kernel,
        out_shape=out_shape,
        grid_spec=pltpu.PrefetchScalarGridSpec(
            num_scalar_prefetch=0,
            grid=(N,),
            in_specs=in_specs,
            out_specs=out_specs,
            scratch_shapes=[
                pltpu.VMEM((H + 2, W + 2, Cin), jnp.float32),   # zero-halo input
                pltpu.VMEM((H * W, 9 * Cin), compute_dtype),    # im2col
            ],
        ),
        compiler_params=pltpu.CompilerParams(
            dimension_semantics=("parallel",),
            vmem_limit_bytes=64 * 1024 * 1024),
    )(*args)


# -----------------------------------------------------------------------------
# Kernel 2: final fused BN + ReLU epilogue on a lane-dense (rows, W*C) slab.
# -----------------------------------------------------------------------------
def _bn_relu_kernel(y_ref, s_ref, b_ref, o_ref):
    o_ref[...] = jnp.maximum(y_ref[...] * s_ref[...] + b_ref[...], 0.0)


def bn_relu_fused(y_nhwc, scale, shift):
    N, H, W, C = y_nhwc.shape
    R, F = N * H, W * C                      # lane-dense last dim (mult. of 128 here)
    y2d = y_nhwc.reshape(R, F)               # contiguous reshape: free
    s_row = jnp.tile(scale.reshape(1, C), (1, W))   # channel pattern along flat W*C
    b_row = jnp.tile(shift.reshape(1, C), (1, W))
    tR = 8 if R % 8 == 0 else R              # 8-aligned sublane tile when possible

    out = pl.pallas_call(
        _bn_relu_kernel,
        out_shape=jax.ShapeDtypeStruct((R, F), jnp.float32),
        grid_spec=pltpu.PrefetchScalarGridSpec(
            num_scalar_prefetch=0,
            grid=(R // tR,),
            in_specs=[
                pl.BlockSpec((tR, F), lambda i: (i, 0)),
                pl.BlockSpec((1, F), lambda i: (0, 0)),   # stays resident
                pl.BlockSpec((1, F), lambda i: (0, 0)),
            ],
            out_specs=pl.BlockSpec((tR, F), lambda i: (i, 0)),
        ),
        compiler_params=pltpu.CompilerParams(
            dimension_semantics=("parallel",)),
    )(y2d, s_row, b_row)
    return out.reshape(N, H, W, C)


# -----------------------------------------------------------------------------
# Glue: reduce partial stats, fold (gamma, beta) into per-channel scale/shift.
# -----------------------------------------------------------------------------
def fold_bn(psum, pssq, gamma, beta, count, eps=1e-5):
    s = jnp.sum(psum, axis=(0, 1))                       # (C,)
    q = jnp.sum(pssq, axis=(0, 1))
    mean = s / count
    var = jnp.maximum(q / count - mean * mean, 0.0)      # biased var, clamped >= 0
    inv = gamma / jnp.sqrt(var + eps)
    return inv, beta - mean * inv                        # scale, shift


def double_conv(x_nchw, w1, g1, b1, w2, g2, b2, eps=1e-5,
                compute_dtype=jnp.float32):
    x = jnp.transpose(x_nchw, (0, 2, 3, 1)).astype(jnp.float32)   # NCHW -> NHWC
    N, H, W, _ = x.shape
    count = float(N * H * W)

    # Stage 1: conv1 + partial batch stats (halo handled in-kernel; no jnp.pad).
    y1, s1, q1 = conv3x3_bn_stats(x, w1, compute_dtype=compute_dtype)
    sc1, sh1 = fold_bn(s1, q1, g1, b1, count, eps)

    # Stage 2: BN1+ReLU1 fused into conv2's input path + conv2 + partial stats.
    y2, s2, q2 = conv3x3_bn_stats(y1, w2, sc1, sh1, compute_dtype=compute_dtype)
    sc2, sh2 = fold_bn(s2, q2, g2, b2, count, eps)

    # Stage 3: lane-dense fused BN2 + ReLU2 epilogue.
    out = bn_relu_fused(y2, sc2, sh2)

    # Final NHWC -> NCHW only to match the PyTorch interface; a real pipeline
    # would keep NHWC for the consumer (saves one HBM round trip).
    return jnp.transpose(out, (0, 3, 1, 2))


# -----------------------------------------------------------------------------
# Pure-JAX reference (XLA conv) for correctness check.
# -----------------------------------------------------------------------------
def ref_double_conv(x_nchw, w1, w2, g1, b1, g2, b2, eps=1e-5):
    x = jnp.transpose(x_nchw, (0, 2, 3, 1))

    def conv(a, w):
        return jax.lax.conv_general_dilated(
            a, w, (1, 1), ((1, 1), (1, 1)),
            dimension_numbers=("NHWC", "HWIO", "NHWC"))

    def bnr(a, g, b):
        m = jnp.mean(a, axis=(0, 1, 2))
        v = jnp.var(a, axis=(0, 1, 2))
        return jnp.maximum((a - m) / jnp.sqrt(v + eps) * g + b, 0.0)

    y = bnr(conv(x, w1), g1, b1)
    y = bnr(conv(y, w2), g2, b2)
    return jnp.transpose(y, (0, 3, 1, 2))


if __name__ == "__main__":
    key = jax.random.PRNGKey(0)
    N, Cin, Cout, H, W = 2, 4, 8, 16, 16
    k1, k2, k3, k4, k5, k6, k7 = jax.random.split(key, 7)

    x = jax.random.normal(k1, (N, Cin, H, W), jnp.float32)
    w1 = 0.2 * jax.random.normal(k2, (3, 3, Cin, Cout), jnp.float32)   # conv1 (HWIO)
    w2 = 0.2 * jax.random.normal(k3, (3, 3, Cout, Cout), jnp.float32)  # conv2 (HWIO)
    g1 = 1.0 + 0.1 * jax.random.normal(k4, (Cout,), jnp.float32)
    b1 = 0.1 * jax.random.normal(k5, (Cout,), jnp.float32)
    g2 = 1.0 + 0.1 * jax.random.normal(k6, (Cout,), jnp.float32)
    b2 = 0.1 * jax.random.normal(k7, (Cout,), jnp.float32)

    out = double_conv(x, w1, g1, b1, w2, g2, b2)
    out = jax.block_until_ready(out)

    ref = jax.block_until_ready(ref_double_conv(x, w1, w2, g1, b1, g2, b2))
    assert out.shape == (N, Cout, H, W)
    assert jnp.allclose(out, ref, atol=1e-3, rtol=1e-3), \
        float(jnp.max(jnp.abs(out - ref)))

    print("KERNEL_OK")
</pallas_src>

<mosaic_0001>
module attributes {stable_mosaic.version = 11 : i64} {
  func.func @_conv_kernel(%arg0: i32, %arg1: memref<1x16x16x4xf32, #tpu.memory_space<vmem>>, %arg2: memref<36x8xf32, #tpu.memory_space<vmem>>, %arg3: memref<1x16x16x8xf32, #tpu.memory_space<vmem>>, %arg4: memref<1x1x8xf32, #tpu.memory_space<vmem>>, %arg5: memref<1x1x8xf32, #tpu.memory_space<vmem>>, %arg6: memref<18x18x4xf32, #tpu.memory_space<vmem>>, %arg7: memref<256x36xf32, #tpu.memory_space<vmem>>) attributes {dimension_semantics = [#tpu.dimension_semantics<parallel>], iteration_bounds = array<i64: 2>, scalar_prefetch = 0 : i64, scratch_operands = 2 : i64, tpu.core_type = #tpu.core_type<tc>, window_params = [{transform_indices = @transform_0, window_bounds = array<i64: 1, 16, 16, 4>}, {pipeline_mode = #tpu.pipeline_mode<synchronous>, transform_indices = @transform_1, window_bounds = array<i64: 36, 8>}, {transform_indices = @transform_2, window_bounds = array<i64: 1, 16, 16, 8>}, {transform_indices = @transform_3, window_bounds = array<i64: 1, 1, 8>}, {transform_indices = @transform_4, window_bounds = array<i64: 1, 1, 8>}]} {
    %c0 = arith.constant 0 : index
    %c0_0 = arith.constant 0 : index
    %c0_1 = arith.constant 0 : index
    %c0_2 = arith.constant 0 : index
    %0 = vector.load %arg1[%c0, %c0_0, %c0_1, %c0_2] : memref<1x16x16x4xf32, #tpu.memory_space<vmem>>, vector<1x16x16x4xf32>
    %1 = vector.shape_cast %0 : vector<1x16x16x4xf32> to vector<16x16x4xf32>
    %cst = arith.constant 0.000000e+00 : f32
    %2 = vector.broadcast %cst : f32 to vector<18x18x4xf32>
    %c0_3 = arith.constant 0 : index
    %c0_4 = arith.constant 0 : index
    %c0_5 = arith.constant 0 : index
    %3 = vector.load %arg6[%c0_3, %c0_4, %c0_5] : memref<18x18x4xf32, #tpu.memory_space<vmem>>, vector<18x18x4xf32>
    tpu.vector_store %arg6[%c0_3, %c0_4, %c0_5], %2 {strides = array<i32>} : memref<18x18x4xf32, #tpu.memory_space<vmem>>, vector<18x18x4xf32>,
    %c1 = arith.constant 1 : index
    %c1_6 = arith.constant 1 : index
    %c0_7 = arith.constant 0 : index
    %4 = vector.load %arg6[%c1, %c1_6, %c0_7] : memref<18x18x4xf32, #tpu.memory_space<vmem>>, vector<16x16x4xf32>
    tpu.vector_store %arg6[%c1, %c1_6, %c0_7], %1 {strides = array<i32>} : memref<18x18x4xf32, #tpu.memory_space<vmem>>, vector<16x16x4xf32>,
    %c0_8 = arith.constant 0 : index
    %c0_9 = arith.constant 0 : index
    %c0_10 = arith.constant 0 : index
    %5 = vector.load %arg6[%c0_8, %c0_9, %c0_10] : memref<18x18x4xf32, #tpu.memory_space<vmem>>, vector<16x16x4xf32>
    %6 = vector.shape_cast %5 : vector<16x16x4xf32> to vector<256x4xf32>
    %c0_11 = arith.constant 0 : index
    %c0_12 = arith.constant 0 : index
    %7 = vector.load %arg7[%c0_11, %c0_12] : memref<256x36xf32, #tpu.memory_space<vmem>>, vector<256x4xf32>
    tpu.vector_store %arg7[%c0_11, %c0_12], %6 {strides = array<i32>} : memref<256x36xf32, #tpu.memory_space<vmem>>, vector<256x4xf32>,
    %c0_13 = arith.constant 0 : index
    %c1_14 = arith.constant 1 : index
    %c0_15 = arith.constant 0 : index
    %8 = vector.load %arg6[%c0_13, %c1_14, %c0_15] : memref<18x18x4xf32, #tpu.memory_space<vmem>>, vector<16x16x4xf32>
    %9 = vector.shape_cast %8 : vector<16x16x4xf32> to vector<256x4xf32>
    %c0_16 = arith.constant 0 : index
    %c4 = arith.constant 4 : index
    %10 = vector.load %arg7[%c0_16, %c4] : memref<256x36xf32, #tpu.memory_space<vmem>>, vector<256x4xf32>
    tpu.vector_store %arg7[%c0_16, %c4], %9 {strides = array<i32>} : memref<256x36xf32, #tpu.memory_space<vmem>>, vector<256x4xf32>,
    %c0_17 = arith.constant 0 : index
    %c2 = arith.constant 2 : index
    %c0_18 = arith.constant 0 : index
    %11 = vector.load %arg6[%c0_17, %c2, %c0_18] : memref<18x18x4xf32, #tpu.memory_space<vmem>>, vector<16x16x4xf32>
    %12 = vector.shape_cast %11 : vector<16x16x4xf32> to vector<256x4xf32>
    %c0_19 = arith.constant 0 : index
    %c8 = arith.constant 8 : index
    %13 = vector.load %arg7[%c0_19, %c8] : memref<256x36xf32, #tpu.memory_space<vmem>>, vector<256x4xf32>
    tpu.vector_store %arg7[%c0_19, %c8], %12 {strides = array<i32>} : memref<256x36xf32, #tpu.memory_space<vmem>>, vector<256x4xf32>,
    %c1_20 = arith.constant 1 : index
    %c0_21 = arith.constant 0 : index
    %c0_22 = arith.constant 0 : index
    %14 = vector.load %arg6[%c1_20, %c0_21, %c0_22] : memref<18x18x4xf32, #tpu.memory_space<vmem>>, vector<16x16x4xf32>
    %15 = vector.shape_cast %14 : vector<16x16x4xf32> to vector<256x4xf32>
    %c0_23 = arith.constant 0 : index
    %c12 = arith.constant 12 : index
    %16 = vector.load %arg7[%c0_23, %c12] : memref<256x36xf32, #tpu.memory_space<vmem>>, vector<256x4xf32>
    tpu.vector_store %arg7[%c0_23, %c12], %15 {strides = array<i32>} : memref<256x36xf32, #tpu.memory_space<vmem>>, vector<256x4xf32>,
    %c1_24 = arith.constant 1 : index
    %c1_25 = arith.constant 1 : index
    %c0_26 = arith.constant 0 : index
    %17 = vector.load %arg6[%c1_24, %c1_25, %c0_26] : memref<18x18x4xf32, #tpu.memory_space<vmem>>, vector<16x16x4xf32>
    %18 = vector.shape_cast %17 : vector<16x16x4xf32> to vector<256x4xf32>
    %c0_27 = arith.constant 0 : index
    %c16 = arith.constant 16 : index
    %19 = vector.load %arg7[%c0_27, %c16] : memref<256x36xf32, #tpu.memory_space<vmem>>, vector<256x4xf32>
    tpu.vector_store %arg7[%c0_27, %c16], %18 {strides = array<i32>} : memref<256x36xf32, #tpu.memory_space<vmem>>, vector<256x4xf32>,
    %c1_28 = arith.constant 1 : index
    %c2_29 = arith.constant 2 : index
    %c0_30 = arith.constant 0 : index
    %20 = vector.load %arg6[%c1_28, %c2_29, %c0_30] : memref<18x18x4xf32, #tpu.memory_space<vmem>>, vector<16x16x4xf32>
    %21 = vector.shape_cast %20 : vector<16x16x4xf32> to vector<256x4xf32>
    %c0_31 = arith.constant 0 : index
    %c20 = arith.constant 20 : index
    %22 = vector.load %arg7[%c0_31, %c20] : memref<256x36xf32, #tpu.memory_space<vmem>>, vector<256x4xf32>
    tpu.vector_store %arg7[%c0_31, %c20], %21 {strides = array<i32>} : memref<256x36xf32, #tpu.memory_space<vmem>>, vector<256x4xf32>,
    %c2_32 = arith.constant 2 : index
    %c0_33 = arith.constant 0 : index
    %c0_34 = arith.constant 0 : index
    %23 = vector.load %arg6[%c2_32, %c0_33, %c0_34] : memref<18x18x4xf32, #tpu.memory_space<vmem>>, vector<16x16x4xf32>
    %24 = vector.shape_cast %23 : vector<16x16x4xf32> to vector<256x4xf32>
    %c0_35 = arith.constant 0 : index
    %c24 = arith.constant 24 : index
    %25 = vector.load %arg7[%c0_35, %c24] : memref<256x36xf32, #tpu.memory_space<vmem>>, vector<256x4xf32>
    tpu.vector_store %arg7[%c0_35, %c24], %24 {strides = array<i32>} : memref<256x36xf32, #tpu.memory_space<vmem>>, vector<256x4xf32>,
    %c2_36 = arith.constant 2 : index
    %c1_37 = arith.constant 1 : index
    %c0_38 = arith.constant 0 : index
    %26 = vector.load %arg6[%c2_36, %c1_37, %c0_38] : memref<18x18x4xf32, #tpu.memory_space<vmem>>, vector<16x16x4xf32>
    %27 = vector.shape_cast %26 : vector<16x16x4xf32> to vector<256x4xf32>
    %c0_39 = arith.constant 0 : index
    %c28 = arith.constant 28 : index
    %28 = vector.load %arg7[%c0_39, %c28] : memref<256x36xf32, #tpu.memory_space<vmem>>, vector<256x4xf32>
    tpu.vector_store %arg7[%c0_39, %c28], %27 {strides = array<i32>} : memref<256x36xf32, #tpu.memory_space<vmem>>, vector<256x4xf32>,
    %c2_40 = arith.constant 2 : index
    %c2_41 = arith.constant 2 : index
    %c0_42 = arith.constant 0 : index
    %29 = vector.load %arg6[%c2_40, %c2_41, %c0_42] : memref<18x18x4xf32, #tpu.memory_space<vmem>>, vector<16x16x4xf32>
    %30 = vector.shape_cast %29 : vector<16x16x4xf32> to vector<256x4xf32>
    %c0_43 = arith.constant 0 : index
    %c32 = arith.constant 32 : index
    %31 = vector.load %arg7[%c0_43, %c32] : memref<256x36xf32, #tpu.memory_space<vmem>>, vector<256x4xf32>
    tpu.vector_store %arg7[%c0_43, %c32], %30 {strides = array<i32>} : memref<256x36xf32, #tpu.memory_space<vmem>>, vector<256x4xf32>,
    %c0_44 = arith.constant 0 : index
    %c0_45 = arith.constant 0 : index
    %32 = vector.load %arg7[%c0_44, %c0_45] : memref<256x36xf32, #tpu.memory_space<vmem>>, vector<256x36xf32>
    %c0_46 = arith.constant 0 : index
    %c0_47 = arith.constant 0 : index
    %33 = vector.load %arg2[%c0_46, %c0_47] : memref<36x8xf32, #tpu.memory_space<vmem>>, vector<36x8xf32>
    %cst_48 = arith.constant dense<0.000000e+00> : vector<256x8xf32>
    %34 = tpu.matmul %32, %33, %cst_48 {dimension_numbers = #tpu.dot_dimension_numbers<[1], [0], [0], [1], [0, 0, 1, 1], [], []>} : vector<256x36xf32>, vector<36x8xf32>, vector<256x8xf32> -> vector<256x8xf32>
    %35 = vector.shape_cast %34 : vector<256x8xf32> to vector<1x16x16x8xf32>
    %c0_49 = arith.constant 0 : index
    %c0_50 = arith.constant 0 : index
    %c0_51 = arith.constant 0 : index
    %c0_52 = arith.constant 0 : index
    %36 = vector.load %arg3[%c0_49, %c0_50, %c0_51, %c0_52] : memref<1x16x16x8xf32, #tpu.memory_space<vmem>>, vector<1x16x16x8xf32>
    tpu.vector_store %arg3[%c0_49, %c0_50, %c0_51, %c0_52], %35 {strides = array<i32>} : memref<1x16x16x8xf32, #tpu.memory_space<vmem>>, vector<1x16x16x8xf32>,
    %cst_53 = arith.constant dense<0.000000e+00> : vector<8xf32>
    %37 = vector.multi_reduction <add>, %34, %cst_53 [0] : vector<256x8xf32> to vector<8xf32>
    %38 = vector.shape_cast %37 : vector<8xf32> to vector<1x8xf32>
    %39 = vector.shape_cast %38 : vector<1x8xf32> to vector<1x1x8xf32>
    %c0_54 = arith.constant 0 : index
    %c0_55 = arith.constant 0 : index
    %c0_56 = arith.constant 0 : index
    %40 = vector.load %arg4[%c0_54, %c0_55, %c0_56] : memref<1x1x8xf32, #tpu.memory_space<vmem>>, vector<1x1x8xf32>
    tpu.vector_store %arg4[%c0_54, %c0_55, %c0_56], %39 {strides = array<i32>} : memref<1x1x8xf32, #tpu.memory_space<vmem>>, vector<1x1x8xf32>,
    %41 = arith.mulf %34, %34 : vector<256x8xf32>
    %cst_57 = arith.constant dense<0.000000e+00> : vector<8xf32>
    %42 = vector.multi_reduction <add>, %41, %cst_57 [0] : vector<256x8xf32> to vector<8xf32>
    %43 = vector.shape_cast %42 : vector<8xf32> to vector<1x8xf32>
    %44 = vector.shape_cast %43 : vector<1x8xf32> to vector<1x1x8xf32>
    %c0_58 = arith.constant 0 : index
    %c0_59 = arith.constant 0 : index
    %c0_60 = arith.constant 0 : index
    %45 = vector.load %arg5[%c0_58, %c0_59, %c0_60] : memref<1x1x8xf32, #tpu.memory_space<vmem>>, vector<1x1x8xf32>
    tpu.vector_store %arg5[%c0_58, %c0_59, %c0_60], %44 {strides = array<i32>} : memref<1x1x8xf32, #tpu.memory_space<vmem>>, vector<1x1x8xf32>,
    return
  }
  func.func @transform_0(%arg0: i32) -> (i32, i32, i32, i32) {
    %c0_i32 = arith.constant 0 : i32
    %c0_i32_0 = arith.constant 0 : i32
    %c0_i32_1 = arith.constant 0 : i32
    %c0_i32_2 = arith.constant 0 : i32
    return %arg0, %c0_i32, %c0_i32_0, %c0_i32_1 : i32, i32, i32, i32
  }
  func.func @transform_1(%arg0: i32) -> (i32, i32) {
    %c0_i32 = arith.constant 0 : i32
    %c0_i32_0 = arith.constant 0 : i32
    %c0_i32_1 = arith.constant 0 : i32
    return %c0_i32, %c0_i32_0 : i32, i32
  }
  func.func @transform_2(%arg0: i32) -> (i32, i32, i32, i32) {
    %c0_i32 = arith.constant 0 : i32
    %c0_i32_0 = arith.constant 0 : i32
    %c0_i32_1 = arith.constant 0 : i32
    %c0_i32_2 = arith.constant 0 : i32
    return %arg0, %c0_i32, %c0_i32_0, %c0_i32_1 : i32, i32, i32, i32
  }
  func.func @transform_3(%arg0: i32) -> (i32, i32, i32) {
    %c0_i32 = arith.constant 0 : i32
    %c0_i32_0 = arith.constant 0 : i32
    %c0_i32_1 = arith.constant 0 : i32
    return %arg0, %c0_i32, %c0_i32_0 : i32, i32, i32
  }
  func.func @transform_4(%arg0: i32) -> (i32, i32, i32) {
    %c0_i32 = arith.constant 0 : i32
    %c0_i32_0 = arith.constant 0 : i32
    %c0_i32_1 = arith.constant 0 : i32
    return %arg0, %c0_i32, %c0_i32_0 : i32, i32, i32
  }
}

</mosaic_0001>

<bundles_post_ra>
// kernel: tpu_custom_call.1
= control target key start
LH: loop header
LB: loop body
LE: loop exit
PB: predicated region body
PF: predicated region fallthrough
CT: control target
= control target key end

     0   :  { %10 = vsyncpa [#allocation5], 0  ;;  %s4260_s0 = inlined_call_operand.vmem [shape: f32[2,16,16,4], index: 0, kind: input, shape index: {}]   ;;  %s4261_s1 = inlined_call_operand.vmem [shape: f32[36,8], index: 1, kind: input, shape index: {}]   ;;  %s4262_s2 = inlined_call_operand.vmem [shape: f32[2,16,16,8], index: 2, kind: output, shape index: {0}]   ;;  %s4263_s3 = inlined_call_operand.hbm [shape: f32[2,1,8], index: 3, kind: output, shape index: {1}]   ;;  %s4264_s4 = inlined_call_operand.hbm [shape: f32[2,1,8], index: 4, kind: output, shape index: {2}]  }
   0x1   :  { %12 = vsyncpa [#allocation5 + $0x1], 0 }
   0x2   :  { %13 = vsyncpa [#allocation7], 0 }
   0x3   :  { %15 = vsyncpa [#allocation7 + $0x1], 0  ;;  %s2793_s15 = smov 0   ;;  %s2795_s16 = smov 0  }
   0x4   :  { %s2797_s17 = smov 0   ;;  %s2799_s18 = smov 0  }
   0x5 LB: > { %s2814_s19 = sadd.s32 4294967295, %s2757_s18   ;;  %s2550_s20 = sadd.s32 4294967294, %s2757_s18   ;;  %s2757_s18 = sphi %s2799_s18, %s4357_s18   ;;  %s2753_s17 = sphi %s2797_s17, %s4356_s17   ;;  %s2749_s16 = sphi %s2795_s16, %s4355_s16   ;;  %s2745_s15 = sphi %s2793_s15, %s4354_s15  }
   0x6   : > { %s2818_s21 = sadd.s32 1, %s2757_s18   ;;  %s101_s22 = sadd.s32 1, %s2753_s17 }
   0x7   : > { %s98_s23 = ssub.s32 %s2757_s18, %s2818_s21  ;;  %p111_p0 = scmp.ne.s32.totalorder %s2753_s17, %s2749_s16 }
   0x8   : > { %p99_p1 = scmp.eq.s32.totalorder %s98_s23, 0  ;;  %p112_p2 = scmp.eq.s32.totalorder %s2814_s19, 1 }
   0x9   : > { %p117_p3 = scmp.ne.s32.totalorder %s2749_s16, %s2745_s15  ;;  %p118_p4 = scmp.eq.s32.totalorder %s2550_s20, 1 }
   0xa   : > { %s2829_s24 = scalar_select %p99_p1, %s2753_s17, %s101_s22  }
   0xb   : > { %p2831_p5 = por %p112_p2, %p111_p0  ;;  %p2835_p6 = por %p118_p4, %p117_p3 }
   0xc   : > { %p2553_p7 = scmp.ge.s32.totalorder %s2757_s18, 1  ;;  %p173_p8 = scmp.lt.s32.totalorder %s2757_s18, 3 }
   0xe   : > { %p174_p9 = pnand %p2553_p7, %p173_p8 }
  0x10   : > { %177 = sbr.rel (%p174_p9) target bundleno = 1036 (0x40c), region = 28 }
  0x15   : > { %vm249_vm0 = vcmask 31744   ;;  %v2759_v0 = vmov 0.0   ;;  %s2760_s27 = smov 4   ;;  %p207_p10 = scmp.lt.s32.totalorder %s2814_s19, 1  ;;  %vm252_vm1 = vcmask 25600   ;;  %vm562_vm2 = vcmask 64544  }
  0x16   : > { %250 = vst.msk [vmem:[#allocation2] sm:$0xff] %vm249_vm0, %v2759_v0  ;;  %s2761_s7 = smov 8   ;;  %s2762_s8 = smov 12   ;;  %vm755_vm3 = vcmask 97344   ;;  %vm948_vm4 = vcmask 130144   ;;  %vm1141_vm5 = vcmask 162944  }
  0x17   : > { %251 = vst.msk [vmem:[#allocation2 + $0x8] sm:$0xff] %vm249_vm0, %v2759_v0  ;;  %s2892_s28 = scalar_select %p207_p10, %s2814_s19, 1  ;;  %vm1334_vm6 = vcmask 195744   ;;  %vm2081_vm7 = vcmask 1043456   ;;  %vm1528_vm8 = vcmask 228544   ;;  %vm1721_vm9 = vcmask 261344  }
  0x18   : > { %254 = vst.msk [vmem:[#allocation2 + $0x18] sm:$0xff] %vm249_vm0, %v2759_v0  ;;  %s2763_s9 = smov 16   ;;  %s2764_s10 = smov 20   ;;  %vm1914_vm10 = vcmask 294144   ;;  %vm1984_vm11 = vcmask 293888   ;;  %vm2198_vm12 = vcmask 64512  }
  0x19   : > { %255 = vst.msk [vmem:[#allocation2 + $0x20] sm:$0xff] %vm249_vm0, %v2759_v0  ;;  %s2593_s29 = sshll.u32 %s2892_s28, 8  ;;  %s2765_s11 = smov 24   ;;  %vm2300_vm13 = vcmask 57344  }
  0x1a   : > { %257 = vst.msk [vmem:[#allocation2 + $0x30] sm:$0xff] %vm249_vm0, %v2759_v0  ;;  %s2914_s6 = scalar_lea.vmem %s4260_s0, %s2593_s29  ;;  %s2766_s12 = smov 32  }
  0x1b   : > { %258 = vst.msk [vmem:[#allocation2 + $0x38] sm:$0xff] %vm249_vm0, %v2759_v0  ;;  %v217_v2 = vld [vmem:[%s2914_s6] sm:$0xff]  ;;  %v218_v5 = vld [vmem:[%s2914_s6 + $0x8] sm:$0xff]  ;;  %v224_v8 = vld [vmem:[%s2914_s6 + $0x38] sm:$0xff]  ;;  %s2767_s13 = smov 28   ;;  %s3916_s20 = scalar_lea.vmem %s4262_s2, %s2593_s29 }
  0x1c   : > { %260 = vst.msk [vmem:[#allocation2 + $0x48] sm:$0xff] %vm249_vm0, %v2759_v0  ;;  %v221_v6 = vld [vmem:[%s2914_s6 + $0x20] sm:$0xff]  ;;  %v222_v7 = vld [vmem:[%s2914_s6 + $0x28] sm:$0xff]  ;;  %v219_v9 = vld [vmem:[%s2914_s6 + $0x10] sm:$0xff]  ;;  %s4189_s28 = sand.u32 1, %s2749_s16   ;;  %s2438_s22 = scalar_lea.hbm %s4264_s4, %s2814_s19 }
  0x1d   : > { %261 = vst.msk [vmem:[#allocation2 + $0x50] sm:$0xff] %vm249_vm0, %v2759_v0  ;;  %v225_v10 = vld [vmem:[%s2914_s6 + $0x40] sm:$0xff]  ;;  %v227_v11 = vld [vmem:[%s2914_s6 + $0x50] sm:$0xff]  ;;  %v220_v12 = vld [vmem:[%s2914_s6 + $0x18] sm:$0xff]  ;;  %s200_s23 = scalar_lea.vmem [#allocation4], %s4189_s28  ;;  %s206_s5 = scalar_lea.vmem [#allocation6], %s4189_s28 }
  0x1e   : > { %v402_v1 = vld [vmem:[#allocation2 + $0x1] sm:$0xff]  ;;  %263 = vst.msk [vmem:[#allocation2 + $0x60] sm:$0xff] %vm249_vm0, %v2759_v0  ;;  %v228_v13 = vld [vmem:[%s2914_s6 + $0x58] sm:$0xff]  ;;  %v223_v16 = vld [vmem:[%s2914_s6 + $0x30] sm:$0xff]  ;;  %s2683_s29 = scalar_lea.hbm %s4263_s3, 2 }
  0x1f   : > { %466 = vrot.lane.b32.xlu0 %v402_v1, %s2760_s27  ;;  %264 = vst.msk [vmem:[#allocation2 + $0x68] sm:$0xff] %vm249_vm0, %v2759_v0  ;;  %v230_v14 = vld [vmem:[%s2914_s6 + $0x68] sm:$0xff]  ;;  %v231_v18 = vld [vmem:[%s2914_s6 + $0x70] sm:$0xff]  ;;  %v233_v19 = vld [vmem:[%s2914_s6 + $0x80] sm:$0xff] }
  0x20   : > { %266 = vst.msk [vmem:[#allocation2 + $0x78] sm:$0xff] %vm249_vm0, %v2759_v0  ;;  %v226_v20 = vld [vmem:[%s2914_s6 + $0x48] sm:$0xff]  ;;  %v236_v23 = vld [vmem:[%s2914_s6 + $0x98] sm:$0xff]  ;;  %v229_v25 = vld [vmem:[%s2914_s6 + $0x60] sm:$0xff] }
  0x21   : > { %267 = vst.msk [vmem:[#allocation2 + $0x80] sm:$0xff] %vm249_vm0, %v2759_v0  ;;  %v234_v22 = vld [vmem:[%s2914_s6 + $0x88] sm:$0xff]  ;;  %v237_v27 = vld [vmem:[%s2914_s6 + $0xa0] sm:$0xff]  ;;  %v239_v29 = vld [vmem:[%s2914_s6 + $0xb0] sm:$0xff] }
  0x22   : > { %269 = vst.msk [vmem:[#allocation2 + $0x90] sm:$0xff] %vm249_vm0, %v2759_v0  ;;  %v232_v30 = vld [vmem:[%s2914_s6 + $0x78] sm:$0xff]  ;;  %v242_v35 = vld [vmem:[%s2914_s6 + $0xc8] sm:$0xff]  ;;  %v235_v36 = vld [vmem:[%s2914_s6 + $0x90] sm:$0xff] }
  0x23   : > { %270 = vst.msk [vmem:[#allocation2 + $0x98] sm:$0xff] %vm249_vm0, %v2759_v0  ;;  %v240_v33 = vld [vmem:[%s2914_s6 + $0xb8] sm:$0xff]  ;;  %v243_v39 = vld [vmem:[%s2914_s6 + $0xd0] sm:$0xff]  ;;  %v245_v41 = vld [vmem:[%s2914_s6 + $0xe0] sm:$0xff] }
  0x24   : > { %272 = vst.msk [vmem:[#allocation2 + $0xa8] sm:$0xff] %vm249_vm0, %v2759_v0  ;;  %v238_v42 = vld [vmem:[%s2914_s6 + $0xa8] sm:$0xff]  ;;  %v241_v47 = vld [vmem:[%s2914_s6 + $0xc0] sm:$0xff]  ;;  %v244_v51 = vld [vmem:[%s2914_s6 + $0xd8] sm:$0xff] }
  0x25   : > { %273 = vst.msk [vmem:[#allocation2 + $0xb0] sm:$0xff] %vm249_vm0, %v2759_v0  ;;  %v246_v45 = vld [vmem:[%s2914_s6 + $0xe8] sm:$0xff]  ;;  %v338_v62 = vld [vmem:[#allocation2] sm:$0xff] }
  0x26   : > { %275 = vst.msk [vmem:[#allocation2 + $0xc0] sm:$0xff] %vm249_vm0, %v2759_v0 }
  0x27   : > { %276 = vst.msk [vmem:[#allocation2 + $0xc8] sm:$0xff] %vm249_vm0, %v2759_v0 }
  0x28   : > { %278 = vst.msk [vmem:[#allocation2 + $0xd8] sm:$0xff] %vm249_vm0, %v2759_v0 }
  0x29   : > { %279 = vst.msk [vmem:[#allocation2 + $0xe0] sm:$0xff] %vm249_vm0, %v2759_v0 }
  0x2a   : > { %281 = vst.msk [vmem:[#allocation2 + $0xf0] sm:$0xff] %vm249_vm0, %v2759_v0 }
  0x2b   : > { %282 = vst.msk [vmem:[#allocation2 + $0xf8] sm:$0xff] %vm249_vm0, %v2759_v0 }
  0x2c   : > { %284 = vst.msk [vmem:[#allocation2 + $0x108] sm:$0xff] %vm249_vm0, %v2759_v0 }
  0x2d   : > { %285 = vst.msk [vmem:[#allocation2 + $0x110] sm:$0xff] %vm249_vm0, %v2759_v0 }
  0x2e   : > { %287 = vst.msk [vmem:[#allocation2 + $0x120] sm:$0xff] %vm249_vm0, %v2759_v0 }
  0x2f   : > { %288 = vst.msk [vmem:[#allocation2 + $0x128] sm:$0xff] %vm249_vm0, %v2759_v0 }
  0x30   : > { %290 = vst.msk [vmem:[#allocation2 + $0x138] sm:$0xff] %vm249_vm0, %v2759_v0 }
  0x31   : > { %291 = vst.msk [vmem:[#allocation2 + $0x140] sm:$0xff] %vm249_vm0, %v2759_v0 }
  0x32   : > { %293 = vst.msk [vmem:[#allocation2 + $0x150] sm:$0xff] %vm249_vm0, %v2759_v0 }
  0x33   : > { %294 = vst.msk [vmem:[#allocation2 + $0x158] sm:$0xff] %vm249_vm0, %v2759_v0 }
  0x34   : > { %296 = vst.msk [vmem:[#allocation2 + $0x168] sm:$0xff] %vm249_vm0, %v2759_v0 }
  0x35   : > { %297 = vst.msk [vmem:[#allocation2 + $0x170] sm:$0xff] %vm249_vm0, %v2759_v0 }
  0x36   : > { %299 = vst.msk [vmem:[#allocation2 + $0x180] sm:$0xff] %vm249_vm0, %v2759_v0 }
  0x37   : > { %300 = vst.msk [vmem:[#allocation2 + $0x188] sm:$0xff] %vm249_vm0, %v2759_v0 }
  0x38   : > { %302 = vst.msk [vmem:[#allocation2 + $0x198] sm:$0xff] %vm249_vm0, %v2759_v0 }
  0x39   : > { %303 = vst.msk [vmem:[#allocation2 + $0x1a0] sm:$0xff] %vm249_vm0, %v2759_v0 }
  0x3a   : > { %306 = vst.msk [vmem:[#allocation2 + $0x19] sm:$0xff] %vm249_vm0, %v217_v2 }
  0x3b   : > { %253 = vst.msk [vmem:[#allocation2 + $0x10] sm:$0x3] %vm252_vm1, %v2759_v0 }
  0x3c   : > { %256 = vst.msk [vmem:[#allocation2 + $0x28] sm:$0x3] %vm252_vm1, %v2759_v0 }
  0x3d   : > { %259 = vst.msk [vmem:[#allocation2 + $0x40] sm:$0x3] %vm252_vm1, %v2759_v0 }
  0x3e   : > { %262 = vst.msk [vmem:[#allocation2 + $0x58] sm:$0x3] %vm252_vm1, %v2759_v0 }
  0x3f   : > { %265 = vst.msk [vmem:[#allocation2 + $0x70] sm:$0x3] %vm252_vm1, %v2759_v0 }
  0x40   : > { %268 = vst.msk [vmem:[#allocation2 + $0x88] sm:$0x3] %vm252_vm1, %v2759_v0 }
  0x41   : > { %v2940_v3 = vld [vmem:[#allocation2 + $0x19] sm:$0xff]  ;;  %271 = vst.msk [vmem:[#allocation2 + $0xa0] sm:$0x3] %vm252_vm1, %v2759_v0 }
  0x42   : > { %470 = vrot.lane.b32.xlu1 %v2940_v3, %s2760_s27  ;;  %v403_v4 = vld [vmem:[#allocation2 + $0x9] sm:$0xff]  ;;  %274 = vst.msk [vmem:[#allocation2 + $0xb8] sm:$0x3] %vm252_vm1, %v2759_v0 }
  0x43   : > { %468 = vrot.lane.b32.xlu0 %v403_v4, %s2760_s27  ;;  %277 = vst.msk [vmem:[#allocation2 + $0xd0] sm:$0x3] %vm252_vm1, %v2759_v0  ;;  %v596_v1 = vld [vmem:[#allocation2 + $0xa] sm:$0xff]  ;;  %v3148_v4 = vld [vmem:[#allocation2 + $0x18] sm:$0xff] }
  0x44   : > { %280 = vst.msk [vmem:[#allocation2 + $0xe8] sm:$0x3] %vm252_vm1, %v2759_v0 }
  0x45   : > { %283 = vst.msk [vmem:[#allocation2 + $0x100] sm:$0x3] %vm252_vm1, %v2759_v0 }
  0x46   : > { %286 = vst.msk [vmem:[#allocation2 + $0x118] sm:$0x3] %vm252_vm1, %v2759_v0 }
  0x47   : > { %289 = vst.msk [vmem:[#allocation2 + $0x130] sm:$0x3] %vm252_vm1, %v2759_v0 }
  0x48   : > { %292 = vst.msk [vmem:[#allocation2 + $0x148] sm:$0x3] %vm252_vm1, %v2759_v0 }
  0x49   : > { %295 = vst.msk [vmem:[#allocation2 + $0x160] sm:$0x3] %vm252_vm1, %v2759_v0 }
  0x4a   : > { %298 = vst.msk [vmem:[#allocation2 + $0x178] sm:$0x3] %vm252_vm1, %v2759_v0 }
  0x4b   : > { %301 = vst.msk [vmem:[#allocation2 + $0x190] sm:$0x3] %vm252_vm1, %v2759_v0 }
  0x4c   : > { %304 = vst.msk [vmem:[#allocation2 + $0x1a8] sm:$0x3] %vm252_vm1, %v2759_v0 }
  0x4d   : > { %307 = vst.msk [vmem:[#allocation2 + $0x21] sm:$0xff] %vm249_vm0, %v218_v5  ;;  %v339_v5 = vld [vmem:[#allocation2 + $0x8] sm:$0xff] }
  0x4e   : > { %310 = vst.msk [vmem:[#allocation2 + $0x49] sm:$0xff] %vm249_vm0, %v221_v6 }
  0x4f   : > { %311 = vst.msk [vmem:[#allocation2 + $0x51] sm:$0xff] %vm249_vm0, %v222_v7 }
  0x50   : > { %313 = vst.msk [vmem:[#allocation2 + $0x69] sm:$0xff] %vm249_vm0, %v224_v8 }
  0x51   : > { %308 = vst.msk [vmem:[#allocation2 + $0x31] sm:$0xff] %vm249_vm0, %v219_v9  ;;  %v595_v9 = vld [vmem:[#allocation2 + $0x2] sm:$0xff] }
  0x52   : > { %314 = vst.msk [vmem:[#allocation2 + $0x79] sm:$0xff] %vm249_vm0, %v225_v10 }
  0x53   : > { %316 = vst.msk [vmem:[#allocation2 + $0x91] sm:$0xff] %vm249_vm0, %v227_v11 }
  0x54   : > { %v2986_v15 = vld [vmem:[#allocation2 + $0x21] sm:$0xff]  ;;  %309 = vst.msk [vmem:[#allocation2 + $0x39] sm:$0xff] %vm249_vm0, %v220_v12 }
  0x55   : > { %472 = vrot.lane.b32.xlu1 %v2986_v15, %s2760_s27  ;;  %v2992_v17 = vld [vmem:[#allocation2 + $0x49] sm:$0xff]  ;;  %317 = vst.msk [vmem:[#allocation2 + $0x99] sm:$0xff] %vm249_vm0, %v228_v13  ;;  %v3159_v7 = vld [vmem:[#allocation2 + $0x1a] sm:$0xff] }
  0x56   : > { %478 = vrot.lane.b32.xlu0 %v2992_v17, %s2760_s27  ;;  %319 = vst.msk [vmem:[#allocation2 + $0xb1] sm:$0xff] %vm249_vm0, %v230_v14  ;;  %v3010_v24 = vld [vmem:[#allocation2 + $0x51] sm:$0xff]  ;;  %v3167_v10 = vld [vmem:[#allocation2 + $0x20] sm:$0xff]  ;;  %v3171_v11 = vld [vmem:[#allocation2 + $0x48] sm:$0xff] }
  0x57   : > { %312 = vst.msk [vmem:[#allocation2 + $0x61] sm:$0xff] %vm249_vm0, %v223_v16  ;;  %v3014_v26 = vld [vmem:[#allocation2 + $0x69] sm:$0xff]  ;;  %v3182_v14 = vld [vmem:[#allocation2 + $0x52] sm:$0xff] }
  0x58   : > { %v3002_v21 = vld [vmem:[#allocation2 + $0x31] sm:$0xff]  ;;  %320 = vst.msk [vmem:[#allocation2 + $0xc1] sm:$0xff] %vm249_vm0, %v231_v18  ;;  %v3188_v16 = vld [vmem:[#allocation2 + $0x22] sm:$0xff] }
  0x59   : > { %474 = vrot.lane.b32.xlu2 %v3002_v21, %s2760_s27  ;;  %322 = vst.msk [vmem:[#allocation2 + $0xd9] sm:$0xff] %vm249_vm0, %v233_v19  ;;  %v3033_v31 = vld [vmem:[#allocation2 + $0x79] sm:$0xff]  ;;  %v3133_v63 = vld [vmem:[#allocation2 + $0x30] sm:$0xff] }
  0x5a   : > { %315 = vst.msk [vmem:[#allocation2 + $0x81] sm:$0xff] %vm249_vm0, %v226_v20  ;;  %v3035_v32 = vld [vmem:[#allocation2 + $0x91] sm:$0xff] }
  0x5b   : > { %323 = vst.msk [vmem:[#allocation2 + $0xe1] sm:$0xff] %vm249_vm0, %v234_v22  ;;  %v3024_v28 = vld [vmem:[#allocation2 + $0x39] sm:$0xff]  ;;  %v3190_v18 = vld [vmem:[#allocation2 + $0x50] sm:$0xff] }
  0x5c   : > { %325 = vst.msk [vmem:[#allocation2 + $0xf9] sm:$0xff] %vm249_vm0, %v236_v23  ;;  %v3051_v37 = vld [vmem:[#allocation2 + $0x99] sm:$0xff] }
  0x5d   : > { %480 = vrot.lane.b32.xlu1 %v3010_v24, %s2760_s27  ;;  %318 = vst.msk [vmem:[#allocation2 + $0xa9] sm:$0xff] %vm249_vm0, %v229_v25  ;;  %v3053_v38 = vld [vmem:[#allocation2 + $0xb1] sm:$0xff]  ;;  %v3178_v13 = vld [vmem:[#allocation2 + $0x3a] sm:$0xff] }
  0x5e   : > { %484 = vrot.lane.b32.xlu0 %v3014_v26, %s2760_s27  ;;  %326 = vst.msk [vmem:[#allocation2 + $0x109] sm:$0xff] %vm249_vm0, %v237_v27  ;;  %v3043_v34 = vld [vmem:[#allocation2 + $0x61] sm:$0xff]  ;;  %v3152_v6 = vld [vmem:[#allocation2 + $0x38] sm:$0xff] }
  0x5f   : > { %328 = vst.msk [vmem:[#allocation2 + $0x121] sm:$0xff] %vm249_vm0, %v239_v29  ;;  %v3069_v43 = vld [vmem:[#allocation2 + $0xc1] sm:$0xff]  ;;  %v3161_v8 = vld [vmem:[#allocation2 + $0x32] sm:$0xff] }
  0x60   : > { %321 = vst.msk [vmem:[#allocation2 + $0xc9] sm:$0xff] %vm249_vm0, %v232_v30  ;;  %v3071_v44 = vld [vmem:[#allocation2 + $0xd9] sm:$0xff]  ;;  %v3194_v19 = vld [vmem:[#allocation2 + $0x68] sm:$0xff] }
  0x61   : > { %476 = vrot.lane.b32.xlu2 %v3024_v28, %s2760_s27  ;;  %329 = vst.msk [vmem:[#allocation2 + $0x129] sm:$0xff] %vm249_vm0, %v240_v33  ;;  %v3061_v40 = vld [vmem:[#allocation2 + $0x81] sm:$0xff]  ;;  %v3214_v30 = vld [vmem:[#allocation2 + $0x4a] sm:$0xff]  ;;  %v3217_v33 = vld [vmem:[#allocation2 + $0x78] sm:$0xff] }
  0x62   : > { %331 = vst.msk [vmem:[#allocation2 + $0x141] sm:$0xff] %vm249_vm0, %v242_v35  ;;  %v3085_v48 = vld [vmem:[#allocation2 + $0xe1] sm:$0xff]  ;;  %v3221_v35 = vld [vmem:[#allocation2 + $0x90] sm:$0xff] }
  0x63   : > { %324 = vst.msk [vmem:[#allocation2 + $0xf1] sm:$0xff] %vm249_vm0, %v235_v36  ;;  %v3087_v49 = vld [vmem:[#allocation2 + $0xf9] sm:$0xff]  ;;  %v3202_v22 = vld [vmem:[#allocation2 + $0x62] sm:$0xff] }
  0x64   : > { %332 = vst.msk [vmem:[#allocation2 + $0x151] sm:$0xff] %vm249_vm0, %v243_v39  ;;  %v3079_v46 = vld [vmem:[#allocation2 + $0xa9] sm:$0xff]  ;;  %v3176_v12 = vld [vmem:[#allocation2 + $0x60] sm:$0xff] }
  0x65   : > { %486 = vrot.lane.b32.xlu1 %v3033_v31, %s2760_s27  ;;  %334 = vst.msk [vmem:[#allocation2 + $0x169] sm:$0xff] %vm249_vm0, %v245_v41  ;;  %v3099_v52 = vld [vmem:[#allocation2 + $0x109] sm:$0xff]  ;;  %v3200_v20 = vld [vmem:[#allocation2 + $0x80] sm:$0xff] }
  0x66   : > { %490 = vrot.lane.b32.xlu0 %v3035_v32, %s2760_s27  ;;  %327 = vst.msk [vmem:[#allocation2 + $0x111] sm:$0xff] %vm249_vm0, %v238_v42  ;;  %v3101_v53 = vld [vmem:[#allocation2 + $0x121] sm:$0xff] }
  0x67   : > { %335 = vst.msk [vmem:[#allocation2 + $0x171] sm:$0xff] %vm249_vm0, %v246_v45  ;;  %v3093_v50 = vld [vmem:[#allocation2 + $0xc9] sm:$0xff]  ;;  %v3206_v23 = vld [vmem:[#allocation2 + $0x7a] sm:$0xff] }
  0x68   : > { %330 = vst.msk [vmem:[#allocation2 + $0x139] sm:$0xff] %vm249_vm0, %v241_v47  ;;  %v3111_v55 = vld [vmem:[#allocation2 + $0x129] sm:$0xff]  ;;  %v3233_v41 = vld [vmem:[#allocation2 + $0x9a] sm:$0xff] }
  0x69   : > { %482 = vrot.lane.b32.xlu2 %v3043_v34, %s2760_s27  ;;  %333 = vst.msk [vmem:[#allocation2 + $0x159] sm:$0xff] %vm249_vm0, %v244_v51  ;;  %v3113_v56 = vld [vmem:[#allocation2 + $0x141] sm:$0xff]  ;;  %v3240_v45 = vld [vmem:[#allocation2 + $0x6a] sm:$0xff]  ;;  %v3242_v47 = vld [vmem:[#allocation2 + $0x98] sm:$0xff] }
  0x6a   : > { %v3107_v54 = vld [vmem:[#allocation2 + $0xf1] sm:$0xff]  ;;  %370 = vst.msk [vmem:[#allocation3] sm:$0xff] %vm249_vm0, %v338_v62  ;;  %v3227_v36 = vld [vmem:[#allocation2 + $0xa8] sm:$0xff] }
  0x6b   : > { %v3123_v58 = vld [vmem:[#allocation2 + $0x151] sm:$0xff]  ;;  %374 = vst.msk [vmem:[#allocation3 + $0x20] sm:$0xff] %vm249_vm0, %v3133_v63  ;;  %v3229_v39 = vld [vmem:[#allocation2 + $0x82] sm:$0xff] }
  0x6c   : > { %4296 = vst [vmem:[#allocation10_spill] sm:$0xff] %v3123_v58  ;;  %v3125_v59 = vld [vmem:[#allocation2 + $0x169] sm:$0xff] }
  0x6d   : > { %492 = vrot.lane.b32.xlu1 %v3051_v37, %s2760_s27  ;;  %v3119_v57 = vld [vmem:[#allocation2 + $0x111] sm:$0xff]  ;;  %372 = vst.msk [vmem:[#allocation3 + $0x10] sm:$0xff] %vm249_vm0, %v3148_v4 }
  0x6e   : > { %496 = vrot.lane.b32.xlu0 %v3053_v38, %s2760_s27  ;;  %v3141_v0 = vld [vmem:[#allocation2 + $0x171] sm:$0xff]  ;;  %371 = vst.msk [vmem:[#allocation3 + $0x8] sm:$0xff] %vm249_vm0, %v339_v5 }
  0x6f   : > { %v3131_v60 = vld [vmem:[#allocation2 + $0x139] sm:$0xff]  ;;  %4297 = vst [vmem:[#allocation11_spill] sm:$0xff] %v3141_v0  ;;  %v3246_v51 = vld [vmem:[#allocation2 + $0xb0] sm:$0xff] }
  0x70   : > { %v3146_v2 = vld [vmem:[#allocation2 + $0x159] sm:$0xff]  ;;  %375 = vst.msk [vmem:[#allocation3 + $0x28] sm:$0xff] %vm249_vm0, %v3152_v6  ;;  %v3254_v62 = vld [vmem:[#allocation2 + $0xaa] sm:$0xff] }
  0x71   : > { %488 = vrot.lane.b32.xlu2 %v3061_v40, %s2760_s27  ;;  %4298 = vst [vmem:[#allocation12_spill] sm:$0xff] %v3159_v7 }
  0x72   : > { %4299 = vst [vmem:[#allocation13_spill] sm:$0xff] %v3161_v8 }
  0x73   : > { %373 = vst.msk [vmem:[#allocation3 + $0x18] sm:$0xff] %vm249_vm0, %v3167_v10 }
  0x74   : > { %376 = vst.msk [vmem:[#allocation3 + $0x30] sm:$0xff] %vm249_vm0, %v3171_v11 }
  0x75   : > { %498 = vrot.lane.b32.xlu1 %v3069_v43, %s2760_s27  ;;  %4300 = vst [vmem:[#allocation14_spill] sm:$0xff] %v3178_v13 }
  0x76   : > { %502 = vrot.lane.b32.xlu0 %v3071_v44, %s2760_s27  ;;  %378 = vst.msk [vmem:[#allocation3 + $0x40] sm:$0xff] %vm249_vm0, %v3176_v12 }
  0x77   : > { %4301 = vst [vmem:[#allocation15_spill] sm:$0xff] %v3182_v14 }
  0x78   : > { %4302 = vst [vmem:[#allocation16_spill] sm:$0xff] %v3188_v16 }
  0x79   : > { %494 = vrot.lane.b32.xlu2 %v3079_v46, %s2760_s27  ;;  %377 = vst.msk [vmem:[#allocation3 + $0x38] sm:$0xff] %vm249_vm0, %v3190_v18 }
  0x7a   : > { %379 = vst.msk [vmem:[#allocation3 + $0x48] sm:$0xff] %vm249_vm0, %v3194_v19 }
  0x7b   : > { %4303 = vst [vmem:[#allocation17_spill] sm:$0xff] %v3202_v22 }
  0x7c   : > { %381 = vst.msk [vmem:[#allocation3 + $0x58] sm:$0xff] %vm249_vm0, %v3200_v20 }
  0x7d   : > { %504 = vrot.lane.b32.xlu1 %v3085_v48, %s2760_s27  ;;  %4304 = vst [vmem:[#allocation18_spill] sm:$0xff] %v3206_v23 }
  0x7e   : > { %508 = vrot.lane.b32.xlu0 %v3087_v49, %s2760_s27  ;;  %4305 = vst [vmem:[#allocation19_spill] sm:$0xff] %v3214_v30 }
  0x7f   : > { %380 = vst.msk [vmem:[#allocation3 + $0x50] sm:$0xff] %vm249_vm0, %v3217_v33 }
  0x80   : > { %382 = vst.msk [vmem:[#allocation3 + $0x60] sm:$0xff] %vm249_vm0, %v3221_v35 }
  0x81   : > { %500 = vrot.lane.b32.xlu2 %v3093_v50, %s2760_s27  ;;  %4306 = vst [vmem:[#allocation20_spill] sm:$0xff] %v3229_v39 }
  0x82   : > { %384 = vst.msk [vmem:[#allocation3 + $0x70] sm:$0xff] %vm249_vm0, %v3227_v36 }
  0x83   : > { %4307 = vst [vmem:[#allocation21_spill] sm:$0xff] %v3233_v41 }
  0x84   : > { %4308 = vst [vmem:[#allocation22_spill] sm:$0xff] %v3240_v45 }
  0x85   : > { %510 = vrot.lane.b32.xlu1 %v3099_v52, %s2760_s27  ;;  %383 = vst.msk [vmem:[#allocation3 + $0x68] sm:$0xff] %vm249_vm0, %v3242_v47 }
  0x86   : > { %514 = vrot.lane.b32.xlu0 %v3101_v53, %s2760_s27  ;;  %385 = vst.msk [vmem:[#allocation3 + $0x78] sm:$0xff] %vm249_vm0, %v3246_v51 }
  0x87   : > { %4309 = vst [vmem:[#allocation23_spill] sm:$0xff] %v3254_v62 }
  0x89   : > { %506 = vrot.lane.b32.xlu2 %v3107_v54, %s2760_s27 }
  0x8d   : > { %516 = vrot.lane.b32.xlu1 %v3111_v55, %s2760_s27 }
  0x8e   : > { %520 = vrot.lane.b32.xlu0 %v3113_v56, %s2760_s27 }
  0x91   : > { %512 = vrot.lane.b32.xlu2 %v3119_v57, %s2760_s27  ;;  %v467_v61 = vpop.permute.xlu0 %466 }
  0x92   : > { %563 = vst.msk [vmem:[#allocation3] sm:$0xff] %vm562_vm2, %v467_v61  ;;  %v3252_v61 = vld [vmem:[#allocation2 + $0xc8] sm:$0xff] }
  0x93   : > { %387 = vst.msk [vmem:[#allocation3 + $0x88] sm:$0xff] %vm249_vm0, %v3252_v61 }
  0x95   : > { %522 = vrot.lane.b32.xlu1 %v3123_v58, %s2760_s27 }
  0x96   : > { %526 = vrot.lane.b32.xlu0 %v3125_v59, %s2760_s27 }
  0x99   : > { %518 = vrot.lane.b32.xlu2 %v3131_v60, %s2760_s27 }
  0x9d   : > { %528 = vrot.lane.b32.xlu1 %v3141_v0, %s2760_s27 }
  0x9e   : > { %661 = vrot.lane.b32.xlu0 %v596_v1, %s2761_s7  ;;  %v3258_v1 = vld [vmem:[#allocation2 + $0xc2] sm:$0xff] }
  0x9f   : > { %4310 = vst [vmem:[#allocation24_spill] sm:$0xff] %v3258_v1 }
  0xa1   : > { %524 = vrot.lane.b32.xlu2 %v3146_v2, %s2760_s27  ;;  %s4200_s27 = sshll.u32 %s200_s23, 4  ;;  %s2428_s27 = int_to_ptr.vmem [resolvable:$true] %s4200_s27 }
  0xa5   : > { %663 = vrot.lane.b32.xlu1 %v3159_v7, %s2761_s7 }
  0xa6   : > { %667 = vrot.lane.b32.xlu0 %v3161_v8, %s2761_s7 }
  0xa9   : > { %659 = vrot.lane.b32.xlu2 %v595_v9, %s2761_s7  ;;  %v3265_v9 = vld [vmem:[#allocation2 + $0x92] sm:$0xff] }
  0xaa   : > { %4311 = vst [vmem:[#allocation25_spill] sm:$0xff] %v3265_v9 }
  0xad   : > { %669 = vrot.lane.b32.xlu1 %v3178_v13, %s2761_s7 }
  0xae   : > { %673 = vrot.lane.b32.xlu0 %v3182_v14, %s2761_s7 }
  0xb1   : > { %665 = vrot.lane.b32.xlu2 %v3188_v16, %s2761_s7  ;;  %v3380_v16 = vld [vmem:[#allocation2 + $0x168] sm:$0xff] }
  0xb2   : > { %400 = vst.msk [vmem:[#allocation3 + $0xf0] sm:$0xff] %vm249_vm0, %v3380_v16 }
  0xb3   : > { %v475_v25 = vpop.permute.xlu2 %474 }
  0xb4   : > { %567 = vst.msk [vmem:[#allocation3 + $0x20] sm:$0xff] %vm562_vm2, %v475_v25  ;;  %v471_v27 = vpop.permute.xlu1 %470  ;;  %v3267_v25 = vld [vmem:[#allocation2 + $0xc0] sm:$0xff] }
  0xb5   : > { %675 = vrot.lane.b32.xlu1 %v3202_v22, %s2761_s7  ;;  %565 = vst.msk [vmem:[#allocation3 + $0x10] sm:$0xff] %vm562_vm2, %v471_v27  ;;  %v469_v29 = vpop.permute.xlu0 %468 }
  0xb6   : > { %679 = vrot.lane.b32.xlu0 %v3206_v23, %s2761_s7  ;;  %564 = vst.msk [vmem:[#allocation3 + $0x8] sm:$0xff] %vm562_vm2, %v469_v29 }
  0xb7   : > { %386 = vst.msk [vmem:[#allocation3 + $0x80] sm:$0xff] %vm249_vm0, %v3267_v25 }
  0xb9   : > { %671 = vrot.lane.b32.xlu2 %v3214_v30, %s2761_s7  ;;  %v3353_v30 = vld [vmem:[#allocation2 + $0x140] sm:$0xff] }
  0xba   : > { %397 = vst.msk [vmem:[#allocation3 + $0xd8] sm:$0xff] %vm249_vm0, %v3353_v30 }
  0xbb   : > { %v477_v42 = vpop.permute.xlu2 %476 }
  0xbc   : > { %568 = vst.msk [vmem:[#allocation3 + $0x28] sm:$0xff] %vm562_vm2, %v477_v42  ;;  %v3272_v42 = vld [vmem:[#allocation2 + $0xd8] sm:$0xff] }
  0xbd   : > { %681 = vrot.lane.b32.xlu1 %v3229_v39, %s2761_s7  ;;  %388 = vst.msk [vmem:[#allocation3 + $0x90] sm:$0xff] %vm249_vm0, %v3272_v42 }
  0xbe   : > { %685 = vrot.lane.b32.xlu0 %v3233_v41, %s2761_s7 }
  0xc1   : > { %677 = vrot.lane.b32.xlu2 %v3240_v45, %s2761_s7  ;;  %v3326_v45 = vld [vmem:[#allocation2 + $0x120] sm:$0xff] }
  0xc2   : > { %394 = vst.msk [vmem:[#allocation3 + $0xc0] sm:$0xff] %vm249_vm0, %v3326_v45 }
  0xc3   : > { %v483_v5 = vpop.permute.xlu2 %482 }
  0xc4   : > { %571 = vst.msk [vmem:[#allocation3 + $0x40] sm:$0xff] %vm562_vm2, %v483_v5  ;;  %v3277_v5 = vld [vmem:[#allocation2 + $0xf0] sm:$0xff] }
  0xc5   : > { %687 = vrot.lane.b32.xlu1 %v3254_v62, %s2761_s7  ;;  %v3279_v62 = vld [vmem:[#allocation2 + $0xca] sm:$0xff]  ;;  %390 = vst.msk [vmem:[#allocation3 + $0xa0] sm:$0xff] %vm249_vm0, %v3277_v5 }
  0xc6   : > { %691 = vrot.lane.b32.xlu0 %v3258_v1, %s2761_s7  ;;  %4312 = vst [vmem:[#allocation26_spill] sm:$0xff] %v3279_v62  ;;  %v3283_v1 = vld [vmem:[#allocation2 + $0xe2] sm:$0xff] }
  0xc7   : > { %v473_v27 = vpop.permute.xlu1 %472  ;;  %4313 = vst [vmem:[#allocation27_spill] sm:$0xff] %v3283_v1 }
  0xc8   : > { %566 = vst.msk [vmem:[#allocation3 + $0x18] sm:$0xff] %vm562_vm2, %v473_v27  ;;  %v479_v29 = vpop.permute.xlu0 %478  ;;  %v3292_v27 = vld [vmem:[#allocation2 + $0xb2] sm:$0xff] }
  0xc9   : > { %569 = vst.msk [vmem:[#allocation3 + $0x30] sm:$0xff] %vm562_vm2, %v479_v29  ;;  %683 = vrot.lane.b32.xlu2 %v3265_v9, %s2761_s7  ;;  %v3294_v29 = vld [vmem:[#allocation2 + $0xe0] sm:$0xff]  ;;  %v3299_v9 = vld [vmem:[#allocation2 + $0xf8] sm:$0xff] }
  0xca   : > { %4314 = vst [vmem:[#allocation28_spill] sm:$0xff] %v3292_v27 }
  0xcb   : > { %v489_v39 = vpop.permute.xlu2 %488  ;;  %389 = vst.msk [vmem:[#allocation3 + $0x98] sm:$0xff] %vm249_vm0, %v3294_v29 }
  0xcc   : > { %574 = vst.msk [vmem:[#allocation3 + $0x58] sm:$0xff] %vm562_vm2, %v489_v39  ;;  %v3304_v39 = vld [vmem:[#allocation2 + $0x110] sm:$0xff] }
  0xcd   : > { %693 = vrot.lane.b32.xlu1 %v3279_v62, %s2761_s7  ;;  %v3306_v62 = vld [vmem:[#allocation2 + $0xf2] sm:$0xff]  ;;  %391 = vst.msk [vmem:[#allocation3 + $0xa8] sm:$0xff] %vm249_vm0, %v3299_v9 }
  0xce   : > { %697 = vrot.lane.b32.xlu0 %v3283_v1, %s2761_s7  ;;  %4315 = vst [vmem:[#allocation29_spill] sm:$0xff] %v3306_v62  ;;  %v3310_v1 = vld [vmem:[#allocation2 + $0x10a] sm:$0xff] }
  0xcf   : > { %v481_v41 = vpop.permute.xlu1 %480  ;;  %4316 = vst [vmem:[#allocation30_spill] sm:$0xff] %v3310_v1 }
  0xd0   : > { %570 = vst.msk [vmem:[#allocation3 + $0x38] sm:$0xff] %vm562_vm2, %v481_v41  ;;  %v485_v22 = vpop.permute.xlu0 %484  ;;  %v3321_v41 = vld [vmem:[#allocation2 + $0x108] sm:$0xff] }
  0xd1   : > { %572 = vst.msk [vmem:[#allocation3 + $0x48] sm:$0xff] %vm562_vm2, %v485_v22  ;;  %689 = vrot.lane.b32.xlu2 %v3292_v27, %s2761_s7  ;;  %v3319_v22 = vld [vmem:[#allocation2 + $0xda] sm:$0xff] }
  0xd2   : > { %393 = vst.msk [vmem:[#allocation3 + $0xb8] sm:$0xff] %vm249_vm0, %v3304_v39 }
  0xd3   : > { %v495_v23 = vpop.permute.xlu2 %494  ;;  %4317 = vst [vmem:[#allocation31_spill] sm:$0xff] %v3319_v22 }
  0xd4   : > { %577 = vst.msk [vmem:[#allocation3 + $0x70] sm:$0xff] %vm562_vm2, %v495_v23  ;;  %v3331_v23 = vld [vmem:[#allocation2 + $0x138] sm:$0xff] }
  0xd5   : > { %699 = vrot.lane.b32.xlu1 %v3306_v62, %s2761_s7  ;;  %392 = vst.msk [vmem:[#allocation3 + $0xb0] sm:$0xff] %vm249_vm0, %v3321_v41  ;;  %v3333_v62 = vld [vmem:[#allocation2 + $0x112] sm:$0xff] }
  0xd6   : > { %703 = vrot.lane.b32.xlu0 %v3310_v1, %s2761_s7  ;;  %4318 = vst [vmem:[#allocation32_spill] sm:$0xff] %v3333_v62  ;;  %v3337_v1 = vld [vmem:[#allocation2 + $0x12a] sm:$0xff] }
  0xd7   : > { %v487_v27 = vpop.permute.xlu1 %486  ;;  %4319 = vst [vmem:[#allocation33_spill] sm:$0xff] %v3337_v1 }
  0xd8   : > { %573 = vst.msk [vmem:[#allocation3 + $0x50] sm:$0xff] %vm562_vm2, %v487_v27  ;;  %v491_v13 = vpop.permute.xlu0 %490  ;;  %v3348_v27 = vld [vmem:[#allocation2 + $0x128] sm:$0xff] }
  0xd9   : > { %575 = vst.msk [vmem:[#allocation3 + $0x60] sm:$0xff] %vm562_vm2, %v491_v13  ;;  %695 = vrot.lane.b32.xlu2 %v3319_v22, %s2761_s7  ;;  %v3346_v13 = vld [vmem:[#allocation2 + $0xfa] sm:$0xff] }
  0xda   : > { %396 = vst.msk [vmem:[#allocation3 + $0xd0] sm:$0xff] %vm249_vm0, %v3331_v23 }
  0xdb   : > { %v501_v14 = vpop.permute.xlu2 %500  ;;  %4320 = vst [vmem:[#allocation34_spill] sm:$0xff] %v3346_v13 }
  0xdc   : > { %580 = vst.msk [vmem:[#allocation3 + $0x88] sm:$0xff] %vm562_vm2, %v501_v14  ;;  %v3358_v14 = vld [vmem:[#allocation2 + $0x158] sm:$0xff] }
  0xdd   : > { %705 = vrot.lane.b32.xlu1 %v3333_v62, %s2761_s7  ;;  %395 = vst.msk [vmem:[#allocation3 + $0xc8] sm:$0xff] %vm249_vm0, %v3348_v27  ;;  %v3360_v62 = vld [vmem:[#allocation2 + $0x13a] sm:$0xff] }
  0xde   : > { %709 = vrot.lane.b32.xlu0 %v3337_v1, %s2761_s7  ;;  %4321 = vst [vmem:[#allocation35_spill] sm:$0xff] %v3360_v62  ;;  %v3364_v1 = vld [vmem:[#allocation2 + $0x152] sm:$0xff] }
  0xdf   : > { %v493_v22 = vpop.permute.xlu1 %492  ;;  %4322 = vst [vmem:[#allocation36_spill] sm:$0xff] %v3364_v1 }
  0xe0   : > { %576 = vst.msk [vmem:[#allocation3 + $0x68] sm:$0xff] %vm562_vm2, %v493_v22  ;;  %v497_v7 = vpop.permute.xlu0 %496  ;;  %v3375_v22 = vld [vmem:[#allocation2 + $0x150] sm:$0xff] }
  0xe1   : > { %578 = vst.msk [vmem:[#allocation3 + $0x78] sm:$0xff] %vm562_vm2, %v497_v7  ;;  %701 = vrot.lane.b32.xlu2 %v3346_v13, %s2761_s7  ;;  %v3373_v7 = vld [vmem:[#allocation2 + $0x122] sm:$0xff] }
  0xe2   : > { %399 = vst.msk [vmem:[#allocation3 + $0xe8] sm:$0xff] %vm249_vm0, %v3358_v14 }
  0xe3   : > { %v507_v8 = vpop.permute.xlu2 %506  ;;  %4323 = vst [vmem:[#allocation37_spill] sm:$0xff] %v3373_v7 }
  0xe4   : > { %583 = vst.msk [vmem:[#allocation3 + $0xa0] sm:$0xff] %vm562_vm2, %v507_v8  ;;  %v3385_v8 = vld [vmem:[#allocation2 + $0x15a] sm:$0xff] }
  0xe5   : > { %711 = vrot.lane.b32.xlu1 %v3360_v62, %s2761_s7  ;;  %398 = vst.msk [vmem:[#allocation3 + $0xe0] sm:$0xff] %vm249_vm0, %v3375_v22  ;;  %v626_v62 = vld [vmem:[#allocation2 + $0x172] sm:$0xff] }
  0xe6   : > { %715 = vrot.lane.b32.xlu0 %v3364_v1, %s2761_s7  ;;  %4324 = vst [vmem:[#allocation38_spill] sm:$0xff] %v3385_v8 }
  0xe7   : > { %v499_v13 = vpop.permute.xlu1 %498 }
  0xe8   : > { %579 = vst.msk [vmem:[#allocation3 + $0x80] sm:$0xff] %vm562_vm2, %v499_v13  ;;  %v503_v0 = vpop.permute.xlu0 %502  ;;  %v3393_v13 = vld [vmem:[#allocation2 + $0x142] sm:$0xff] }
  0xe9   : > { %581 = vst.msk [vmem:[#allocation3 + $0x90] sm:$0xff] %vm562_vm2, %v503_v0  ;;  %707 = vrot.lane.b32.xlu2 %v3373_v7, %s2761_s7  ;;  %v3395_v0 = vld [vmem:[#allocation2 + $0x170] sm:$0xff] }
  0xea   : > { %401 = vst.msk [vmem:[#allocation3 + $0xf8] sm:$0xff] %vm249_vm0, %v3395_v0 }
  0xeb   : > { %v513_v1 = vpop.permute.xlu2 %512 }
  0xec   : > { %586 = vst.msk [vmem:[#allocation3 + $0xb8] sm:$0xff] %vm562_vm2, %v513_v1 }
  0xed   : > { %717 = vrot.lane.b32.xlu1 %v3385_v8, %s2761_s7 }
  0xee   : > { %721 = vrot.lane.b32.xlu0 %v626_v62, %s2761_s7  ;;  %v3408_v62 = vld [vmem:[#allocation2 + $0x16a] sm:$0xff] }
  0xef   : > { %v505_v58 = vpop.permute.xlu1 %504 }
  0xf0   : > { %582 = vst.msk [vmem:[#allocation3 + $0x98] sm:$0xff] %vm562_vm2, %v505_v58  ;;  %v509_v7 = vpop.permute.xlu0 %508 }
  0xf1   : > { %584 = vst.msk [vmem:[#allocation3 + $0xa8] sm:$0xff] %vm562_vm2, %v509_v7  ;;  %713 = vrot.lane.b32.xlu2 %v3393_v13, %s2761_s7 }
  0xf3   : > { %v519_v1 = vpop.permute.xlu2 %518 }
  0xf4   : > { %589 = vst.msk [vmem:[#allocation3 + $0xd0] sm:$0xff] %vm562_vm2, %v519_v1 }
  0xf5   : > { %852 = vrot.lane.b32.xlu1 %v3148_v4, %s2762_s8 }
  0xf6   : > { %856 = vrot.lane.b32.xlu0 %v3133_v63, %s2762_s8 }
  0xf7   : > { %v511_v8 = vpop.permute.xlu1 %510 }
  0xf8   : > { %585 = vst.msk [vmem:[#allocation3 + $0xb0] sm:$0xff] %vm562_vm2, %v511_v8  ;;  %v515_v58 = vpop.permute.xlu0 %514 }
  0xf9   : > { %587 = vst.msk [vmem:[#allocation3 + $0xc0] sm:$0xff] %vm562_vm2, %v515_v58  ;;  %719 = vrot.lane.b32.xlu2 %v3408_v62, %s2761_s7  ;;  %s4207_s7 = sshll.u32 %s2438_s22, 4  ;;  %s2443_s7 = int_to_ptr.hbm [resolvable:$true] %s4207_s7 }
  0xfb   : > { %v525_v7 = vpop.permute.xlu2 %524 }
  0xfc   : > { %592 = vst.msk [vmem:[#allocation3 + $0xe8] sm:$0xff] %vm562_vm2, %v525_v7 }
  0xfd   : > { %858 = vrot.lane.b32.xlu1 %v3152_v6, %s2762_s8 }
  0xfe   : > { %862 = vrot.lane.b32.xlu0 %v3190_v18, %s2762_s8 }
  0xff   : > { %v517_v63 = vpop.permute.xlu1 %516 }
 0x100   : > { %588 = vst.msk [vmem:[#allocation3 + $0xc8] sm:$0xff] %vm562_vm2, %v517_v63  ;;  %v521_v4 = vpop.permute.xlu0 %520 }
 0x101   : > { %590 = vst.msk [vmem:[#allocation3 + $0xd8] sm:$0xff] %vm562_vm2, %v521_v4  ;;  %854 = vrot.lane.b32.xlu2 %v3167_v10, %s2762_s8 }
 0x103   : > { %v660_v8 = vpop.permute.xlu2 %659 }
 0x104   : > { %756 = vst.msk [vmem:[#allocation3] sm:$0xff] %vm755_vm3, %v660_v8 }
 0x105   : > { %864 = vrot.lane.b32.xlu1 %v3176_v12, %s2762_s8 }
 0x106   : > { %868 = vrot.lane.b32.xlu0 %v3217_v33, %s2762_s8 }
 0x107   : > { %v523_v6 = vpop.permute.xlu1 %522 }
 0x108   : > { %591 = vst.msk [vmem:[#allocation3 + $0xe0] sm:$0xff] %vm562_vm2, %v523_v6  ;;  %v527_v18 = vpop.permute.xlu0 %526 }
 0x109   : > { %593 = vst.msk [vmem:[#allocation3 + $0xf0] sm:$0xff] %vm562_vm2, %v527_v18  ;;  %860 = vrot.lane.b32.xlu2 %v3171_v11, %s2762_s8 }
 0x10b   : > { %v666_v10 = vpop.permute.xlu2 %665 }
 0x10c   : > { %759 = vst.msk [vmem:[#allocation3 + $0x18] sm:$0xff] %vm755_vm3, %v666_v10  ;;  %v4325_v10 = vld [vmem:[#allocation10_spill] sm:$0xff] }
 0x10d   : > { %870 = vrot.lane.b32.xlu1 %v3200_v20, %s2762_s8 }
 0x10e   : > { %874 = vrot.lane.b32.xlu0 %v3242_v47, %s2762_s8 }
 0x10f   : > { %v529_v12 = vpop.permute.xlu1 %528 }
 0x110   : > { %594 = vst.msk [vmem:[#allocation3 + $0xf8] sm:$0xff] %vm562_vm2, %v529_v12  ;;  %v662_v33 = vpop.permute.xlu0 %661 }
 0x111   : > { %757 = vst.msk [vmem:[#allocation3 + $0x8] sm:$0xff] %vm755_vm3, %v662_v33  ;;  %866 = vrot.lane.b32.xlu2 %v3194_v19, %s2762_s8  ;;  %v247_v19 = vld [vmem:[%s2914_s6 + $0xf0] sm:$0xff] }
 0x112   : > { %336 = vst.msk [vmem:[#allocation2 + $0x181] sm:$0xff] %vm249_vm0, %v247_v19  ;;  %v4329_v19 = vld [vmem:[#allocation19_spill] sm:$0xff] }
 0x113   : > { %v672_v11 = vpop.permute.xlu2 %671 }
 0x114   : > { %762 = vst.msk [vmem:[#allocation3 + $0x30] sm:$0xff] %vm755_vm3, %v672_v11 }
 0x115   : > { %876 = vrot.lane.b32.xlu1 %v3227_v36, %s2762_s8 }
 0x116   : > { %880 = vrot.lane.b32.xlu0 %v3267_v25, %s2762_s8 }
 0x117   : > { %v664_v20 = vpop.permute.xlu1 %663 }
 0x118   : > { %758 = vst.msk [vmem:[#allocation3 + $0x10] sm:$0xff] %vm755_vm3, %v664_v20  ;;  %v668_v47 = vpop.permute.xlu0 %667  ;;  %v4327_v20 = vld [vmem:[#allocation11_spill] sm:$0xff] }
 0x119   : > { %760 = vst.msk [vmem:[#allocation3 + $0x20] sm:$0xff] %vm755_vm3, %v668_v47  ;;  %872 = vrot.lane.b32.xlu2 %v3221_v35, %s2762_s8  ;;  %v818_v63 = vld [vmem:[#allocation2 + $0x180] sm:$0xff] }
 0x11b   : > { %v678_v1 = vpop.permute.xlu2 %677 }
 0x11c   : > { %765 = vst.msk [vmem:[#allocation3 + $0x48] sm:$0xff] %vm755_vm3, %v678_v1  ;;  %v4328_v1 = vld [vmem:[#allocation13_spill] sm:$0xff] }
 0x11d   : > { %882 = vrot.lane.b32.xlu1 %v3252_v61, %s2762_s8 }
 0x11e   : > { %886 = vrot.lane.b32.xlu0 %v3294_v29, %s2762_s8 }
 0x11f   : > { %v670_v36 = vpop.permute.xlu1 %669 }
 0x120   : > { %761 = vst.msk [vmem:[#allocation3 + $0x28] sm:$0xff] %vm755_vm3, %v670_v36  ;;  %v674_v25 = vpop.permute.xlu0 %673 }
 0x121   : > { %763 = vst.msk [vmem:[#allocation3 + $0x38] sm:$0xff] %vm755_vm3, %v674_v25  ;;  %878 = vrot.lane.b32.xlu2 %v3246_v51, %s2762_s8  ;;  %v248_v51 = vld [vmem:[%s2914_s6 + $0xf8] sm:$0xff]  ;;  %s4205_s6 = sshll.u32 %s206_s5, 4  ;;  %s2441_s6 = int_to_ptr.vmem [resolvable:$true] %s4205_s6 }
 0x122   : > { %337 = vst.msk [vmem:[#allocation2 + $0x189] sm:$0xff] %vm249_vm0, %v248_v51 }
 0x123   : > { %v684_v35 = vpop.permute.xlu2 %683 }
 0x124   : > { %768 = vst.msk [vmem:[#allocation3 + $0x60] sm:$0xff] %vm755_vm3, %v684_v35  ;;  %v4330_v35 = vld [vmem:[#allocation12_spill] sm:$0xff] }
 0x125   : > { %888 = vrot.lane.b32.xlu1 %v3277_v5, %s2762_s8 }
 0x126   : > { %892 = vrot.lane.b32.xlu0 %v3321_v41, %s2762_s8 }
 0x127   : > { %v676_v61 = vpop.permute.xlu1 %675 }
 0x128   : > { %764 = vst.msk [vmem:[#allocation3 + $0x40] sm:$0xff] %vm755_vm3, %v676_v61  ;;  %v680_v29 = vpop.permute.xlu0 %679 }
 0x129   : > { %766 = vst.msk [vmem:[#allocation3 + $0x50] sm:$0xff] %vm755_vm3, %v680_v29  ;;  %884 = vrot.lane.b32.xlu2 %v3272_v42, %s2762_s8  ;;  %v819_v4 = vld [vmem:[#allocation2 + $0x188] sm:$0xff]  ;;  %v4331_v29 = vld [vmem:[#allocation15_spill] sm:$0xff] }
 0x12b   : > { %v690_v58 = vpop.permute.xlu2 %689 }
 0x12c   : > { %771 = vst.msk [vmem:[#allocation3 + $0x78] sm:$0xff] %vm755_vm3, %v690_v58  ;;  %v4332_v58 = vld [vmem:[#allocation22_spill] sm:$0xff] }
 0x12d   : > { %894 = vrot.lane.b32.xlu1 %v3304_v39, %s2762_s8 }
 0x12e   : > { %898 = vrot.lane.b32.xlu0 %v3348_v27, %s2762_s8 }
 0x12f   : > { %v682_v5 = vpop.permute.xlu1 %681 }
 0x130   : > { %767 = vst.msk [vmem:[#allocation3 + $0x58] sm:$0xff] %vm755_vm3, %v682_v5  ;;  %v686_v41 = vpop.permute.xlu0 %685 }
 0x131   : > { %769 = vst.msk [vmem:[#allocation3 + $0x68] sm:$0xff] %vm755_vm3, %v686_v41  ;;  %890 = vrot.lane.b32.xlu2 %v3299_v9, %s2762_s8  ;;  %v4333_v41 = vld [vmem:[#allocation14_spill] sm:$0xff] }
 0x133   : > { %v696_v42 = vpop.permute.xlu2 %695 }
 0x134   : > { %774 = vst.msk [vmem:[#allocation3 + $0x90] sm:$0xff] %vm755_vm3, %v696_v42 }
 0x135   : > { %900 = vrot.lane.b32.xlu1 %v3331_v23, %s2762_s8 }
 0x136   : > { %904 = vrot.lane.b32.xlu0 %v3375_v22, %s2762_s8 }
 0x137   : > { %v688_v39 = vpop.permute.xlu1 %687 }
 0x138   : > { %770 = vst.msk [vmem:[#allocation3 + $0x70] sm:$0xff] %vm755_vm3, %v688_v39  ;;  %v692_v27 = vpop.permute.xlu0 %691  ;;  %v4334_v39 = vld [vmem:[#allocation18_spill] sm:$0xff] }
 0x139   : > { %772 = vst.msk [vmem:[#allocation3 + $0x80] sm:$0xff] %vm755_vm3, %v692_v27  ;;  %896 = vrot.lane.b32.xlu2 %v3326_v45, %s2762_s8  ;;  %v4335_v27 = vld [vmem:[#allocation25_spill] sm:$0xff] }
 0x13b   : > { %v702_v7 = vpop.permute.xlu2 %701 }
 0x13c   : > { %777 = vst.msk [vmem:[#allocation3 + $0xa8] sm:$0xff] %vm755_vm3, %v702_v7 }
 0x13d   : > { %906 = vrot.lane.b32.xlu1 %v3358_v14, %s2762_s8 }
 0x13e   : > { %910 = vrot.lane.b32.xlu0 %v3395_v0, %s2762_s8 }
 0x13f   : > { %v694_v9 = vpop.permute.xlu1 %693 }
 0x140   : > { %773 = vst.msk [vmem:[#allocation3 + $0x88] sm:$0xff] %vm755_vm3, %v694_v9  ;;  %v698_v23 = vpop.permute.xlu0 %697 }
 0x141   : > { %775 = vst.msk [vmem:[#allocation3 + $0x98] sm:$0xff] %vm755_vm3, %v698_v23  ;;  %902 = vrot.lane.b32.xlu2 %v3353_v30, %s2762_s8  ;;  %v4336_v23 = vld [vmem:[#allocation17_spill] sm:$0xff] }
 0x143   : > { %v708_v45 = vpop.permute.xlu2 %707 }
 0x144   : > { %780 = vst.msk [vmem:[#allocation3 + $0xc0] sm:$0xff] %vm755_vm3, %v708_v45  ;;  %v4337_v45 = vld [vmem:[#allocation21_spill] sm:$0xff] }
 0x145   : > { %912 = vrot.lane.b32.xlu1 %v818_v63, %s2762_s8 }
 0x146   : > { %1045 = vrot.lane.b32.xlu0 %v2940_v3, %s2763_s9 }
 0x147   : > { %v700_v14 = vpop.permute.xlu1 %699 }
 0x148   : > { %776 = vst.msk [vmem:[#allocation3 + $0xa0] sm:$0xff] %vm755_vm3, %v700_v14  ;;  %v704_v0 = vpop.permute.xlu0 %703  ;;  %v4338_v14 = vld [vmem:[#allocation28_spill] sm:$0xff] }
 0x149   : > { %778 = vst.msk [vmem:[#allocation3 + $0xb0] sm:$0xff] %vm755_vm3, %v704_v0  ;;  %908 = vrot.lane.b32.xlu2 %v3380_v16, %s2762_s8 }
 0x14b   : > { %v714_v30 = vpop.permute.xlu2 %713 }
 0x14c   : > { %783 = vst.msk [vmem:[#allocation3 + $0xd8] sm:$0xff] %vm755_vm3, %v714_v30 }
 0x14d   : > { %1047 = vrot.lane.b32.xlu1 %v2986_v15, %s2763_s9 }
 0x14e   : > { %1051 = vrot.lane.b32.xlu0 %v3024_v28, %s2763_s9 }
 0x14f   : > { %v706_v3 = vpop.permute.xlu1 %705 }
 0x150   : > { %779 = vst.msk [vmem:[#allocation3 + $0xb8] sm:$0xff] %vm755_vm3, %v706_v3  ;;  %v710_v8 = vpop.permute.xlu0 %709 }
 0x151   : > { %781 = vst.msk [vmem:[#allocation3 + $0xc8] sm:$0xff] %vm755_vm3, %v710_v8  ;;  %914 = vrot.lane.b32.xlu2 %v819_v4, %s2762_s8  ;;  %v4339_v4 = vld [vmem:[#allocation20_spill] sm:$0xff] }
 0x152   : > { %v4340_v8 = vld [vmem:[#allocation24_spill] sm:$0xff] }
 0x153   : > { %v720_v6 = vpop.permute.xlu2 %719 }
 0x154   : > { %786 = vst.msk [vmem:[#allocation3 + $0xf0] sm:$0xff] %vm755_vm3, %v720_v6  ;;  %v4341_v6 = vld [vmem:[#allocation31_spill] sm:$0xff] }
 0x155   : > { %1053 = vrot.lane.b32.xlu1 %v2992_v17, %s2763_s9 }
 0x156   : > { %1057 = vrot.lane.b32.xlu0 %v3043_v34, %s2763_s9 }
 0x157   : > { %v712_v15 = vpop.permute.xlu1 %711 }
 0x158   : > { %782 = vst.msk [vmem:[#allocation3 + $0xd0] sm:$0xff] %vm755_vm3, %v712_v15  ;;  %v716_v28 = vpop.permute.xlu0 %715 }
 0x159   : > { %784 = vst.msk [vmem:[#allocation3 + $0xe0] sm:$0xff] %vm755_vm3, %v716_v28  ;;  %1049 = vrot.lane.b32.xlu2 %v3002_v21, %s2763_s9 }
 0x15b   : > { %v855_v16 = vpop.permute.xlu2 %854 }
 0x15c   : > { %950 = vst.msk [vmem:[#allocation3 + $0x8] sm:$0xff] %vm948_vm4, %v855_v16  ;;  %v4342_v16 = vld [vmem:[#allocation23_spill] sm:$0xff] }
 0x15d   : > { %1059 = vrot.lane.b32.xlu1 %v3014_v26, %s2763_s9 }
 0x15e   : > { %1063 = vrot.lane.b32.xlu0 %v3061_v40, %s2763_s9 }
 0x15f   : > { %v718_v17 = vpop.permute.xlu1 %717 }
 0x160   : > { %785 = vst.msk [vmem:[#allocation3 + $0xe8] sm:$0xff] %vm755_vm3, %v718_v17  ;;  %v722_v34 = vpop.permute.xlu0 %721 }
 0x161   : > { %787 = vst.msk [vmem:[#allocation3 + $0xf8] sm:$0xff] %vm755_vm3, %v722_v34  ;;  %1055 = vrot.lane.b32.xlu2 %v3010_v24, %s2763_s9  ;;  %v4343_v34 = vld [vmem:[#allocation27_spill] sm:$0xff] }
 0x163   : > { %v861_v21 = vpop.permute.xlu2 %860 }
 0x164   : > { %953 = vst.msk [vmem:[#allocation3 + $0x20] sm:$0xff] %vm948_vm4, %v861_v21  ;;  %v4344_v21 = vld [vmem:[#allocation34_spill] sm:$0xff] }
 0x165   : > { %1065 = vrot.lane.b32.xlu1 %v3035_v32, %s2763_s9 }
 0x166   : > { %1069 = vrot.lane.b32.xlu0 %v3079_v46, %s2763_s9 }
 0x167   : > { %v853_v26 = vpop.permute.xlu1 %852 }
 0x168   : > { %949 = vst.msk [vmem:[#allocation3] sm:$0xff] %vm948_vm4, %v853_v26  ;;  %v857_v40 = vpop.permute.xlu0 %856 }
 0x169   : > { %951 = vst.msk [vmem:[#allocation3 + $0x10] sm:$0xff] %vm948_vm4, %v857_v40  ;;  %1061 = vrot.lane.b32.xlu2 %v3033_v31, %s2763_s9 }
 0x16b   : > { %v867_v18 = vpop.permute.xlu2 %866 }
 0x16c   : > { %956 = vst.msk [vmem:[#allocation3 + $0x38] sm:$0xff] %vm948_vm4, %v867_v18  ;;  %v4345_v18 = vld [vmem:[#allocation26_spill] sm:$0xff] }
 0x16d   : > { %1071 = vrot.lane.b32.xlu1 %v3053_v38, %s2763_s9 }
 0x16e   : > { %1075 = vrot.lane.b32.xlu0 %v3093_v50, %s2763_s9 }
 0x16f   : > { %v859_v24 = vpop.permute.xlu1 %858 }
 0x170   : > { %952 = vst.msk [vmem:[#allocation3 + $0x18] sm:$0xff] %vm948_vm4, %v859_v24  ;;  %v863_v32 = vpop.permute.xlu0 %862 }
 0x171   : > { %954 = vst.msk [vmem:[#allocation3 + $0x28] sm:$0xff] %vm948_vm4, %v863_v32  ;;  %1067 = vrot.lane.b32.xlu2 %v3051_v37, %s2763_s9  ;;  %v4346_v32 = vld [vmem:[#allocation30_spill] sm:$0xff] }
 0x173   : > { %v873_v46 = vpop.permute.xlu2 %872 }
 0x174   : > { %959 = vst.msk [vmem:[#allocation3 + $0x50] sm:$0xff] %vm948_vm4, %v873_v46  ;;  %v4347_v46 = vld [vmem:[#allocation37_spill] sm:$0xff] }
 0x175   : > { %1077 = vrot.lane.b32.xlu1 %v3071_v44, %s2763_s9 }
 0x176   : > { %1081 = vrot.lane.b32.xlu0 %v3107_v54, %s2763_s9 }
 0x177   : > { %v865_v31 = vpop.permute.xlu1 %864 }
 0x178   : > { %955 = vst.msk [vmem:[#allocation3 + $0x30] sm:$0xff] %vm948_vm4, %v865_v31  ;;  %v869_v38 = vpop.permute.xlu0 %868 }
 0x179   : > { %957 = vst.msk [vmem:[#allocation3 + $0x40] sm:$0xff] %vm948_vm4, %v869_v38  ;;  %1073 = vrot.lane.b32.xlu2 %v3069_v43, %s2763_s9 }
 0x17b   : > { %v879_v50 = vpop.permute.xlu2 %878 }
 0x17c   : > { %962 = vst.msk [vmem:[#allocation3 + $0x68] sm:$0xff] %vm948_vm4, %v879_v50  ;;  %v4348_v50 = vld [vmem:[#allocation29_spill] sm:$0xff] }
 0x17d   : > { %1083 = vrot.lane.b32.xlu1 %v3087_v49, %s2763_s9 }
 0x17e   : > { %1087 = vrot.lane.b32.xlu0 %v3119_v57, %s2763_s9 }
 0x17f   : > { %v871_v37 = vpop.permute.xlu1 %870 }
 0x180   : > { %958 = vst.msk [vmem:[#allocation3 + $0x48] sm:$0xff] %vm948_vm4, %v871_v37  ;;  %v875_v44 = vpop.permute.xlu0 %874 }
 0x181   : > { %960 = vst.msk [vmem:[#allocation3 + $0x58] sm:$0xff] %vm948_vm4, %v875_v44  ;;  %1079 = vrot.lane.b32.xlu2 %v3085_v48, %s2763_s9  ;;  %v4349_v44 = vld [vmem:[#allocation33_spill] sm:$0xff] }
 0x183   : > { %v885_v54 = vpop.permute.xlu2 %884 }
 0x184   : > { %965 = vst.msk [vmem:[#allocation3 + $0x80] sm:$0xff] %vm948_vm4, %v885_v54 }
 0x185   : > { %1089 = vrot.lane.b32.xlu1 %v3101_v53, %s2763_s9 }
 0x186   : > { %1093 = vrot.lane.b32.xlu0 %v3131_v60, %s2763_s9  ;;  %v3587_v60 = vld [vmem:[#allocation2 + $0x181] sm:$0xff] }
 0x187   : > { %v877_v43 = vpop.permute.xlu1 %876 }
 0x188   : > { %961 = vst.msk [vmem:[#allocation3 + $0x60] sm:$0xff] %vm948_vm4, %v877_v43  ;;  %v881_v49 = vpop.permute.xlu0 %880 }
 0x189   : > { %963 = vst.msk [vmem:[#allocation3 + $0x70] sm:$0xff] %vm948_vm4, %v881_v49  ;;  %1085 = vrot.lane.b32.xlu2 %v3099_v52, %s2763_s9  ;;  %v4350_v49 = vld [vmem:[#allocation32_spill] sm:$0xff] }
 0x18b   : > { %v891_v57 = vpop.permute.xlu2 %890 }
 0x18c   : > { %968 = vst.msk [vmem:[#allocation3 + $0x98] sm:$0xff] %vm948_vm4, %v891_v57 }
 0x18d   : > { %1095 = vrot.lane.b32.xlu1 %v3113_v56, %s2763_s9 }
 0x18e   : > { %1099 = vrot.lane.b32.xlu0 %v3146_v2, %s2763_s9 }
 0x18f   : > { %v883_v48 = vpop.permute.xlu1 %882 }
 0x190   : > { %964 = vst.msk [vmem:[#allocation3 + $0x78] sm:$0xff] %vm948_vm4, %v883_v48  ;;  %v887_v53 = vpop.permute.xlu0 %886  ;;  %v4351_v48 = vld [vmem:[#allocation36_spill] sm:$0xff] }
 0x191   : > { %966 = vst.msk [vmem:[#allocation3 + $0x88] sm:$0xff] %vm948_vm4, %v887_v53  ;;  %1091 = vrot.lane.b32.xlu2 %v3111_v55, %s2763_s9  ;;  %v1012_v55 = vld [vmem:[#allocation2 + $0x189] sm:$0xff] }
 0x193   : > { %v897_v52 = vpop.permute.xlu2 %896 }
 0x194   : > { %971 = vst.msk [vmem:[#allocation3 + $0xb0] sm:$0xff] %vm948_vm4, %v897_v52  ;;  %v4352_v52 = vld [vmem:[#allocation35_spill] sm:$0xff] }
 0x195   : > { %1101 = vrot.lane.b32.xlu1 %v3125_v59, %s2763_s9  ;;  %v4326_v59 = vld [vmem:[#allocation16_spill] sm:$0xff] }
 0x196   : > { %1105 = vrot.lane.b32.xlu0 %v3587_v60, %s2763_s9 }
 0x197   : > { %v889_v56 = vpop.permute.xlu1 %888 }
 0x198   : > { %967 = vst.msk [vmem:[#allocation3 + $0x90] sm:$0xff] %vm948_vm4, %v889_v56  ;;  %v893_v2 = vpop.permute.xlu0 %892  ;;  %v1368_v56 = vld [vmem:[#allocation2 + $0x30] sm:$0xff] }
 0x199   : > { %969 = vst.msk [vmem:[#allocation3 + $0xa0] sm:$0xff] %vm948_vm4, %v893_v2  ;;  %1097 = vrot.lane.b32.xlu2 %v4325_v10, %s2763_s9  ;;  %v1754_v2 = vld [vmem:[#allocation2 + $0x32] sm:$0xff] }
 0x19b   : > { %v903_v12 = vpop.permute.xlu2 %902 }
 0x19c   : > { %974 = vst.msk [vmem:[#allocation3 + $0xc8] sm:$0xff] %vm948_vm4, %v903_v12  ;;  %v4353_v12 = vld [vmem:[#allocation38_spill] sm:$0xff] }
 0x19d   : > { %1107 = vrot.lane.b32.xlu1 %v1012_v55, %s2763_s9 }
 0x19e   : > { %1240 = vrot.lane.b32.xlu0 %v4326_v59, %s2764_s10  ;;  %v1369_v59 = vld [vmem:[#allocation2 + $0x38] sm:$0xff] }
 0x19f   : > { %v895_v33 = vpop.permute.xlu1 %894 }
 0x1a0   : > { %970 = vst.msk [vmem:[#allocation3 + $0xa8] sm:$0xff] %vm948_vm4, %v895_v33  ;;  %v899_v11 = vpop.permute.xlu0 %898  ;;  %v1755_v33 = vld [vmem:[#allocation2 + $0x3a] sm:$0xff] }
 0x1a1   : > { %972 = vst.msk [vmem:[#allocation3 + $0xb8] sm:$0xff] %vm948_vm4, %v899_v11  ;;  %1103 = vrot.lane.b32.xlu2 %v4327_v20, %s2763_s9  ;;  %v1561_v20 = vld [vmem:[#allocation2 + $0x31] sm:$0xff] }
 0x1a3   : > { %v909_v47 = vpop.permute.xlu2 %908 }
 0x1a4   : > { %977 = vst.msk [vmem:[#allocation3 + $0xe0] sm:$0xff] %vm948_vm4, %v909_v47 }
 0x1a5   : > { %1242 = vrot.lane.b32.xlu1 %v4328_v1, %s2764_s10 }
 0x1a6   : > { %1246 = vrot.lane.b32.xlu0 %v4329_v19, %s2764_s10  ;;  %v1370_v19 = vld [vmem:[#allocation2 + $0x48] sm:$0xff] }
 0x1a7   : > { %v901_v36 = vpop.permute.xlu1 %900 }
 0x1a8   : > { %973 = vst.msk [vmem:[#allocation3 + $0xc0] sm:$0xff] %vm948_vm4, %v901_v36  ;;  %v905_v25 = vpop.permute.xlu0 %904  ;;  %v1563_v36 = vld [vmem:[#allocation2 + $0x49] sm:$0xff] }
 0x1a9   : > { %975 = vst.msk [vmem:[#allocation3 + $0xd0] sm:$0xff] %vm948_vm4, %v905_v25  ;;  %1238 = vrot.lane.b32.xlu2 %v4330_v35, %s2764_s10  ;;  %v1562_v35 = vld [vmem:[#allocation2 + $0x39] sm:$0xff] }
 0x1ab   : > { %v915_v61 = vpop.permute.xlu2 %914 }
 0x1ac   : > { %980 = vst.msk [vmem:[#allocation3 + $0xf8] sm:$0xff] %vm948_vm4, %v915_v61 }
 0x1ad   : > { %1248 = vrot.lane.b32.xlu1 %v4331_v29, %s2764_s10 }
 0x1ae   : > { %1252 = vrot.lane.b32.xlu0 %v4332_v58, %s2764_s10  ;;  %v1569_v58 = vld [vmem:[#allocation2 + $0x91] sm:$0xff] }
 0x1af   : > { %v907_v51 = vpop.permute.xlu1 %906 }
 0x1b0   : > { %976 = vst.msk [vmem:[#allocation3 + $0xd8] sm:$0xff] %vm948_vm4, %v907_v51  ;;  %v911_v5 = vpop.permute.xlu0 %910  ;;  %v1762_v51 = vld [vmem:[#allocation2 + $0x92] sm:$0xff] }
 0x1b1   : > { %978 = vst.msk [vmem:[#allocation3 + $0xe8] sm:$0xff] %vm948_vm4, %v911_v5  ;;  %1244 = vrot.lane.b32.xlu2 %v4333_v41, %s2764_s10  ;;  %v1376_v41 = vld [vmem:[#allocation2 + $0x90] sm:$0xff] }
 0x1b3   : > { %v1050_v42 = vpop.permute.xlu2 %1049 }
 0x1b4   : > { %1144 = vst.msk [vmem:[#allocation3 + $0x10] sm:$0xff] %vm1141_vm5, %v1050_v42 }
 0x1b5   : > { %1254 = vrot.lane.b32.xlu1 %v4334_v39, %s2764_s10 }
 0x1b6   : > { %1258 = vrot.lane.b32.xlu0 %v4335_v27, %s2764_s10  ;;  %v1371_v27 = vld [vmem:[#allocation2 + $0x50] sm:$0xff] }
 0x1b7   : > { %v913_v7 = vpop.permute.xlu1 %912 }
 0x1b8   : > { %979 = vst.msk [vmem:[#allocation3 + $0xf0] sm:$0xff] %vm948_vm4, %v913_v7  ;;  %v1046_v9 = vpop.permute.xlu0 %1045  ;;  %v1564_v7 = vld [vmem:[#allocation2 + $0x51] sm:$0xff] }
 0x1b9   : > { %1142 = vst.msk [vmem:[#allocation3] sm:$0xff] %vm1141_vm5, %v1046_v9  ;;  %1250 = vrot.lane.b32.xlu2 %v4336_v23, %s2764_s10  ;;  %v1756_v23 = vld [vmem:[#allocation2 + $0x4a] sm:$0xff] }
 0x1bb   : > { %v1056_v63 = vpop.permute.xlu2 %1055 }
 0x1bc   : > { %1147 = vst.msk [vmem:[#allocation3 + $0x28] sm:$0xff] %vm1141_vm5, %v1056_v63 }
 0x1bd   : > { %1260 = vrot.lane.b32.xlu1 %v4337_v45, %s2764_s10 }
 0x1be   : > { %1264 = vrot.lane.b32.xlu0 %v4338_v14, %s2764_s10  ;;  %v1570_v14 = vld [vmem:[#allocation2 + $0x99] sm:$0xff] }
 0x1bf   : > { %v1048_v0 = vpop.permute.xlu1 %1047 }
 0x1c0   : > { %1143 = vst.msk [vmem:[#allocation3 + $0x8] sm:$0xff] %vm1141_vm5, %v1048_v0  ;;  %v1052_v30 = vpop.permute.xlu0 %1051  ;;  %v1757_v0 = vld [vmem:[#allocation2 + $0x52] sm:$0xff] }
 0x1c1   : > { %1145 = vst.msk [vmem:[#allocation3 + $0x18] sm:$0xff] %vm1141_vm5, %v1052_v30  ;;  %1256 = vrot.lane.b32.xlu2 %v4339_v4, %s2764_s10  ;;  %v1377_v4 = vld [vmem:[#allocation2 + $0x98] sm:$0xff] }
 0x1c3   : > { %v1062_v3 = vpop.permute.xlu2 %1061 }
 0x1c4   : > { %1150 = vst.msk [vmem:[#allocation3 + $0x40] sm:$0xff] %vm1141_vm5, %v1062_v3 }
 0x1c5   : > { %1266 = vrot.lane.b32.xlu1 %v4340_v8, %s2764_s10 }
 0x1c6   : > { %1270 = vrot.lane.b32.xlu0 %v4341_v6, %s2764_s10  ;;  %v1763_v6 = vld [vmem:[#allocation2 + $0x9a] sm:$0xff] }
 0x1c7   : > { %v1054_v15 = vpop.permute.xlu1 %1053 }
 0x1c8   : > { %1146 = vst.msk [vmem:[#allocation3 + $0x20] sm:$0xff] %vm1141_vm5, %v1054_v15  ;;  %v1058_v28 = vpop.permute.xlu0 %1057  ;;  %v1770_v15 = vld [vmem:[#allocation2 + $0xf2] sm:$0xff] }
 0x1c9   : > { %1148 = vst.msk [vmem:[#allocation3 + $0x30] sm:$0xff] %vm1141_vm5, %v1058_v28  ;;  %1262 = vrot.lane.b32.xlu2 %v4342_v16, %s2764_s10  ;;  %v1384_v16 = vld [vmem:[#allocation2 + $0xf0] sm:$0xff] }
 0x1cb   : > { %v1068_v17 = vpop.permute.xlu2 %1067 }
 0x1cc   : > { %1153 = vst.msk [vmem:[#allocation3 + $0x58] sm:$0xff] %vm1141_vm5, %v1068_v17 }
 0x1cd   : > { %1272 = vrot.lane.b32.xlu1 %v4343_v34, %s2764_s10 }
 0x1ce   : > { %1276 = vrot.lane.b32.xlu0 %v4344_v21, %s2764_s10  ;;  %v1372_v21 = vld [vmem:[#allocation2 + $0x60] sm:$0xff] }
 0x1cf   : > { %v1060_v26 = vpop.permute.xlu1 %1059 }
 0x1d0   : > { %1149 = vst.msk [vmem:[#allocation3 + $0x38] sm:$0xff] %vm1141_vm5, %v1060_v26  ;;  %v1064_v40 = vpop.permute.xlu0 %1063  ;;  %v1565_v26 = vld [vmem:[#allocation2 + $0x61] sm:$0xff] }
 0x1d1   : > { %1151 = vst.msk [vmem:[#allocation3 + $0x48] sm:$0xff] %vm1141_vm5, %v1064_v40  ;;  %1268 = vrot.lane.b32.xlu2 %v4345_v18, %s2764_s10  ;;  %v1577_v18 = vld [vmem:[#allocation2 + $0xf1] sm:$0xff] }
 0x1d3   : > { %v1074_v24 = vpop.permute.xlu2 %1073 }
 0x1d4   : > { %1156 = vst.msk [vmem:[#allocation3 + $0x70] sm:$0xff] %vm1141_vm5, %v1074_v24 }
 0x1d5   : > { %1278 = vrot.lane.b32.xlu1 %v4346_v32, %s2764_s10 }
 0x1d6   : > { %1282 = vrot.lane.b32.xlu0 %v4347_v46, %s2764_s10  ;;  %v1571_v46 = vld [vmem:[#allocation2 + $0xa9] sm:$0xff] }
 0x1d7   : > { %v1066_v31 = vpop.permute.xlu1 %1065 }
 0x1d8   : > { %1152 = vst.msk [vmem:[#allocation3 + $0x50] sm:$0xff] %vm1141_vm5, %v1066_v31  ;;  %v1070_v38 = vpop.permute.xlu0 %1069  ;;  %v1758_v31 = vld [vmem:[#allocation2 + $0x62] sm:$0xff] }
 0x1d9   : > { %1154 = vst.msk [vmem:[#allocation3 + $0x60] sm:$0xff] %vm1141_vm5, %v1070_v38  ;;  %1274 = vrot.lane.b32.xlu2 %v4348_v50, %s2764_s10  ;;  %v1378_v50 = vld [vmem:[#allocation2 + $0xa8] sm:$0xff] }
 0x1db   : > { %v1080_v37 = vpop.permute.xlu2 %1079 }
 0x1dc   : > { %1159 = vst.msk [vmem:[#allocation3 + $0x88] sm:$0xff] %vm1141_vm5, %v1080_v37 }
 0x1dd   : > { %1284 = vrot.lane.b32.xlu1 %v4349_v44, %s2764_s10 }
 0x1de   : > { %1288 = vrot.lane.b32.xlu0 %v3393_v13, %s2764_s10 }
 0x1df   : > { %v1072_v54 = vpop.permute.xlu1 %1071 }
 0x1e0   : > { %1155 = vst.msk [vmem:[#allocation3 + $0x68] sm:$0xff] %vm1141_vm5, %v1072_v54  ;;  %v1076_v43 = vpop.permute.xlu0 %1075  ;;  %v1764_v54 = vld [vmem:[#allocation2 + $0xaa] sm:$0xff] }
 0x1e1   : > { %1157 = vst.msk [vmem:[#allocation3 + $0x78] sm:$0xff] %vm1141_vm5, %v1076_v43  ;;  %1280 = vrot.lane.b32.xlu2 %v4350_v49, %s2764_s10  ;;  %v1771_v43 = vld [vmem:[#allocation2 + $0xfa] sm:$0xff] }
 0x1e3   : > { %v1086_v57 = vpop.permute.xlu2 %1085 }
 0x1e4   : > { %1162 = vst.msk [vmem:[#allocation3 + $0xa0] sm:$0xff] %vm1141_vm5, %v1086_v57  ;;  %v1385_v57 = vld [vmem:[#allocation2 + $0xf8] sm:$0xff] }
 0x1e5   : > { %1290 = vrot.lane.b32.xlu1 %v4351_v48, %s2764_s10 }
 0x1e6   : > { %1294 = vrot.lane.b32.xlu0 %v3408_v62, %s2764_s10 }
 0x1e7   : > { %v1078_v53 = vpop.permute.xlu1 %1077 }
 0x1e8   : > { %1158 = vst.msk [vmem:[#allocation3 + $0x80] sm:$0xff] %vm1141_vm5, %v1078_v53  ;;  %v1082_v13 = vpop.permute.xlu0 %1081 }
 0x1e9   : > { %1160 = vst.msk [vmem:[#allocation3 + $0x90] sm:$0xff] %vm1141_vm5, %v1082_v13  ;;  %1286 = vrot.lane.b32.xlu2 %v4352_v52, %s2764_s10  ;;  %v1373_v13 = vld [vmem:[#allocation2 + $0x68] sm:$0xff] }
 0x1ea   : > { %v1566_v52 = vld [vmem:[#allocation2 + $0x69] sm:$0xff] }
 0x1eb   : > { %v1092_v10 = vpop.permute.xlu2 %1091 }
 0x1ec   : > { %1165 = vst.msk [vmem:[#allocation3 + $0xb8] sm:$0xff] %vm1141_vm5, %v1092_v10 }
 0x1ed   : > { %1432 = vrot.lane.b32.xlu1 %v1368_v56, %s2765_s11 }
 0x1ee   : > { %1818 = vrot.lane.b32.xlu0 %v1754_v2, %s2766_s12  ;;  %v1578_v2 = vld [vmem:[#allocation2 + $0xf9] sm:$0xff] }
 0x1ef   : > { %v1084_v62 = vpop.permute.xlu1 %1083 }
 0x1f0   : > { %1161 = vst.msk [vmem:[#allocation3 + $0x98] sm:$0xff] %vm1141_vm5, %v1084_v62  ;;  %v1088_v55 = vpop.permute.xlu0 %1087 }
 0x1f1   : > { %1163 = vst.msk [vmem:[#allocation3 + $0xa8] sm:$0xff] %vm1141_vm5, %v1088_v55  ;;  %1292 = vrot.lane.b32.xlu2 %v4353_v12, %s2764_s10  ;;  %v1983_v55 = vld [vmem:[%s4261_s1 + $0x20] sm:$0xf]  ;;  %v1572_v12 = vld [vmem:[#allocation2 + $0xb1] sm:$0xff] }
 0x1f2   : > { %2558 = vmatpush.msk.msra.mxu0 %vm2081_vm7, %v1983_v55  ;;  %2595 = vmatpush.msk.msra.mxu1 %vm2081_vm7, %v1983_v55 }
 0x1f3   : > { %v1098_v11 = vpop.permute.xlu2 %1097  ;;  %2596 = vmatpush.msk.msra.mxu2 %vm2081_vm7, %v1983_v55  ;;  %2597 = vmatpush.msk.msra.mxu3 %vm2081_vm7, %v1983_v55  ;;  %v1581_v55 = vld [vmem:[#allocation2 + $0x121] sm:$0xff] }
 0x1f4   : > { %1168 = vst.msk [vmem:[#allocation3 + $0xd0] sm:$0xff] %vm1141_vm5, %v1098_v11 }
 0x1f5   : > { %1434 = vrot.lane.b32.xlu1 %v1369_v59, %s2765_s11  ;;  %v1982_v59 = vld [vmem:[%s4261_s1 + $0x18] sm:$0xff] }
 0x1f6   : > { %1820 = vrot.lane.b32.xlu0 %v1755_v33, %s2766_s12  ;;  %v1981_v33 = vld [vmem:[%s4261_s1 + $0x10] sm:$0xff]  ;;  %2097 = vmatpush.msra.mxu0 %v1982_v59 }
 0x1f7   : > { %v1090_v47 = vpop.permute.xlu1 %1089  ;;  %2598 = vmatpush.msra.mxu1 %v1982_v59  ;;  %2599 = vmatpush.msra.mxu2 %v1982_v59 }
 0x1f8   : > { %1164 = vst.msk [vmem:[#allocation3 + $0xb0] sm:$0xff] %vm1141_vm5, %v1090_v47  ;;  %v1094_v1 = vpop.permute.xlu0 %1093  ;;  %2098 = vmatpush.msra.mxu0 %v1981_v33  ;;  %v1379_v47 = vld [vmem:[#allocation2 + $0xb0] sm:$0xff]  ;;  %2600 = vmatpush.msra.mxu3 %v1982_v59  ;;  %v1388_v59 = vld [vmem:[#allocation2 + $0x120] sm:$0xff] }
 0x1f9   : > { %1166 = vst.msk [vmem:[#allocation3 + $0xc0] sm:$0xff] %vm1141_vm5, %v1094_v1  ;;  %1625 = vrot.lane.b32.xlu2 %v1561_v20, %s2767_s13  ;;  %v1980_v20 = vld [vmem:[%s4261_s1 + $0x8] sm:$0xff]  ;;  %2601 = vmatpush.msra.mxu1 %v1981_v33 }
 0x1fa   : > { %2099 = vmatpush.msra.mxu0 %v1980_v20  ;;  %2602 = vmatpush.msra.mxu2 %v1981_v33 }
 0x1fb   : > { %v1104_v25 = vpop.permute.xlu2 %1103  ;;  %2604 = vmatpush.msra.mxu1 %v1980_v20  ;;  %2603 = vmatpush.msra.mxu3 %v1981_v33 }
 0x1fc   : > { %1171 = vst.msk [vmem:[#allocation3 + $0xe8] sm:$0xff] %vm1141_vm5, %v1104_v25  ;;  %2605 = vmatpush.msra.mxu2 %v1980_v20  ;;  %v1579_v25 = vld [vmem:[#allocation2 + $0x109] sm:$0xff] }
 0x1fd   : > { %1436 = vrot.lane.b32.xlu1 %v1370_v19, %s2765_s11  ;;  %2606 = vmatpush.msra.mxu3 %v1980_v20 }
 0x1fe   : > { %1629 = vrot.lane.b32.xlu0 %v1563_v36, %s2767_s13  ;;  %v1979_v36 = vld [vmem:[%s4261_s1] sm:$0xff] }
 0x1ff   : > { %v1096_v61 = vpop.permute.xlu1 %1095  ;;  %2100 = vmatpush.msra.mxu0 %v1979_v36  ;;  %2607 = vmatpush.msra.mxu1 %v1979_v36 }
 0x200   : > { %1167 = vst.msk [vmem:[#allocation3 + $0xc8] sm:$0xff] %vm1141_vm5, %v1096_v61  ;;  %v1100_v29 = vpop.permute.xlu0 %1099  ;;  %2608 = vmatpush.msra.mxu2 %v1979_v36  ;;  %v1386_v61 = vld [vmem:[#allocation2 + $0x108] sm:$0xff]  ;;  %2609 = vmatpush.msra.mxu3 %v1979_v36 }
 0x201   : > { %1169 = vst.msk [vmem:[#allocation3 + $0xd8] sm:$0xff] %vm1141_vm5, %v1100_v29  ;;  %1627 = vrot.lane.b32.xlu2 %v1562_v35, %s2767_s13  ;;  %v1767_v36 = vld [vmem:[#allocation2 + $0xca] sm:$0xff] }
 0x203   : > { %v1239_v5 = vpop.permute.xlu2 %1238 }
 0x204   : > { %1335 = vst.msk [vmem:[#allocation3] sm:$0xff] %vm1334_vm6, %v1239_v5  ;;  %v1778_v5 = vld [vmem:[#allocation2 + $0x152] sm:$0xff] }
 0x205   : > { %1641 = vrot.lane.b32.xlu1 %v1569_v58, %s2767_s13 }
 0x206   : > { %1834 = vrot.lane.b32.xlu0 %v1762_v51, %s2766_s12  ;;  %v1585_v51 = vld [vmem:[#allocation2 + $0x151] sm:$0xff] }
 0x207   : > { %v1102_v42 = vpop.permute.xlu1 %1101 }
 0x208   : > { %1170 = vst.msk [vmem:[#allocation3 + $0xe0] sm:$0xff] %vm1141_vm5, %v1102_v42  ;;  %v1106_v39 = vpop.permute.xlu0 %1105  ;;  %v1765_v42 = vld [vmem:[#allocation2 + $0xb2] sm:$0xff] }
 0x209   : > { %1172 = vst.msk [vmem:[#allocation3 + $0xf0] sm:$0xff] %vm1141_vm5, %v1106_v39  ;;  %1448 = vrot.lane.b32.xlu2 %v1376_v41, %s2765_s11 }
 0x20b   : > { %v1245_v9 = vpop.permute.xlu2 %1244 }
 0x20c   : > { %1338 = vst.msk [vmem:[#allocation3 + $0x18] sm:$0xff] %vm1334_vm6, %v1245_v9  ;;  %v1567_v9 = vld [vmem:[#allocation2 + $0x79] sm:$0xff] }
 0x20d   : > { %1438 = vrot.lane.b32.xlu1 %v1371_v27, %s2765_s11 }
 0x20e   : > { %1631 = vrot.lane.b32.xlu0 %v1564_v7, %s2767_s13  ;;  %v1374_v7 = vld [vmem:[#allocation2 + $0x78] sm:$0xff] }
 0x20f   : > { %v1108_v63 = vpop.permute.xlu1 %1107 }
 0x210   : > { %1173 = vst.msk [vmem:[#allocation3 + $0xf8] sm:$0xff] %vm1141_vm5, %v1108_v63  ;;  %v1241_v45 = vpop.permute.xlu0 %1240  ;;  %v1772_v63 = vld [vmem:[#allocation2 + $0x10a] sm:$0xff] }
 0x211   : > { %1336 = vst.msk [vmem:[#allocation3 + $0x8] sm:$0xff] %vm1334_vm6, %v1241_v45  ;;  %1822 = vrot.lane.b32.xlu2 %v1756_v23, %s2766_s12 }
 0x213   : > { %v1251_v30 = vpop.permute.xlu2 %1250 }
 0x214   : > { %1341 = vst.msk [vmem:[#allocation3 + $0x30] sm:$0xff] %vm1334_vm6, %v1251_v30  ;;  %v1393_v30 = vld [vmem:[#allocation2 + $0x158] sm:$0xff] }
 0x215   : > { %1643 = vrot.lane.b32.xlu1 %v1570_v14, %s2767_s13 }
 0x216   : > { %1824 = vrot.lane.b32.xlu0 %v1757_v0, %s2766_s12  ;;  %v1573_v0 = vld [vmem:[#allocation2 + $0xc1] sm:$0xff] }
 0x217   : > { %v1243_v3 = vpop.permute.xlu1 %1242 }
 0x218   : > { %1337 = vst.msk [vmem:[#allocation3 + $0x10] sm:$0xff] %vm1334_vm6, %v1243_v3  ;;  %v1247_v8 = vpop.permute.xlu0 %1246  ;;  %v1380_v3 = vld [vmem:[#allocation2 + $0xc0] sm:$0xff] }
 0x219   : > { %1339 = vst.msk [vmem:[#allocation3 + $0x20] sm:$0xff] %vm1334_vm6, %v1247_v8  ;;  %1450 = vrot.lane.b32.xlu2 %v1377_v4, %s2765_s11 }
 0x21b   : > { %v1257_v28 = vpop.permute.xlu2 %1256 }
 0x21c   : > { %1344 = vst.msk [vmem:[#allocation3 + $0x48] sm:$0xff] %vm1334_vm6, %v1257_v28  ;;  %v1760_v28 = vld [vmem:[#allocation2 + $0x7a] sm:$0xff] }
 0x21d   : > { %1836 = vrot.lane.b32.xlu1 %v1763_v6, %s2766_s12 }
 0x21e   : > { %1850 = vrot.lane.b32.xlu0 %v1770_v15, %s2766_s12 }
 0x21f   : > { %v1249_v17 = vpop.permute.xlu1 %1248 }
 0x220   : > { %1340 = vst.msk [vmem:[#allocation3 + $0x28] sm:$0xff] %vm1334_vm6, %v1249_v17  ;;  %v1253_v34 = vpop.permute.xlu0 %1252 }
 0x221   : > { %1342 = vst.msk [vmem:[#allocation3 + $0x38] sm:$0xff] %vm1334_vm6, %v1253_v34  ;;  %1464 = vrot.lane.b32.xlu2 %v1384_v16, %s2765_s11  ;;  %v1580_v16 = vld [vmem:[#allocation2 + $0x111] sm:$0xff] }
 0x222   : > { %v1387_v34 = vld [vmem:[#allocation2 + $0x110] sm:$0xff] }
 0x223   : > { %v1263_v40 = vpop.permute.xlu2 %1262 }
 0x224   : > { %1347 = vst.msk [vmem:[#allocation3 + $0x60] sm:$0xff] %vm1334_vm6, %v1263_v40 }
 0x225   : > { %1440 = vrot.lane.b32.xlu1 %v1372_v21, %s2765_s11 }
 0x226   : > { %1633 = vrot.lane.b32.xlu0 %v1565_v26, %s2767_s13 }
 0x227   : > { %v1255_v24 = vpop.permute.xlu1 %1254 }
 0x228   : > { %1343 = vst.msk [vmem:[#allocation3 + $0x40] sm:$0xff] %vm1334_vm6, %v1255_v24  ;;  %v1259_v32 = vpop.permute.xlu0 %1258  ;;  %v1779_v24 = vld [vmem:[#allocation2 + $0x15a] sm:$0xff] }
 0x229   : > { %1345 = vst.msk [vmem:[#allocation3 + $0x50] sm:$0xff] %vm1334_vm6, %v1259_v32  ;;  %1657 = vrot.lane.b32.xlu2 %v1577_v18, %s2767_s13  ;;  %v1586_v18 = vld [vmem:[#allocation2 + $0x159] sm:$0xff] }
 0x22b   : > { %v1269_v38 = vpop.permute.xlu2 %1268 }
 0x22c   : > { %1350 = vst.msk [vmem:[#allocation3 + $0x78] sm:$0xff] %vm1334_vm6, %v1269_v38 }
 0x22d   : > { %1645 = vrot.lane.b32.xlu1 %v1571_v46, %s2767_s13  ;;  %v1766_v46 = vld [vmem:[#allocation2 + $0xc2] sm:$0xff] }
 0x22e   : > { %1826 = vrot.lane.b32.xlu0 %v1758_v31, %s2766_s12 }
 0x22f   : > { %v1261_v37 = vpop.permute.xlu1 %1260 }
 0x230   : > { %1346 = vst.msk [vmem:[#allocation3 + $0x58] sm:$0xff] %vm1334_vm6, %v1261_v37  ;;  %v1265_v44 = vpop.permute.xlu0 %1264  ;;  %v1375_v37 = vld [vmem:[#allocation2 + $0x80] sm:$0xff] }
 0x231   : > { %1348 = vst.msk [vmem:[#allocation3 + $0x68] sm:$0xff] %vm1334_vm6, %v1265_v44  ;;  %1452 = vrot.lane.b32.xlu2 %v1378_v50, %s2765_s11  ;;  %v1568_v44 = vld [vmem:[#allocation2 + $0x81] sm:$0xff] }
 0x233   : > { %v1275_v49 = vpop.permute.xlu2 %1274 }
 0x234   : > { %1353 = vst.msk [vmem:[#allocation3 + $0x90] sm:$0xff] %vm1334_vm6, %v1275_v49 }
 0x235   : > { %1838 = vrot.lane.b32.xlu1 %v1764_v54, %s2766_s12 }
 0x236   : > { %1852 = vrot.lane.b32.xlu0 %v1771_v43, %s2766_s12  ;;  %v1773_v43 = vld [vmem:[#allocation2 + $0x112] sm:$0xff] }
 0x237   : > { %v1267_v48 = vpop.permute.xlu1 %1266 }
 0x238   : > { %1349 = vst.msk [vmem:[#allocation3 + $0x70] sm:$0xff] %vm1334_vm6, %v1267_v48  ;;  %v1271_v53 = vpop.permute.xlu0 %1270 }
 0x239   : > { %1351 = vst.msk [vmem:[#allocation3 + $0x80] sm:$0xff] %vm1334_vm6, %v1271_v53  ;;  %1466 = vrot.lane.b32.xlu2 %v1385_v57, %s2765_s11  ;;  %v1574_v53 = vld [vmem:[#allocation2 + $0xc9] sm:$0xff] }
 0x23b   : > { %v1281_v56 = vpop.permute.xlu2 %1280 }
 0x23c   : > { %1356 = vst.msk [vmem:[#allocation3 + $0xa8] sm:$0xff] %vm1334_vm6, %v1281_v56  ;;  %v1381_v56 = vld [vmem:[#allocation2 + $0xc8] sm:$0xff] }
 0x23d   : > { %1442 = vrot.lane.b32.xlu1 %v1373_v13, %s2765_s11  ;;  %v1394_v13 = vld [vmem:[#allocation2 + $0x168] sm:$0xff] }
 0x23e   : > { %1635 = vrot.lane.b32.xlu0 %v1566_v52, %s2767_s13 }
 0x23f   : > { %v1273_v10 = vpop.permute.xlu1 %1272 }
 0x240   : > { %1352 = vst.msk [vmem:[#allocation3 + $0x88] sm:$0xff] %vm1334_vm6, %v1273_v10  ;;  %v1277_v62 = vpop.permute.xlu0 %1276 }
 0x241   : > { %1354 = vst.msk [vmem:[#allocation3 + $0x98] sm:$0xff] %vm1334_vm6, %v1277_v62  ;;  %1659 = vrot.lane.b32.xlu2 %v1578_v2, %s2767_s13  ;;  %v1761_v62 = vld [vmem:[#allocation2 + $0x82] sm:$0xff] }
 0x243   : > { %v1287_v11 = vpop.permute.xlu2 %1286 }
 0x244   : > { %1359 = vst.msk [vmem:[#allocation3 + $0xc0] sm:$0xff] %vm1334_vm6, %v1287_v11 }
 0x245   : > { %1647 = vrot.lane.b32.xlu1 %v1572_v12, %s2767_s13 }
 0x246   : > { %1480 = vrot.lane.b32.xlu0 %v3375_v22, %s2765_s11  ;;  %v1759_v22 = vld [vmem:[#allocation2 + $0x6a] sm:$0xff] }
 0x247   : > { %v1279_v1 = vpop.permute.xlu1 %1278 }
 0x248   : > { %1355 = vst.msk [vmem:[#allocation3 + $0xa0] sm:$0xff] %vm1334_vm6, %v1279_v1  ;;  %v1283_v19 = vpop.permute.xlu0 %1282  ;;  %v1780_v1 = vld [vmem:[#allocation2 + $0x16a] sm:$0xff] }
 0x249   : > { %1357 = vst.msk [vmem:[#allocation3 + $0xb0] sm:$0xff] %vm1334_vm6, %v1283_v19  ;;  %1454 = vrot.lane.b32.xlu2 %v1379_v47, %s2765_s11  ;;  %v1587_v47 = vld [vmem:[#allocation2 + $0x169] sm:$0xff] }
 0x24b   : > { %v1293_v35 = vpop.permute.xlu2 %1292 }
 0x24c   : > { %1362 = vst.msk [vmem:[#allocation3 + $0xd8] sm:$0xff] %vm1334_vm6, %v1293_v35 }
 0x24d   : > { %1828 = vrot.lane.b32.xlu1 %v1759_v22, %s2766_s12 }
 0x24e   : > { %1661 = vrot.lane.b32.xlu0 %v1579_v25, %s2767_s13 }
 0x24f   : > { %v1285_v29 = vpop.permute.xlu1 %1284 }
 0x250   : > { %1358 = vst.msk [vmem:[#allocation3 + $0xb8] sm:$0xff] %vm1334_vm6, %v1285_v29  ;;  %v1289_v58 = vpop.permute.xlu0 %1288  ;;  %v1382_v29 = vld [vmem:[#allocation2 + $0xd8] sm:$0xff] }
 0x251   : > { %1360 = vst.msk [vmem:[#allocation3 + $0xc8] sm:$0xff] %vm1334_vm6, %v1289_v58  ;;  %1468 = vrot.lane.b32.xlu2 %v1386_v61, %s2765_s11  ;;  %v1389_v58 = vld [vmem:[#allocation2 + $0x128] sm:$0xff] }
 0x253   : > { %v1626_v41 = vpop.permute.xlu2 %1625 }
 0x255   : > { %1673 = vrot.lane.b32.xlu1 %v1585_v51, %s2767_s13 }
 0x256   : > { %1866 = vrot.lane.b32.xlu0 %v1778_v5, %s2766_s12  ;;  %v1774_v5 = vld [vmem:[#allocation2 + $0x122] sm:$0xff] }
 0x257   : > { %v1291_v39 = vpop.permute.xlu1 %1290 }
 0x258   : > { %1361 = vst.msk [vmem:[#allocation3 + $0xd0] sm:$0xff] %vm1334_vm6, %v1291_v39  ;;  %v1295_v27 = vpop.permute.xlu0 %1294  ;;  %v1395_v39 = vld [vmem:[#allocation2 + $0x170] sm:$0xff] }
 0x259   : > { %1363 = vst.msk [vmem:[#allocation3 + $0xe0] sm:$0xff] %vm1334_vm6, %v1295_v27  ;;  %1840 = vrot.lane.b32.xlu2 %v1765_v42, %s2766_s12  ;;  %v1582_v27 = vld [vmem:[#allocation2 + $0x129] sm:$0xff] }
 0x25b   : > { %v1628_v23 = vpop.permute.xlu2 %1627 }
 0x25d   : > { %1444 = vrot.lane.b32.xlu1 %v1374_v7, %s2765_s11 }
 0x25e   : > { %1637 = vrot.lane.b32.xlu0 %v1567_v9, %s2767_s13  ;;  %v1575_v9 = vld [vmem:[#allocation2 + $0xd9] sm:$0xff] }
 0x25f   : > { %v1433_v45 = vpop.permute.xlu1 %1432 }
 0x260   : > { %1529 = vst.msk [vmem:[#allocation3] sm:$0xff] %vm1528_vm8, %v1433_v45  ;;  %v1819_v14 = vpop.permute.xlu0 %1818 }
 0x261   : > { %1722 = vst.msk [vmem:[#allocation3] sm:$0xff] %vm1721_vm9, %v1626_v41  ;;  %1854 = vrot.lane.b32.xlu2 %v1772_v63, %s2766_s12 }
 0x262   : > { %1915 = vst.msk [vmem:[#allocation3] sm:$0xff] %vm1914_vm10, %v1819_v14  ;;  %v1588_v14 = vld [vmem:[#allocation2 + $0x171] sm:$0xff] }
 0x263   : > { %v1449_v4 = vpop.permute.xlu2 %1448 }
 0x264   : > { %1537 = vst.msk [vmem:[#allocation3 + $0x40] sm:$0xff] %vm1528_vm8, %v1449_v4  ;;  %v1768_v4 = vld [vmem:[#allocation2 + $0xda] sm:$0xff] }
 0x265   : > { %1649 = vrot.lane.b32.xlu1 %v1573_v0, %s2767_s13  ;;  %v1781_v0 = vld [vmem:[#allocation2 + $0x172] sm:$0xff] }
 0x266   : > { %1482 = vrot.lane.b32.xlu0 %v1393_v30, %s2765_s11 }
 0x267   : > { %v1435_v8 = vpop.permute.xlu1 %1434 }
 0x268   : > { %1530 = vst.msk [vmem:[#allocation3 + $0x8] sm:$0xff] %vm1528_vm8, %v1435_v8  ;;  %v1821_v6 = vpop.permute.xlu0 %1820 }
 0x269   : > { %1723 = vst.msk [vmem:[#allocation3 + $0x8] sm:$0xff] %vm1721_vm9, %v1628_v23  ;;  %v1947_v15 = vld [vmem:[#allocation3] sm:$0xff]  ;;  %1456 = vrot.lane.b32.xlu2 %v1380_v3, %s2765_s11 }
 0x26a   : > { %1916 = vst.msk [vmem:[#allocation3 + $0x8] sm:$0xff] %vm1914_vm10, %v1821_v6  ;;  %2559 = vmatmul.msk.f32.vlgmr.msra.gmra.mxu0 %vm1984_vm11, %v1947_v15 }
 0x26b   : > { %v1823_v17 = vpop.permute.xlu2 %1822 }
 0x26d   : > { %1830 = vrot.lane.b32.xlu1 %v1760_v28, %s2766_s12  ;;  %v1383_v28 = vld [vmem:[#allocation2 + $0xe0] sm:$0xff] }
 0x26e   : > { %1663 = vrot.lane.b32.xlu0 %v1580_v16, %s2767_s13  ;;  %v1390_v16 = vld [vmem:[#allocation2 + $0x138] sm:$0xff] }
 0x26f   : > { %v1437_v21 = vpop.permute.xlu1 %1436 }
 0x270   : > { %1531 = vst.msk [vmem:[#allocation3 + $0x10] sm:$0xff] %vm1528_vm8, %v1437_v21  ;;  %v1630_v26 = vpop.permute.xlu0 %1629 }
 0x271   : > { %1724 = vst.msk [vmem:[#allocation3 + $0x10] sm:$0xff] %vm1721_vm9, %v1630_v26  ;;  %v1948_v40 = vld [vmem:[#allocation3 + $0x8] sm:$0xff]  ;;  %1470 = vrot.lane.b32.xlu2 %v1387_v34, %s2765_s11  ;;  %v1775_v34 = vld [vmem:[#allocation2 + $0x12a] sm:$0xff] }
 0x272   : > { %1917 = vst.msk [vmem:[#allocation3 + $0x10] sm:$0xff] %vm1914_vm10, %v1823_v17  ;;  %2560 = vmatmul.msk.f32.gmra.mxu0 %vm1984_vm11, %v1948_v40  ;;  %v1396_v40 = vld [vmem:[#allocation2 + $0x180] sm:$0xff] }
 0x273   : > { %v1451_v32 = vpop.permute.xlu2 %1450 }
 0x274   : > { %1538 = vst.msk [vmem:[#allocation3 + $0x48] sm:$0xff] %vm1528_vm8, %v1451_v32  ;;  %v1576_v32 = vld [vmem:[#allocation2 + $0xe1] sm:$0xff] }
 0x275   : > { %1675 = vrot.lane.b32.xlu1 %v1586_v18, %s2767_s13  ;;  %v1583_v18 = vld [vmem:[#allocation2 + $0x139] sm:$0xff] }
 0x276   : > { %1868 = vrot.lane.b32.xlu0 %v1779_v24, %s2766_s12 }
 0x277   : > { %v1642_v31 = vpop.permute.xlu1 %1641 }
 0x278   : > { %1730 = vst.msk [vmem:[#allocation3 + $0x40] sm:$0xff] %vm1721_vm9, %v1642_v31  ;;  %v1835_v38 = vpop.permute.xlu0 %1834 }
 0x279   : > { %1923 = vst.msk [vmem:[#allocation3 + $0x40] sm:$0xff] %vm1914_vm10, %v1835_v38  ;;  %v1949_v50 = vld [vmem:[#allocation3 + $0x10] sm:$0xff]  ;;  %1842 = vrot.lane.b32.xlu2 %v1766_v46, %s2766_s12 }
 0x27a   : > { %2561 = vmatmul.msk.f32.gmra.mxu0 %vm1984_vm11, %v1949_v50  ;;  %v3877_v50 = vld [vmem:[#allocation2 + $0x182] sm:$0xff] }
 0x27b   : > { %v1465_v54 = vpop.permute.xlu2 %1464 }
 0x27c   : > { %1545 = vst.msk [vmem:[#allocation3 + $0x80] sm:$0xff] %vm1528_vm8, %v1465_v54 }
 0x27d   : > { %1446 = vrot.lane.b32.xlu1 %v1375_v37, %s2765_s11 }
 0x27e   : > { %1639 = vrot.lane.b32.xlu0 %v1568_v44, %s2767_s13  ;;  %v1769_v44 = vld [vmem:[#allocation2 + $0xe2] sm:$0xff] }
 0x27f   : > { %v1439_v49 = vpop.permute.xlu1 %1438 }
 0x280   : > { %1532 = vst.msk [vmem:[#allocation3 + $0x18] sm:$0xff] %vm1528_vm8, %v1439_v49  ;;  %v1632_v57 = vpop.permute.xlu0 %1631  ;;  %v1955_v48 = vld [vmem:[#allocation3 + $0x40] sm:$0xff] }
 0x281   : > { %1725 = vst.msk [vmem:[#allocation3 + $0x18] sm:$0xff] %vm1721_vm9, %v1632_v57  ;;  %2567 = vmatmul.msk.f32.vlgmr.msra.gmra.mxu1 %vm1984_vm11, %v1955_v48  ;;  %1856 = vrot.lane.b32.xlu2 %v1773_v43, %s2766_s12  ;;  %v1397_v48 = vld [vmem:[#allocation2 + $0x188] sm:$0xff] }
 0x283   : > { %v1658_v52 = vpop.permute.xlu2 %1657 }
 0x284   : > { %1738 = vst.msk [vmem:[#allocation3 + $0x80] sm:$0xff] %vm1721_vm9, %v1658_v52 }
 0x285   : > { %1651 = vrot.lane.b32.xlu1 %v1574_v53, %s2767_s13  ;;  %v1776_v53 = vld [vmem:[#allocation2 + $0x13a] sm:$0xff] }
 0x286   : > { %1484 = vrot.lane.b32.xlu0 %v1394_v13, %s2765_s11 }
 0x287   : > { %v1644_v2 = vpop.permute.xlu1 %1643 }
 0x288   : > { %1731 = vst.msk [vmem:[#allocation3 + $0x48] sm:$0xff] %vm1721_vm9, %v1644_v2  ;;  %v1825_v10 = vpop.permute.xlu0 %1824  ;;  %v1584_v2 = vld [vmem:[#allocation2 + $0x141] sm:$0xff] }
 0x289   : > { %1918 = vst.msk [vmem:[#allocation3 + $0x18] sm:$0xff] %vm1914_vm10, %v1825_v10  ;;  %1458 = vrot.lane.b32.xlu2 %v1381_v56, %s2765_s11  ;;  %v1777_v10 = vld [vmem:[#allocation2 + $0x142] sm:$0xff] }
 0x28b   : > { %v1453_v12 = vpop.permute.xlu2 %1452 }
 0x28c   : > { %1539 = vst.msk [vmem:[#allocation3 + $0x50] sm:$0xff] %vm1528_vm8, %v1453_v12 }
 0x28d   : > { %1832 = vrot.lane.b32.xlu1 %v1761_v62, %s2766_s12 }
 0x28e   : > { %1665 = vrot.lane.b32.xlu0 %v1581_v55, %s2767_s13  ;;  %v1391_v55 = vld [vmem:[#allocation2 + $0x140] sm:$0xff] }
 0x28f   : > { %v1837_v33 = vpop.permute.xlu1 %1836 }
 0x290   : > { %1924 = vst.msk [vmem:[#allocation3 + $0x48] sm:$0xff] %vm1914_vm10, %v1837_v33  ;;  %v1851_v11 = vpop.permute.xlu0 %1850  ;;  %v1950_v20 = vld [vmem:[#allocation3 + $0x18] sm:$0xff] }
 0x291   : > { %1931 = vst.msk [vmem:[#allocation3 + $0x80] sm:$0xff] %vm1914_vm10, %v1851_v11  ;;  %2562 = vmatmul.msk.f32.gmra.mxu0 %vm1984_vm11, %v1950_v20  ;;  %1472 = vrot.lane.b32.xlu2 %v1388_v59, %s2765_s11  ;;  %v1783_v33 = vld [vmem:[#allocation2 + $0x18a] sm:$0xff]  ;;  %v1398_v11 = vld [vmem:[#allocation2 + $0x198] sm:$0xff] }
 0x293   : > { %v1467_v19 = vpop.permute.xlu2 %1466 }
 0x294   : > { %1546 = vst.msk [vmem:[#allocation3 + $0x88] sm:$0xff] %vm1528_vm8, %v1467_v19 }
 0x295   : > { %1677 = vrot.lane.b32.xlu1 %v1587_v47, %s2767_s13  ;;  %v1590_v47 = vld [vmem:[#allocation2 + $0x189] sm:$0xff] }
 0x296   : > { %1870 = vrot.lane.b32.xlu0 %v1780_v1, %s2766_s12 }
 0x297   : > { %v1441_v22 = vpop.permute.xlu1 %1440  ;;  %v1956_v25 = vld [vmem:[#allocation3 + $0x48] sm:$0xff] }
 0x298   : > { %1533 = vst.msk [vmem:[#allocation3 + $0x20] sm:$0xff] %vm1528_vm8, %v1441_v22  ;;  %2568 = vmatmul.msk.f32.gmra.mxu1 %vm1984_vm11, %v1956_v25  ;;  %v1634_v35 = vpop.permute.xlu0 %1633  ;;  %v1963_v61 = vld [vmem:[#allocation3 + $0x80] sm:$0xff]  ;;  %v1591_v22 = vld [vmem:[#allocation2 + $0x199] sm:$0xff] }
 0x299   : > { %1726 = vst.msk [vmem:[#allocation3 + $0x20] sm:$0xff] %vm1721_vm9, %v1634_v35  ;;  %2575 = vmatmul.msk.f32.vlgmr.msra.gmra.mxu2 %vm1984_vm11, %v1963_v61  ;;  %1844 = vrot.lane.b32.xlu2 %v1767_v36, %s2766_s12 }
 0x29b   : > { %v1660_v51 = vpop.permute.xlu2 %1659 }
 0x29c   : > { %1739 = vst.msk [vmem:[#allocation3 + $0x88] sm:$0xff] %vm1721_vm9, %v1660_v51 }
 0x29d   : > { %1460 = vrot.lane.b32.xlu1 %v1382_v29, %s2765_s11 }
 0x29e   : > { %1474 = vrot.lane.b32.xlu0 %v1389_v58, %s2765_s11 }
 0x29f   : > { %v1646_v41 = vpop.permute.xlu1 %1645 }
 0x2a0   : > { %1732 = vst.msk [vmem:[#allocation3 + $0x50] sm:$0xff] %vm1721_vm9, %v1646_v41  ;;  %v1827_v42 = vpop.permute.xlu0 %1826  ;;  %v1785_v41 = vld [vmem:[#allocation2 + $0x1a2] sm:$0xff] }
 0x2a1   : > { %1919 = vst.msk [vmem:[#allocation3 + $0x20] sm:$0xff] %vm1914_vm10, %v1827_v42  ;;  %1858 = vrot.lane.b32.xlu2 %v1774_v5, %s2766_s12  ;;  %v1399_v5 = vld [vmem:[#allocation2 + $0x1a0] sm:$0xff] }
 0x2a3   : > { %v1455_v7 = vpop.permute.xlu2 %1454 }
 0x2a4   : > { %1540 = vst.msk [vmem:[#allocation3 + $0x58] sm:$0xff] %vm1528_vm8, %v1455_v7 }
 0x2a5   : > { %1486 = vrot.lane.b32.xlu1 %v1395_v39, %s2765_s11 }
 0x2a6   : > { %1667 = vrot.lane.b32.xlu0 %v1582_v27, %s2767_s13  ;;  %v1784_v27 = vld [vmem:[#allocation2 + $0x19a] sm:$0xff] }
 0x2a7   : > { %v1839_v23 = vpop.permute.xlu1 %1838 }
 0x2a8   : > { %1925 = vst.msk [vmem:[#allocation3 + $0x50] sm:$0xff] %vm1914_vm10, %v1839_v23  ;;  %v1853_v63 = vpop.permute.xlu0 %1852  ;;  %v1951_v45 = vld [vmem:[#allocation3 + $0x20] sm:$0xff] }
 0x2a9   : > { %1932 = vst.msk [vmem:[#allocation3 + $0x88] sm:$0xff] %vm1914_vm10, %v1853_v63  ;;  %2563 = vmatmul.msk.f32.gmra.mxu0 %vm1984_vm11, %v1951_v45  ;;  %1653 = vrot.lane.b32.xlu2 %v1575_v9, %s2767_s13 }
 0x2ab   : > { %v1469_v30 = vpop.permute.xlu2 %1468 }
 0x2ac   : > { %1547 = vst.msk [vmem:[#allocation3 + $0x90] sm:$0xff] %vm1528_vm8, %v1469_v30 }
 0x2ad   : > { %1679 = vrot.lane.b32.xlu1 %v1588_v14, %s2767_s13 }
 0x2ae   : > { %1872 = vrot.lane.b32.xlu0 %v1781_v0, %s2766_s12 }
 0x2af   : > { %v1443_v3 = vpop.permute.xlu1 %1442  ;;  %v1957_v8 = vld [vmem:[#allocation3 + $0x50] sm:$0xff] }
 0x2b0   : > { %1534 = vst.msk [vmem:[#allocation3 + $0x28] sm:$0xff] %vm1528_vm8, %v1443_v3  ;;  %2569 = vmatmul.msk.f32.gmra.mxu1 %vm1984_vm11, %v1957_v8  ;;  %v1636_v6 = vpop.permute.xlu0 %1635  ;;  %v1964_v15 = vld [vmem:[#allocation3 + $0x88] sm:$0xff] }
 0x2b1   : > { %1727 = vst.msk [vmem:[#allocation3 + $0x28] sm:$0xff] %vm1721_vm9, %v1636_v6  ;;  %2576 = vmatmul.msk.f32.gmra.mxu2 %vm1984_vm11, %v1964_v15  ;;  %1846 = vrot.lane.b32.xlu2 %v1768_v4, %s2766_s12  ;;  %v1592_v15 = vld [vmem:[#allocation2 + $0x1a1] sm:$0xff] }
 0x2b3   : > { %v1841_v17 = vpop.permute.xlu2 %1840 }
 0x2b5   : > { %1462 = vrot.lane.b32.xlu1 %v1383_v28, %s2765_s11 }
 0x2b6   : > { %1476 = vrot.lane.b32.xlu0 %v1390_v16, %s2765_s11 }
 0x2b7   : > { %v1648_v21 = vpop.permute.xlu1 %1647 }
 0x2b8   : > { %1733 = vst.msk [vmem:[#allocation3 + $0x58] sm:$0xff] %vm1721_vm9, %v1648_v21  ;;  %v1481_v26 = vpop.permute.xlu0 %1480 }
 0x2b9   : > { %1553 = vst.msk [vmem:[#allocation3 + $0xc0] sm:$0xff] %vm1528_vm8, %v1481_v26  ;;  %1860 = vrot.lane.b32.xlu2 %v1775_v34, %s2766_s12 }
 0x2ba   : > { %1926 = vst.msk [vmem:[#allocation3 + $0x58] sm:$0xff] %vm1914_vm10, %v1841_v17 }
 0x2bb   : > { %v1855_v24 = vpop.permute.xlu2 %1854 }
 0x2bd   : > { %1488 = vrot.lane.b32.xlu1 %v1396_v40, %s2765_s11 }
 0x2be   : > { %1669 = vrot.lane.b32.xlu0 %v1583_v18, %s2767_s13 }
 0x2bf   : > { %v1829_v46 = vpop.permute.xlu1 %1828 }
 0x2c0   : > { %1920 = vst.msk [vmem:[#allocation3 + $0x28] sm:$0xff] %vm1914_vm10, %v1829_v46  ;;  %v1662_v31 = vpop.permute.xlu0 %1661 }
 0x2c1   : > { %1740 = vst.msk [vmem:[#allocation3 + $0x90] sm:$0xff] %vm1721_vm9, %v1662_v31  ;;  %1655 = vrot.lane.b32.xlu2 %v1576_v32, %s2767_s13  ;;  %v1958_v38 = vld [vmem:[#allocation3 + $0x58] sm:$0xff] }
 0x2c2   : > { %1933 = vst.msk [vmem:[#allocation3 + $0x90] sm:$0xff] %vm1914_vm10, %v1855_v24  ;;  %2570 = vmatmul.msk.f32.gmra.mxu1 %vm1984_vm11, %v1958_v38 }
 0x2c3   : > { %v1457_v37 = vpop.permute.xlu2 %1456 }
 0x2c4   : > { %1541 = vst.msk [vmem:[#allocation3 + $0x60] sm:$0xff] %vm1528_vm8, %v1457_v37 }
 0x2c5   : > { %1681 = vrot.lane.b32.xlu1 %v3587_v60, %s2767_s13 }
 0x2c6   : > { %1874 = vrot.lane.b32.xlu0 %v3877_v50, %s2766_s12 }
 0x2c7   : > { %v1674_v54 = vpop.permute.xlu1 %1673  ;;  %v1952_v43 = vld [vmem:[#allocation3 + $0x28] sm:$0xff] }
 0x2c8   : > { %1746 = vst.msk [vmem:[#allocation3 + $0xc0] sm:$0xff] %vm1721_vm9, %v1674_v54  ;;  %2564 = vmatmul.msk.f32.gmra.mxu0 %vm1984_vm11, %v1952_v43  ;;  %v1867_v49 = vpop.permute.xlu0 %1866 }
 0x2c9   : > { %1939 = vst.msk [vmem:[#allocation3 + $0xc0] sm:$0xff] %vm1914_vm10, %v1867_v49  ;;  %1848 = vrot.lane.b32.xlu2 %v1769_v44, %s2766_s12  ;;  %v1965_v57 = vld [vmem:[#allocation3 + $0x90] sm:$0xff] }
 0x2ca   : > { %2577 = vmatmul.msk.f32.gmra.mxu2 %vm1984_vm11, %v1965_v57 }
 0x2cb   : > { %v1471_v60 = vpop.permute.xlu2 %1470 }
 0x2cc   : > { %1548 = vst.msk [vmem:[#allocation3 + $0x98] sm:$0xff] %vm1528_vm8, %v1471_v60 }
 0x2cd   : > { %1296 = vrot.lane.b32.xlu1 %v1781_v0, %s2764_s10 }
 0x2ce   : > { %1490 = vrot.lane.b32.xlu0 %v1397_v48, %s2765_s11 }
 0x2cf   : > { %v1445_v13 = vpop.permute.xlu1 %1444 }
 0x2d0   : > { %1535 = vst.msk [vmem:[#allocation3 + $0x30] sm:$0xff] %vm1528_vm8, %v1445_v13  ;;  %v1638_v52 = vpop.permute.xlu0 %1637  ;;  %v1971_v56 = vld [vmem:[#allocation3 + $0xc0] sm:$0xff] }
 0x2d1   : > { %1728 = vst.msk [vmem:[#allocation3 + $0x30] sm:$0xff] %vm1721_vm9, %v1638_v52  ;;  %2583 = vmatmul.msk.f32.vlgmr.msra.gmra.mxu3 %vm1984_vm11, %v1971_v56  ;;  %1862 = vrot.lane.b32.xlu2 %v1776_v53, %s2766_s12 }
 0x2d3   : > { %v1843_v62 = vpop.permute.xlu2 %1842 }
 0x2d5   : > { %1671 = vrot.lane.b32.xlu1 %v1584_v2, %s2767_s13 }
 0x2d6   : > { %1864 = vrot.lane.b32.xlu0 %v1777_v10, %s2766_s12 }
 0x2d7   : > { %v1650_v12 = vpop.permute.xlu1 %1649 }
 0x2d8   : > { %1734 = vst.msk [vmem:[#allocation3 + $0x60] sm:$0xff] %vm1721_vm9, %v1650_v12  ;;  %v1483_v59 = vpop.permute.xlu0 %1482 }
 0x2d9   : > { %1554 = vst.msk [vmem:[#allocation3 + $0xc8] sm:$0xff] %vm1528_vm8, %v1483_v59  ;;  %1478 = vrot.lane.b32.xlu2 %v1391_v55, %s2765_s11 }
 0x2da   : > { %1927 = vst.msk [vmem:[#allocation3 + $0x60] sm:$0xff] %vm1914_vm10, %v1843_v62 }
 0x2db   : > { %v1857_v20 = vpop.permute.xlu2 %1856 }
 0x2dd   : > { %1876 = vrot.lane.b32.xlu1 %v1783_v33, %s2766_s12 }
 0x2de   : > { %1492 = vrot.lane.b32.xlu0 %v1398_v11, %s2765_s11 }
 0x2df   : > { %v1831_v1 = vpop.permute.xlu1 %1830 }
 0x2e0   : > { %1921 = vst.msk [vmem:[#allocation3 + $0x30] sm:$0xff] %vm1914_vm10, %v1831_v1  ;;  %v1664_v19 = vpop.permute.xlu0 %1663 }
 0x2e1   : > { %1741 = vst.msk [vmem:[#allocation3 + $0x98] sm:$0xff] %vm1721_vm9, %v1664_v19  ;;  %v1959_v36 = vld [vmem:[#allocation3 + $0x60] sm:$0xff]  ;;  %1683 = vrot.lane.b32.xlu2 %v1590_v47, %s2767_s13 }
 0x2e2   : > { %1934 = vst.msk [vmem:[#allocation3 + $0x98] sm:$0xff] %vm1914_vm10, %v1857_v20  ;;  %2571 = vmatmul.msk.f32.gmra.mxu1 %vm1984_vm11, %v1959_v36 }
 0x2e3   : > { %v1459_v25 = vpop.permute.xlu2 %1458 }
 0x2e4   : > { %1542 = vst.msk [vmem:[#allocation3 + $0x68] sm:$0xff] %vm1528_vm8, %v1459_v25 }
 0x2e5   : > { %1685 = vrot.lane.b32.xlu1 %v1591_v22, %s2767_s13 }
 0x2e6   : > { %1300 = vrot.lane.b32.xlu0 %v1783_v33, %s2764_s10 }
 0x2e7   : > { %v2102_v35 = vpop.f32.mrf.mxu0  ;;  %v1676_v61 = vpop.permute.xlu1 %1675  ;;  %v1953_v29 = vld [vmem:[#allocation3 + $0x30] sm:$0xff] }
 0x2e8   : > { %2199 = vst.msk [vmem:[%s3916_s20] sm:$0xff] %vm2198_vm12, %v2102_v35  ;;  %2565 = vmatmul.msk.f32.gmra.mxu0 %vm1984_vm11, %v1953_v29  ;;  %v1869_v58 = vpop.permute.xlu0 %1868  ;;  %v2302_v39 = vmul.f32 %v2102_v35, %v2102_v35  ;;  %v2231_v23 = vsel %vm2198_vm12, %v2102_v35, 0.0 }
 0x2e9   : > { %1747 = vst.msk [vmem:[#allocation3 + $0xc8] sm:$0xff] %vm1721_vm9, %v1676_v61  ;;  %v1966_v51 = vld [vmem:[#allocation3 + $0x98] sm:$0xff]  ;;  %1298 = vrot.lane.b32.xlu2 %v3877_v50, %s2764_s10 }
 0x2ea   : > { %1940 = vst.msk [vmem:[#allocation3 + $0xc8] sm:$0xff] %vm1914_vm10, %v1869_v58  ;;  %2578 = vmatmul.msk.f32.gmra.mxu2 %vm1984_vm11, %v1966_v51  ;;  %v2334_v4 = vsel %vm2198_vm12, %v2302_v39, 0.0 }
 0x2eb   : > { %v1473_v42 = vpop.permute.xlu2 %1472 }
 0x2ec   : > { %1549 = vst.msk [vmem:[#allocation3 + $0xa0] sm:$0xff] %vm1528_vm8, %v1473_v42 }
 0x2ed   : > { %1494 = vrot.lane.b32.xlu1 %v1399_v5, %s2765_s11  ;;  %s2425_s11 = scalar_lea.hbm %s4263_s3, %s2814_s19  ;;  %s2410_s19 = scalar_lea.sflag [#allocation5], %s4189_s28 }
 0x2ee   : > { %1880 = vrot.lane.b32.xlu0 %v1785_v41, %s2766_s12  ;;  %s4202_s30 = sshll.u32 %s2425_s11, 4  ;;  %s2430_s30 = int_to_ptr.hbm [resolvable:$true] %s4202_s30 }
 0x2ef   : > { %v2105_v7 = vpop.f32.mrf.mxu0  ;;  %v1447_v9 = vpop.permute.xlu1 %1446  ;;  %s2677_s8 = sshra.s32 %s2430_s30, 4  ;;  %s2678_s8 = int_to_ptr.hbm [resolvable:$true] %s2677_s8 }
 0x2f0   : > { %2200 = vst.msk [vmem:[%s3916_s20 + $0x8] sm:$0xff] %vm2198_vm12, %v2105_v7  ;;  %v2232_v63 = vsel %vm2198_vm12, %v2105_v7, 0.0  ;;  %v2303_v45 = vmul.f32 %v2105_v7, %v2105_v7  ;;  %v1640_v14 = vpop.permute.xlu0 %1639  ;;  %s2679_s9 = scalar_lea.hbm %s2678_s8, 1  ;;  %p2684_p0 = scmp.lt.s32.totalorder %s2678_s8, %s4263_s3 }
 0x2f1   : > { %v2233_v0 = vadd.f32 %v2232_v63, %v2231_v23  ;;  %1536 = vst.msk [vmem:[#allocation3 + $0x38] sm:$0xff] %vm1528_vm8, %v1447_v9  ;;  %v1972_v30 = vld [vmem:[#allocation3 + $0xc8] sm:$0xff]  ;;  %1878 = vrot.lane.b32.xlu2 %v1784_v27, %s2766_s12  ;;  %p2680_p11 = scmp.ne.s32.totalorder %s2678_s8, %s2679_s9  ;;  %p2685_p1 = scmp.lt.s32.totalorder %s2683_s29, %s2679_s9 }
 0x2f2   : > { %v2335_v3 = vsel %vm2198_vm12, %v2303_v45, 0.0  ;;  %1729 = vst.msk [vmem:[#allocation3 + $0x38] sm:$0xff] %vm1721_vm9, %v1640_v14  ;;  %2584 = vmatmul.msk.f32.gmra.mxu3 %vm1984_vm11, %v1972_v30 }
 0x2f3   : > { %v2336_v8 = vadd.f32 %v2335_v3, %v2334_v4  ;;  %v1845_v6 = vpop.permute.xlu2 %1844  ;;  %p2681_p12 = pnand %p2680_p11, %p2831_p5  ;;  %p2686_p2 = por %p2685_p1, %p2684_p0 }
 0x2f5   : > { %p2682_p13 = pneg %p2681_p12 }
 0x2f7   : > { %v1652_v28 = vpop.permute.xlu1 %1651  ;;  %v2108_v16 = vpop.f32.mrf.mxu0  ;;  %p2687_p3 = pnand %p2686_p2, %p2682_p13 }
 0x2f8   : > { %1735 = vst.msk [vmem:[#allocation3 + $0x68] sm:$0xff] %vm1721_vm9, %v1652_v28  ;;  %v2234_v17 = vsel %vm2198_vm12, %v2108_v16, 0.0  ;;  %v2304_v34 = vmul.f32 %v2108_v16, %v2108_v16  ;;  %v1485_v21 = vpop.permute.xlu0 %1484 }
 0x2f9   : > { %2201 = vst.msk [vmem:[%s3916_s20 + $0x10] sm:$0xff] %vm2198_vm12, %v2108_v16  ;;  %v2235_v26 = vadd.f32 %v2234_v17, %v2233_v0  ;;  %1687 = vrot.lane.b32.xlu2 %v1592_v15, %s2767_s13 }
 0x2fa   : > { %v2337_v40 = vsel %vm2198_vm12, %v2304_v34, 0.0  ;;  %1555 = vst.msk [vmem:[#allocation3 + $0xd0] sm:$0xff] %vm1528_vm8, %v1485_v21 }
 0x2fb   : > { %v2338_v18 = vadd.f32 %v2337_v40, %v2336_v8  ;;  %1928 = vst.msk [vmem:[#allocation3 + $0x68] sm:$0xff] %vm1914_vm10, %v1845_v6  ;;  %v1859_v24 = vpop.permute.xlu2 %1858 }
 0x2fe   : > { %v3948_v32 = vpop.f32.mrf.mxu1 }
 0x2ff   : > { %2207 = vst.msk [vmem:[%s3916_s20 + $0x40] sm:$0xff] %vm2198_vm12, %v3948_v32  ;;  %v1833_v46 = vpop.permute.xlu1 %1832 }
 0x300   : > { %1922 = vst.msk [vmem:[#allocation3 + $0x38] sm:$0xff] %vm1914_vm10, %v1833_v46  ;;  %v1666_v31 = vpop.permute.xlu0 %1665 }
 0x301   : > { %1742 = vst.msk [vmem:[#allocation3 + $0xa0] sm:$0xff] %vm1721_vm9, %v1666_v31 }
 0x302   : > { %1935 = vst.msk [vmem:[#allocation3 + $0xa0] sm:$0xff] %vm1914_vm10, %v1859_v24  ;;  %v1960_v38 = vld [vmem:[#allocation3 + $0x68] sm:$0xff] }
 0x303   : > { %v1654_v50 = vpop.permute.xlu2 %1653  ;;  %2572 = vmatmul.msk.f32.gmra.mxu1 %vm1984_vm11, %v1960_v38 }
 0x307   : > { %v1678_v37 = vpop.permute.xlu1 %1677  ;;  %v1954_v44 = vld [vmem:[#allocation3 + $0x38] sm:$0xff] }
 0x308   : > { %1748 = vst.msk [vmem:[#allocation3 + $0xd0] sm:$0xff] %vm1721_vm9, %v1678_v37  ;;  %2566 = vmatmul.msk.f32.gmra.mxu0 %vm1984_vm11, %v1954_v44  ;;  %v1871_v54 = vpop.permute.xlu0 %1870 }
 0x309   : > { %1941 = vst.msk [vmem:[#allocation3 + $0xd0] sm:$0xff] %vm1914_vm10, %v1871_v54  ;;  %v1967_v43 = vld [vmem:[#allocation3 + $0xa0] sm:$0xff] }
 0x30a   : > { %2579 = vmatmul.msk.f32.gmra.mxu2 %vm1984_vm11, %v1967_v43 }
 0x30b   : > { %v1847_v49 = vpop.permute.xlu2 %1846 }
 0x30e   : > { %v2111_v57 = vpop.f32.mrf.mxu0 }
 0x30f   : > { %v1461_v48 = vpop.permute.xlu1 %1460  ;;  %2202 = vst.msk [vmem:[%s3916_s20 + $0x18] sm:$0xff] %vm2198_vm12, %v2111_v57  ;;  %v2236_v60 = vsel %vm2198_vm12, %v2111_v57, 0.0  ;;  %v2305_v53 = vmul.f32 %v2111_v57, %v2111_v57 }
 0x310   : > { %1543 = vst.msk [vmem:[#allocation3 + $0x70] sm:$0xff] %vm1528_vm8, %v1461_v48  ;;  %v2237_v13 = vadd.f32 %v2236_v60, %v2235_v26  ;;  %v1475_v52 = vpop.permute.xlu0 %1474  ;;  %v1973_v56 = vld [vmem:[#allocation3 + $0xd0] sm:$0xff] }
 0x311   : > { %1736 = vst.msk [vmem:[#allocation3 + $0x70] sm:$0xff] %vm1721_vm9, %v1654_v50  ;;  %v2339_v2 = vsel %vm2198_vm12, %v2305_v53, 0.0  ;;  %2585 = vmatmul.msk.f32.gmra.mxu3 %vm1984_vm11, %v1973_v56 }
 0x312   : > { %v2340_v10 = vadd.f32 %v2339_v2, %v2338_v18  ;;  %1550 = vst.msk [vmem:[#allocation3 + $0xa8] sm:$0xff] %vm1528_vm8, %v1475_v52 }
 0x313   : > { %1929 = vst.msk [vmem:[#allocation3 + $0x70] sm:$0xff] %vm1914_vm10, %v1847_v49  ;;  %v1861_v62 = vpop.permute.xlu2 %1860 }
 0x315   : > { %v3970_v55 = vpop.f32.mrf.mxu1 }
 0x316   : > { %2208 = vst.msk [vmem:[%s3916_s20 + $0x48] sm:$0xff] %vm2198_vm12, %v3970_v55 }
 0x317   : > { %v1487_v12 = vpop.permute.xlu1 %1486 }
 0x318   : > { %1556 = vst.msk [vmem:[#allocation3 + $0xd8] sm:$0xff] %vm1528_vm8, %v1487_v12  ;;  %v1668_v59 = vpop.permute.xlu0 %1667 }
 0x319   : > { %1743 = vst.msk [vmem:[#allocation3 + $0xa8] sm:$0xff] %vm1721_vm9, %v1668_v59 }
 0x31a   : > { %1936 = vst.msk [vmem:[#allocation3 + $0xa8] sm:$0xff] %vm1914_vm10, %v1861_v62  ;;  %v1961_v33 = vld [vmem:[#allocation3 + $0x70] sm:$0xff] }
 0x31b   : > { %2573 = vmatmul.msk.f32.gmra.mxu1 %vm1984_vm11, %v1961_v33  ;;  %v1656_v11 = vpop.permute.xlu2 %1655 }
 0x31c   : > { %v3979_v20 = vpop.f32.mrf.mxu2 }
 0x31d   : > { %2215 = vst.msk [vmem:[%s3916_s20 + $0x80] sm:$0xff] %vm2198_vm12, %v3979_v20 }
 0x31f   : > { %v1680_v47 = vpop.permute.xlu1 %1679 }
 0x320   : > { %1749 = vst.msk [vmem:[#allocation3 + $0xd8] sm:$0xff] %vm1721_vm9, %v1680_v47  ;;  %v1873_v1 = vpop.permute.xlu0 %1872 }
 0x321   : > { %1942 = vst.msk [vmem:[#allocation3 + $0xd8] sm:$0xff] %vm1914_vm10, %v1873_v1  ;;  %v1968_v19 = vld [vmem:[#allocation3 + $0xa8] sm:$0xff]  ;;  %v2310_v1 = vmul.f32 %v3948_v32, %v3948_v32 }
 0x322   : > { %2580 = vmatmul.msk.f32.gmra.mxu2 %vm1984_vm11, %v1968_v19 }
 0x323   : > { %v1849_v36 = vpop.permute.xlu2 %1848 }
 0x326   : > { %v2114_v22 = vpop.f32.mrf.mxu0 }
 0x327   : > { %v1463_v25 = vpop.permute.xlu1 %1462  ;;  %2203 = vst.msk [vmem:[%s3916_s20 + $0x20] sm:$0xff] %vm2198_vm12, %v2114_v22  ;;  %v2238_v35 = vsel %vm2198_vm12, %v2114_v22, 0.0  ;;  %v2306_v61 = vmul.f32 %v2114_v22, %v2114_v22 }
 0x328   : > { %1544 = vst.msk [vmem:[#allocation3 + $0x78] sm:$0xff] %vm1528_vm8, %v1463_v25  ;;  %v2239_v29 = vadd.f32 %v2238_v35, %v2237_v13  ;;  %v1477_v58 = vpop.permute.xlu0 %1476  ;;  %v1974_v51 = vld [vmem:[#allocation3 + $0xd8] sm:$0xff]  ;;  %v2246_v25 = vsel %vm2198_vm12, %v3948_v32, 0.0  ;;  %v2311_v35 = vmul.f32 %v3970_v55, %v3970_v55 }
 0x329   : > { %1737 = vst.msk [vmem:[#allocation3 + $0x78] sm:$0xff] %vm1721_vm9, %v1656_v11  ;;  %v2341_v5 = vsel %vm2198_vm12, %v2306_v61, 0.0  ;;  %2586 = vmatmul.msk.f32.gmra.mxu3 %vm1984_vm11, %v1974_v51  ;;  %v2349_v51 = vsel %vm2198_vm12, %v2310_v1, 0.0 }
 0x32a   : > { %v2342_v41 = vadd.f32 %v2341_v5, %v2340_v10  ;;  %1551 = vst.msk [vmem:[#allocation3 + $0xb0] sm:$0xff] %vm1528_vm8, %v1477_v58  ;;  %v2248_v5 = vsel %vm2198_vm12, %v3970_v55, 0.0  ;;  %v2351_v32 = vsel %vm2198_vm12, %v2311_v35, 0.0 }
 0x32b   : > { %1930 = vst.msk [vmem:[#allocation3 + $0x78] sm:$0xff] %vm1914_vm10, %v1849_v36  ;;  %v1863_v42 = vpop.permute.xlu2 %1862 }
 0x32d   : > { %v3996_v39 = vpop.f32.mrf.mxu1 }
 0x32e   : > { %2209 = vst.msk [vmem:[%s3916_s20 + $0x50] sm:$0xff] %vm2198_vm12, %v3996_v39 }
 0x32f   : > { %v1489_v27 = vpop.permute.xlu1 %1488 }
 0x330   : > { %1557 = vst.msk [vmem:[#allocation3 + $0xe0] sm:$0xff] %vm1528_vm8, %v1489_v27  ;;  %v1670_v7 = vpop.permute.xlu0 %1669 }
 0x331   : > { %1744 = vst.msk [vmem:[#allocation3 + $0xb0] sm:$0xff] %vm1721_vm9, %v1670_v7  ;;  %v2250_v7 = vsel %vm2198_vm12, %v3996_v39, 0.0 }
 0x332   : > { %1937 = vst.msk [vmem:[#allocation3 + $0xb0] sm:$0xff] %vm1914_vm10, %v1863_v42  ;;  %v1962_v9 = vld [vmem:[#allocation3 + $0x78] sm:$0xff] }
 0x333   : > { %2574 = vmatmul.msk.f32.gmra.mxu1 %vm1984_vm11, %v1962_v9  ;;  %v1479_v23 = vpop.permute.xlu2 %1478 }
 0x334   : > { %v4005_v63 = vpop.f32.mrf.mxu2  ;;  %1552 = vst.msk [vmem:[#allocation3 + $0xb8] sm:$0xff] %vm1528_vm8, %v1479_v23 }
 0x335   : > { %2216 = vst.msk [vmem:[%s3916_s20 + $0x88] sm:$0xff] %vm2198_vm12, %v4005_v63 }
 0x337   : > { %v1682_v45 = vpop.permute.xlu1 %1681 }
 0x338   : > { %1750 = vst.msk [vmem:[#allocation3 + $0xe0] sm:$0xff] %vm1721_vm9, %v1682_v45  ;;  %v1875_v14 = vpop.permute.xlu0 %1874 }
 0x339   : > { %1943 = vst.msk [vmem:[#allocation3 + $0xe0] sm:$0xff] %vm1914_vm10, %v1875_v14  ;;  %v1969_v0 = vld [vmem:[#allocation3 + $0xb0] sm:$0xff] }
 0x33a   : > { %2581 = vmatmul.msk.f32.gmra.mxu2 %vm1984_vm11, %v1969_v0 }
 0x33b   : > { %v1684_v30 = vpop.permute.xlu2 %1683 }
 0x33f   : > { %v1297_v4 = vpop.permute.xlu1 %1296  ;;  %v4014_v3 = vpop.f32.mrf.mxu1 }
 0x340   : > { %1364 = vst.msk [vmem:[#allocation3 + $0xe8] sm:$0xff] %vm1334_vm6, %v1297_v4  ;;  %v1491_v8 = vpop.permute.xlu0 %1490  ;;  %v1975_v6 = vld [vmem:[#allocation3 + $0xe0] sm:$0xff]  ;;  %v2313_v9 = vmul.f32 %v4014_v3, %v4014_v3  ;;  %v2252_v55 = vsel %vm2198_vm12, %v4014_v3, 0.0 }
 0x341   : > { %1558 = vst.msk [vmem:[#allocation3 + $0xe8] sm:$0xff] %vm1528_vm8, %v1491_v8  ;;  %2587 = vmatmul.msk.f32.gmra.mxu3 %vm1984_vm11, %v1975_v6 }
 0x342   : > { %2210 = vst.msk [vmem:[%s3916_s20 + $0x58] sm:$0xff] %vm2198_vm12, %v4014_v3 }
 0x343   : > { %1751 = vst.msk [vmem:[#allocation3 + $0xe8] sm:$0xff] %vm1721_vm9, %v1684_v30  ;;  %v1299_v15 = vpop.permute.xlu2 %1298 }
 0x344   : > { %1365 = vst.msk [vmem:[#allocation3 + $0xf0] sm:$0xff] %vm1334_vm6, %v1299_v15 }
 0x345   : > { %v2117_v28 = vpop.f32.mrf.mxu0 }
 0x346   : > { %2204 = vst.msk [vmem:[%s3916_s20 + $0x28] sm:$0xff] %vm2198_vm12, %v2117_v28  ;;  %v2240_v16 = vsel %vm2198_vm12, %v2117_v28, 0.0  ;;  %v2307_v17 = vmul.f32 %v2117_v28, %v2117_v28 }
 0x347   : > { %v2241_v34 = vadd.f32 %v2240_v16, %v2239_v29  ;;  %v1672_v21 = vpop.permute.xlu1 %1671 }
 0x348   : > { %v2343_v26 = vsel %vm2198_vm12, %v2307_v17, 0.0  ;;  %1745 = vst.msk [vmem:[#allocation3 + $0xb8] sm:$0xff] %vm1721_vm9, %v1672_v21  ;;  %v1865_v40 = vpop.permute.xlu0 %1864 }
 0x349   : > { %v2344_v18 = vadd.f32 %v2343_v26, %v2342_v41  ;;  %1938 = vst.msk [vmem:[#allocation3 + $0xb8] sm:$0xff] %vm1914_vm10, %v1865_v40  ;;  %v2312_v41 = vmul.f32 %v3996_v39, %v3996_v39  ;;  %v2355_v39 = vsel %vm2198_vm12, %v2313_v9, 0.0 }
 0x34b   : > { %v1879_v37 = vpop.permute.xlu2 %1878  ;;  %v2353_v0 = vsel %vm2198_vm12, %v2312_v41, 0.0 }
 0x34d   : > { %v4030_v24 = vpop.f32.mrf.mxu2 }
 0x34e   : > { %2217 = vst.msk [vmem:[%s3916_s20 + $0x90] sm:$0xff] %vm2198_vm12, %v4030_v24 }
 0x34f   : > { %v1877_v46 = vpop.permute.xlu1 %1876 }
 0x350   : > { %1944 = vst.msk [vmem:[#allocation3 + $0xe8] sm:$0xff] %vm1914_vm10, %v1877_v46  ;;  %v1493_v31 = vpop.permute.xlu0 %1492  ;;  %v1970_v38 = vld [vmem:[#allocation3 + $0xb8] sm:$0xff] }
 0x351   : > { %1559 = vst.msk [vmem:[#allocation3 + $0xf0] sm:$0xff] %vm1528_vm8, %v1493_v31  ;;  %2582 = vmatmul.msk.f32.gmra.mxu2 %vm1984_vm11, %v1970_v38 }
 0x353   : > { %v1688_v49 = vpop.permute.xlu2 %1687 }
 0x354   : > { %v4038_v50 = vpop.f32.mrf.mxu3 }
 0x355   : > { %2223 = vst.msk [vmem:[%s3916_s20 + $0xc0] sm:$0xff] %vm2198_vm12, %v4038_v50 }
 0x357   : > { %v1686_v44 = vpop.permute.xlu1 %1685  ;;  %v1976_v54 = vld [vmem:[#allocation3 + $0xe8] sm:$0xff] }
 0x358   : > { %1752 = vst.msk [vmem:[#allocation3 + $0xf0] sm:$0xff] %vm1721_vm9, %v1686_v44  ;;  %2588 = vmatmul.msk.f32.gmra.mxu3 %vm1984_vm11, %v1976_v54  ;;  %v1301_v43 = vpop.permute.xlu0 %1300 }
 0x359   : > { %1945 = vst.msk [vmem:[#allocation3 + $0xf0] sm:$0xff] %vm1914_vm10, %v1879_v37 }
 0x35a   : > { %1366 = vst.msk [vmem:[#allocation3 + $0xf8] sm:$0xff] %vm1334_vm6, %v1301_v43 }
 0x35f   : > { %v1495_v57 = vpop.permute.xlu1 %1494  ;;  %v2138_v53 = vpop.f32.mrf.mxu1 }
 0x360   : > { %1560 = vst.msk [vmem:[#allocation3 + $0xf8] sm:$0xff] %vm1528_vm8, %v1495_v57  ;;  %v1881_v48 = vpop.permute.xlu0 %1880  ;;  %v1977_v60 = vld [vmem:[#allocation3 + $0xf0] sm:$0xff]  ;;  %v2314_v30 = vmul.f32 %v2138_v53, %v2138_v53  ;;  %v2254_v6 = vsel %vm2198_vm12, %v2138_v53, 0.0  ;;  %v2318_v57 = vmul.f32 %v3979_v20, %v3979_v20 }
 0x361   : > { %1753 = vst.msk [vmem:[#allocation3 + $0xf8] sm:$0xff] %vm1721_vm9, %v1688_v49  ;;  %2589 = vmatmul.msk.f32.gmra.mxu3 %vm1984_vm11, %v1977_v60 }
 0x362   : > { %1946 = vst.msk [vmem:[#allocation3 + $0xf8] sm:$0xff] %vm1914_vm10, %v1881_v48  ;;  %v2357_v17 = vsel %vm2198_vm12, %v2314_v30, 0.0 }
 0x363   : > { %2211 = vst.msk [vmem:[%s3916_s20 + $0x60] sm:$0xff] %vm2198_vm12, %v2138_v53 }
 0x365   : > { %v2120_v13 = vpop.f32.mrf.mxu0 }
 0x366   : > { %2205 = vst.msk [vmem:[%s3916_s20 + $0x30] sm:$0xff] %vm2198_vm12, %v2120_v13  ;;  %v2242_v52 = vsel %vm2198_vm12, %v2120_v13, 0.0  ;;  %v2308_v56 = vmul.f32 %v2120_v13, %v2120_v13 }
 0x367   : > { %v2243_v2 = vadd.f32 %v2242_v52, %v2241_v34  ;;  %v2262_v52 = vsel %vm2198_vm12, %v3979_v20, 0.0  ;;  %v2266_v20 = vsel %vm2198_vm12, %v4030_v24, 0.0 }
 0x368   : > { %v2345_v10 = vsel %vm2198_vm12, %v2308_v56, 0.0  ;;  %v2319_v56 = vmul.f32 %v4005_v63, %v4005_v63 }
 0x369   : > { %v2346_v62 = vadd.f32 %v2345_v10, %v2344_v18  ;;  %v1978_v12 = vld [vmem:[#allocation3 + $0xf8] sm:$0xff] }
 0x36a   : > { %2590 = vmatmul.msk.f32.gmra.mxu3 %vm1984_vm11, %v1978_v12  ;;  %v2365_v12 = vsel %vm2198_vm12, %v2318_v57, 0.0 }
 0x36d   : > { %v4058_v59 = vpop.f32.mrf.mxu2 }
 0x36e   : > { %2218 = vst.msk [vmem:[%s3916_s20 + $0x98] sm:$0xff] %vm2198_vm12, %v4058_v59 }
 0x375   : > { %v4063_v33 = vpop.f32.mrf.mxu3 }
 0x376   : > { %2224 = vst.msk [vmem:[%s3916_s20 + $0xc8] sm:$0xff] %vm2198_vm12, %v4063_v33 }
 0x380   : > { %v2141_v11 = vpop.f32.mrf.mxu1 }
 0x381   : > { %2212 = vst.msk [vmem:[%s3916_s20 + $0x68] sm:$0xff] %vm2198_vm12, %v2141_v11  ;;  %v2315_v15 = vmul.f32 %v2141_v11, %v2141_v11  ;;  %v2256_v3 = vsel %vm2198_vm12, %v2141_v11, 0.0  ;;  %v2264_v11 = vsel %vm2198_vm12, %v4005_v63, 0.0  ;;  %v2268_v63 = vsel %vm2198_vm12, %v4058_v59, 0.0 }
 0x383   : > { %v2359_v26 = vsel %vm2198_vm12, %v2315_v15, 0.0 }
 0x385   : > { %v2123_v47 = vpop.f32.mrf.mxu0 }
 0x386   : > { %2206 = vst.msk [vmem:[%s3916_s20 + $0x38] sm:$0xff] %vm2198_vm12, %v2123_v47  ;;  %v2244_v19 = vsel %vm2198_vm12, %v2123_v47, 0.0  ;;  %v2309_v36 = vmul.f32 %v2123_v47, %v2123_v47  ;;  %v2320_v47 = vmul.f32 %v4030_v24, %v4030_v24 }
 0x387   : > { %v2245_v22 = vadd.f32 %v2244_v19, %v2243_v2 }
 0x388   : > { %v2347_v61 = vsel %vm2198_vm12, %v2309_v36, 0.0  ;;  %v2367_v36 = vsel %vm2198_vm12, %v2319_v56, 0.0 }
 0x389   : > { %v2247_v29 = vadd.f32 %v2246_v25, %v2245_v22  ;;  %v2348_v58 = vadd.f32 %v2347_v61, %v2346_v62  ;;  %v2321_v22 = vmul.f32 %v4058_v59, %v4058_v59  ;;  %v2369_v61 = vsel %vm2198_vm12, %v2320_v47, 0.0 }
 0x38b   : > { %v2249_v42 = vadd.f32 %v2248_v5, %v2247_v29  ;;  %v2350_v27 = vadd.f32 %v2349_v51, %v2348_v58  ;;  %v2371_v5 = vsel %vm2198_vm12, %v2321_v22, 0.0 }
 0x38d   : > { %v2251_v23 = vadd.f32 %v2250_v7, %v2249_v42  ;;  %v2352_v45 = vadd.f32 %v2351_v32, %v2350_v27  ;;  %v2162_v14 = vpop.f32.mrf.mxu2 }
 0x38e   : > { %2219 = vst.msk [vmem:[%s3916_s20 + $0xa0] sm:$0xff] %vm2198_vm12, %v2162_v14  ;;  %v2322_v29 = vmul.f32 %v2162_v14, %v2162_v14  ;;  %v2270_v41 = vsel %vm2198_vm12, %v2162_v14, 0.0 }
 0x38f   : > { %v2354_v4 = vadd.f32 %v2353_v0, %v2352_v45  ;;  %v2253_v8 = vadd.f32 %v2252_v55, %v2251_v23 }
 0x390   : > { %v2373_v27 = vsel %vm2198_vm12, %v2322_v29, 0.0 }
 0x391   : > { %v2255_v28 = vadd.f32 %v2254_v6, %v2253_v8  ;;  %v2356_v16 = vadd.f32 %v2355_v39, %v2354_v4  ;;  %v2326_v6 = vmul.f32 %v4038_v50, %v4038_v50 }
 0x393   : > { %v2257_v34 = vadd.f32 %v2256_v3, %v2255_v28  ;;  %v2358_v21 = vadd.f32 %v2357_v17, %v2356_v16  ;;  %v2278_v3 = vsel %vm2198_vm12, %v4038_v50, 0.0 }
 0x394   : > { %v4100_v40 = vpop.f32.mrf.mxu3 }
 0x395   : > { %v2360_v18 = vadd.f32 %v2359_v26, %v2358_v21  ;;  %2225 = vst.msk [vmem:[%s3916_s20 + $0xd0] sm:$0xff] %vm2198_vm12, %v4100_v40  ;;  %v2282_v50 = vsel %vm2198_vm12, %v4100_v40, 0.0 }
 0x398   : > { %v2144_v46 = vpop.f32.mrf.mxu1 }
 0x399   : > { %2213 = vst.msk [vmem:[%s3916_s20 + $0x70] sm:$0xff] %vm2198_vm12, %v2144_v46  ;;  %v2316_v38 = vmul.f32 %v2144_v46, %v2144_v46  ;;  %v2258_v44 = vsel %vm2198_vm12, %v2144_v46, 0.0  ;;  %v2381_v46 = vsel %vm2198_vm12, %v2326_v6, 0.0 }
 0x39a   : > { %v2259_v43 = vadd.f32 %v2258_v44, %v2257_v34  ;;  %v2327_v34 = vmul.f32 %v4063_v33, %v4063_v33 }
 0x39b   : > { %v2361_v54 = vsel %vm2198_vm12, %v2316_v38, 0.0  ;;  %v2328_v38 = vmul.f32 %v4100_v40, %v4100_v40 }
 0x39c   : > { %v2362_v53 = vadd.f32 %v2361_v54, %v2360_v18 }
 0x3a5   : > { %v2165_v31 = vpop.f32.mrf.mxu2 }
 0x3a6   : > { %2220 = vst.msk [vmem:[%s3916_s20 + $0xa8] sm:$0xff] %vm2198_vm12, %v2165_v31  ;;  %v2323_v59 = vmul.f32 %v2165_v31, %v2165_v31  ;;  %v2272_v23 = vsel %vm2198_vm12, %v2165_v31, 0.0  ;;  %v2280_v31 = vsel %vm2198_vm12, %v4063_v33, 0.0 }
 0x3a8   : > { %v2375_v55 = vsel %vm2198_vm12, %v2323_v59, 0.0 }
 0x3ac   : > { %v4109_v37 = vpop.f32.mrf.mxu3 }
 0x3ad   : > { %2226 = vst.msk [vmem:[%s3916_s20 + $0xd8] sm:$0xff] %vm2198_vm12, %v4109_v37  ;;  %v2329_v33 = vmul.f32 %v4109_v37, %v4109_v37 }
 0x3af   : > { %v2387_v56 = vsel %vm2198_vm12, %v2329_v33, 0.0 }
 0x3b0   : > { %v2147_v49 = vpop.f32.mrf.mxu1 }
 0x3b1   : > { %2214 = vst.msk [vmem:[%s3916_s20 + $0x78] sm:$0xff] %vm2198_vm12, %v2147_v49  ;;  %v2260_v48 = vsel %vm2198_vm12, %v2147_v49, 0.0  ;;  %v2317_v60 = vmul.f32 %v2147_v49, %v2147_v49 }
 0x3b2   : > { %v2261_v13 = vadd.f32 %v2260_v48, %v2259_v43  ;;  %v2383_v43 = vsel %vm2198_vm12, %v2327_v34, 0.0 }
 0x3b3   : > { %v2363_v2 = vsel %vm2198_vm12, %v2317_v60, 0.0  ;;  %v2385_v60 = vsel %vm2198_vm12, %v2328_v38, 0.0 }
 0x3b4   : > { %v2263_v10 = vadd.f32 %v2262_v52, %v2261_v13  ;;  %v2364_v62 = vadd.f32 %v2363_v2, %v2362_v53  ;;  %v2284_v13 = vsel %vm2198_vm12, %v4109_v37, 0.0 }
 0x3b6   : > { %v2265_v1 = vadd.f32 %v2264_v11, %v2263_v10  ;;  %v2366_v19 = vadd.f32 %v2365_v12, %v2364_v62 }
 0x3b8   : > { %v2267_v25 = vadd.f32 %v2266_v20, %v2265_v1  ;;  %v2368_v35 = vadd.f32 %v2367_v36, %v2366_v19 }
 0x3ba   : > { %v2370_v58 = vadd.f32 %v2369_v61, %v2368_v35  ;;  %v2269_v51 = vadd.f32 %v2268_v63, %v2267_v25 }
 0x3bc   : > { %v2271_v42 = vadd.f32 %v2270_v41, %v2269_v51  ;;  %v2372_v24 = vadd.f32 %v2371_v5, %v2370_v58 }
 0x3bd   : > { %v2168_v32 = vpop.f32.mrf.mxu2 }
 0x3be   : > { %2221 = vst.msk [vmem:[%s3916_s20 + $0xb0] sm:$0xff] %vm2198_vm12, %v2168_v32  ;;  %v2374_v7 = vadd.f32 %v2373_v27, %v2372_v24  ;;  %v2324_v45 = vmul.f32 %v2168_v32, %v2168_v32  ;;  %v2273_v0 = vadd.f32 %v2272_v23, %v2271_v42  ;;  %v2274_v14 = vsel %vm2198_vm12, %v2168_v32, 0.0 }
 0x3c0   : > { %v2376_v30 = vadd.f32 %v2375_v55, %v2374_v7  ;;  %v2377_v4 = vsel %vm2198_vm12, %v2324_v45, 0.0  ;;  %v2275_v8 = vadd.f32 %v2274_v14, %v2273_v0 }
 0x3c2   : > { %v2378_v16 = vadd.f32 %v2377_v4, %v2376_v30 }
 0x3c4   : > { %v2186_v9 = vpop.f32.mrf.mxu3 }
 0x3c5   : > { %2227 = vst.msk [vmem:[%s3916_s20 + $0xe0] sm:$0xff] %vm2198_vm12, %v2186_v9  ;;  %v2330_v2 = vmul.f32 %v2186_v9, %v2186_v9  ;;  %v2286_v10 = vsel %vm2198_vm12, %v2186_v9, 0.0 }
 0x3c7   : > { %v2389_v11 = vsel %vm2198_vm12, %v2330_v2, 0.0 }
 0x3d4   : > { %v2171_v39 = vpop.f32.mrf.mxu2 }
 0x3d5   : > { %2222 = vst.msk [vmem:[%s3916_s20 + $0xb8] sm:$0xff] %vm2198_vm12, %v2171_v39  ;;  %v2276_v15 = vsel %vm2198_vm12, %v2171_v39, 0.0  ;;  %v2325_v28 = vmul.f32 %v2171_v39, %v2171_v39 }
 0x3d6   : > { %v2277_v17 = vadd.f32 %v2276_v15, %v2275_v8 }
 0x3d7   : > { %v2379_v21 = vsel %vm2198_vm12, %v2325_v28, 0.0 }
 0x3d8   : > { %v2279_v26 = vadd.f32 %v2278_v3, %v2277_v17  ;;  %v2380_v18 = vadd.f32 %v2379_v21, %v2378_v16 }
 0x3da   : > { %v2281_v44 = vadd.f32 %v2280_v31, %v2279_v26  ;;  %v2382_v54 = vadd.f32 %v2381_v46, %v2380_v18 }
 0x3db   : > { %v2189_v49 = vpop.f32.mrf.mxu3 }
 0x3dc   : > { %v2283_v57 = vadd.f32 %v2282_v50, %v2281_v44  ;;  %v2384_v48 = vadd.f32 %v2383_v43, %v2382_v54  ;;  %2228 = vst.msk [vmem:[%s3916_s20 + $0xe8] sm:$0xff] %vm2198_vm12, %v2189_v49  ;;  %v2331_v47 = vmul.f32 %v2189_v49, %v2189_v49  ;;  %v2288_v19 = vsel %vm2198_vm12, %v2189_v49, 0.0 }
 0x3de   : > { %v2386_v53 = vadd.f32 %v2385_v60, %v2384_v48  ;;  %v2285_v52 = vadd.f32 %v2284_v13, %v2283_v57  ;;  %v2391_v20 = vsel %vm2198_vm12, %v2331_v47, 0.0 }
 0x3e0   : > { %v2388_v40 = vadd.f32 %v2387_v56, %v2386_v53  ;;  %v2287_v12 = vadd.f32 %v2286_v10, %v2285_v52 }
 0x3e2   : > { %v2390_v1 = vadd.f32 %v2389_v11, %v2388_v40  ;;  %v2289_v37 = vadd.f32 %v2288_v19, %v2287_v12 }
 0x3e4   : > { %v2192_v62 = vpop.f32.mrf.mxu3  ;;  %v2392_v25 = vadd.f32 %v2391_v20, %v2390_v1 }
 0x3e5   : > { %2229 = vst.msk [vmem:[%s3916_s20 + $0xf0] sm:$0xff] %vm2198_vm12, %v2192_v62  ;;  %v2332_v36 = vmul.f32 %v2192_v62, %v2192_v62  ;;  %v2290_v22 = vsel %vm2198_vm12, %v2192_v62, 0.0 }
 0x3e6   : > { %v2291_v61 = vadd.f32 %v2290_v22, %v2289_v37 }
 0x3e7   : > { %v2393_v35 = vsel %vm2198_vm12, %v2332_v36, 0.0 }
 0x3e8   : > { %v2394_v51 = vadd.f32 %v2393_v35, %v2392_v25 }
 0x3ed   : > { %v2195_v63 = vpop.f32.mrf.mxu3 }
 0x3ee   : > { %2230 = vst.msk [vmem:[%s3916_s20 + $0xf8] sm:$0xff] %vm2198_vm12, %v2195_v63  ;;  %v2292_v29 = vsel %vm2198_vm12, %v2195_v63, 0.0  ;;  %v2333_v58 = vmul.f32 %v2195_v63, %v2195_v63 }
 0x3ef   : > { %v2293_v5 = vadd.f32 %v2292_v29, %v2291_v61 }
 0x3f0   : > { %v2395_v41 = vsel %vm2198_vm12, %v2333_v58, 0.0 }
 0x3f1   : > { %v2294_v42 = vrot.slane %v2293_v5, 4  ;;  %v2396_v24 = vadd.f32 %v2395_v41, %v2394_v51 }
 0x3f3   : > { %v2295_v27 = vadd.f32 %v2294_v42, %v2293_v5  ;;  %v2397_v32 = vrot.slane %v2396_v24, 4 }
 0x3f5   : > { %v2296_v7 = vrot.slane %v2295_v27, 2  ;;  %v2398_v9 = vadd.f32 %v2397_v32, %v2396_v24 }
 0x3f7   : > { %v2297_v59 = vadd.f32 %v2296_v7, %v2295_v27  ;;  %v2399_v23 = vrot.slane %v2398_v9, 2 }
 0x3f9   : > { %v2298_v45 = vrot.slane %v2297_v59, 1  ;;  %v2400_v0 = vadd.f32 %v2399_v23, %v2398_v9 }
 0x3fb   : > { %v2299_v55 = vadd.f32 %v2298_v45, %v2297_v59  ;;  %v2401_v14 = vrot.slane %v2400_v0, 1 }
 0x3fd   : > { %2301 = vst.msk [vmem:[%s200_s23] sm:$0x1] %vm2300_vm13, %v2299_v55  ;;  %v2402_v30 = vadd.f32 %v2401_v14, %v2400_v0 }
 0x3fe   : > { %2690 = shalt.err (!%p2687_p3)
}
 0x3ff   : > { %2610 = dma.vmem_to_hbm [thread:$0]  (%p2831_p5), %s2428_s27, 16, %s2430_s30, %s2410_s19   ;;  %2403 = vst.msk [vmem:[%s206_s5] sm:$0x1] %vm2300_vm13, %v2402_v30 }
 0x400   : > { %s2414_s12 = scalar_lea.sflag [#allocation7], %s4189_s28  ;;  %s2705_s13 = sshra.s32 %s2443_s7, 4  ;;  %s2706_s13 = int_to_ptr.hbm [resolvable:$true] %s2705_s13 }
 0x401   : > { %s2707_s22 = scalar_lea.hbm %s2706_s13, 1  ;;  %s2711_s9 = scalar_lea.hbm %s4264_s4, 2 }
 0x402   : > { %p2708_p4 = scmp.ne.s32.totalorder %s2706_s13, %s2707_s22  ;;  %p2712_p9 = scmp.lt.s32.totalorder %s2706_s13, %s4264_s4 }
 0x403   : > { %p2713_p10 = scmp.lt.s32.totalorder %s2711_s9, %s2707_s22 }
 0x404   : > { %p2709_p7 = pnand %p2708_p4, %p2831_p5 }
 0x405   : > { %p2714_p11 = por %p2713_p10, %p2712_p9 }
 0x406   : > { %p2710_p8 = pneg %p2709_p7 }
 0x408   : > { %p2715_p12 = pnand %p2714_p11, %p2710_p8 }
 0x40a   : > { %2718 = shalt.err (!%p2715_p12)
}
 0x40b   : > { %2611 = dma.vmem_to_hbm [thread:$0]  (%p2831_p5), %s2441_s6, 16, %s2443_s7, %s2414_s12  }
 0x40c PF: > { %p2621_p13 = scmp.ge.s32.totalorder %s2757_s18, 2  ;;  %s2462_s28 = sand.u32 1, %s2745_s15  }
 0x40d   : > { %s2463_s27 = scalar_lea.sflag [#allocation5], %s2462_s28 }
 0x40e   : > { %p2615_p0 = pnand %p2621_p13, %p2835_p6 }
 0x410   : > { %p2616_p1 = pneg %p2615_p0 }
 0x412   : > { %2736 = dma.done.wait (%p2616_p1), %s2463_s27, 16  }
 0x413   : > { %2738 = vsyncadd (%p2616_p1), %s2463_s27, 4294967280  ;;  %s2472_s30 = scalar_lea.sflag [#allocation7], %s2462_s28 }
 0x414   : > { %2740 = dma.done.wait (%p2616_p1), %s2472_s30, 16  }
 0x415   : > { %2742 = vsyncadd (%p2616_p1), %s2472_s30, 4294967280  ;;  %p18_p5 = scmp.ge.s32.totalorder %s2818_s21, 4   ;;  %s4354_s15 = smov %s2749_s16 }
 0x416   : > { %s4355_s16 = smov %s2753_s17  ;;  %s4356_s17 = smov %s2829_s24 }
 0x417   : > { %s4357_s18 = smov %s2818_s21  ;;  %20 = sbr.rel (!%p18_p5) target bundleno = 5 (0x5), region = 94 }
 0x41c   :  { %2477 = vsyncpa [#allocation5], 1 }
 0x41d   :  { %2479 = vsyncpa [#allocation5 + $0x1], 1 }
 0x41e   :  { %2480 = vsyncpa [#allocation7], 1 }
 0x41f   :  { %2482 = vsyncpa [#allocation7 + $0x1], 1 }

</bundles_post_ra>
